<compile_context>
chip_gen: v7x
topology: tpu7x:2x2x1
jax: 0.10.0
libtpu: 0.0.40
codegen_flags: <defaults>
</compile_context>

<pallas_src>
import jax
import jax.numpy as jnp
from jax import lax
from jax.experimental import pallas as pl
from jax.experimental.pallas import tpu as pltpu

# ----------------------------- sizes -----------------------------
B = 2            # batch
N = 16           # seq length == joints == Conv1d channels == adjacency size
F = 256          # feature dim (2048 in original)
D = 64           # d_model (512 in original)
H = 8            # attention heads
HD = D // H      # head dim
DEPTH = 2        # transformer blocks (n_layers)
MLP = 4 * D      # mlp hidden dim


# ------------------------ math helpers (kernel + reference) ------------------------
def _erf(x, recip=None):
    # Abramowitz & Stegun 7.1.26, |err| < 1.5e-7 (exp + arithmetic only -> Mosaic-safe).
    a1, a2, a3, a4, a5 = 0.254829592, -0.284496736, 1.421413741, -1.453152027, 1.061405429
    pco = 0.3275911
    s = jnp.where(x >= 0.0, 1.0, -1.0)
    ax = jnp.abs(x)
    den = 1.0 + pco * ax
    t = recip(den) if recip is not None else 1.0 / den
    poly = ((((a5 * t + a4) * t + a3) * t + a2) * t + a1) * t
    return s * (1.0 - poly * jnp.exp(-ax * ax))


def _gelu(x, recip=None):
    # exact (erf-based) GELU, matching torch.nn.GELU default
    return 0.5 * x * (1.0 + _erf(x * 0.7071067811865476, recip))


def _layernorm(x, w, b, eps=1e-6):
    mu = jnp.mean(x, axis=-1, keepdims=True)
    var = jnp.mean(jnp.square(x - mu), axis=-1, keepdims=True)
    return (x - mu) * lax.rsqrt(var + eps) * w + b


# ------------------------ fused kernel: whole forward for one batch element ------------------------
def _model_kernel(x_ref, wc_ref, wg_ref, m_ref, adj_ref, gb_ref,
                  projw_ref, posb_ref, hmask_ref,
                  ln1w_ref, ln1b_ref, qkvw_ref, qkvb_ref, aw_ref, ab_ref,
                  ln2w_ref, ln2b_ref, f1w_ref, f1b_ref, f2w_ref, f2b_ref,
                  lnfw_ref, lnfb_ref, ow_ref, ob_ref, o_ref):
    f32 = jnp.float32
    bf16 = jnp.bfloat16
    recip = lambda v: pl.reciprocal(v, approx=True)

    x = x_ref[0]                                                   # (N, F) f32

    # -------- branch 1: Conv1d(16,16,k=3,p=1,no-bias) + ModulatedGraphConv + residual --------
    zcol = jnp.zeros((N, 1), f32)
    x_r = jnp.concatenate([zcol, x[:, :F - 1]], axis=1)            # x[:, w-1] (zero pad at w=0)
    x_l = jnp.concatenate([x[:, 1:], zcol], axis=1)                # x[:, w+1] (zero pad at w=F-1)
    x_stack = jnp.concatenate([x_r, x, x_l], axis=0)               # (3N, F)
    xt = jnp.dot(wc_ref[...], x_stack, preferred_element_type=f32)  # (N, F)  x_trr (one merged matmul)

    # GCN: h0/h1 from one (F,2F) matmul, both adjacency matmuls merged into one (N,2N) matmul.
    h01 = jnp.dot(xt, wg_ref[...].astype(f32), preferred_element_type=f32)   # (N, 2F)
    mh = m_ref[...] * h01
    mh_stack = jnp.concatenate([mh[:, :F], mh[:, F:]], axis=0)               # (2N, F)
    gcn = jnp.dot(adj_ref[...], mh_stack, preferred_element_type=f32) + gb_ref[...]
    x_all = gcn + xt                                               # gcn16(x_trr) + x_trr (stays in VMEM)

    # -------- branch 2: proj -> Transformer (DEPTH blocks) -> out_proj --------
    h = jnp.dot(x.astype(bf16), projw_ref[...], preferred_element_type=f32) + posb_ref[...]

    hmask = hmask_ref[...]                                         # (H*N, D) block-diag head mask
    ln1w, ln1b = ln1w_ref[...], ln1b_ref[...]
    qkvw, qkvb = qkvw_ref[...], qkvb_ref[...]
    aw, ab = aw_ref[...], ab_ref[...]
    ln2w, ln2b = ln2w_ref[...], ln2b_ref[...]
    f1w, f1b = f1w_ref[...], f1b_ref[...]
    f2w, f2b = f2w_ref[...], f2b_ref[...]
    scale = 1.0 / (HD ** 0.5)

    for d in range(DEPTH):                                         # static unroll over blocks
        # --- attention: all H heads batched along the sublane axis ---
        y = _layernorm(h, ln1w[d:d + 1], ln1b[d:d + 1])
        qkv = jnp.dot(y.astype(bf16), qkvw[d], preferred_element_type=f32) + qkvb[d:d + 1]  # (N, 3D)
        q = qkv[:, 0:D]
        k = qkv[:, D:2 * D]
        v = qkv[:, 2 * D:3 * D]
        # row h*N+n of q_bd keeps only head h's feature lanes of q[n]
        q_bd = jnp.concatenate([q] * H, axis=0) * hmask            # (H*N, D)
        s = lax.dot_general(q_bd, k, (((1,), (1,)), ((), ())),
                            preferred_element_type=f32) * scale    # (H*N, N): all head scores stacked
        s_max = jnp.max(s, axis=-1, keepdims=True)
        pexp = jnp.exp(s - s_max)
        psum = jnp.sum(pexp, axis=-1, keepdims=True)
        pattn = pexp * recip(psum)                                 # ONE softmax for all heads
        o_stack = jnp.dot(pattn, v, preferred_element_type=f32) * hmask     # (H*N, D)
        att = o_stack[0:N]
        for hh in range(1, H):                                     # merge heads (block-diagonal pick)
            att = att + o_stack[hh * N:(hh + 1) * N]
        att = jnp.dot(att.astype(bf16), aw[d], preferred_element_type=f32) + ab[d:d + 1]
        h = h + att                                                # dropout / drop_path = identity
        # --- MLP ---
        y2 = _layernorm(h, ln2w[d:d + 1], ln2b[d:d + 1])
        m1 = _gelu(jnp.dot(y2.astype(bf16), f1w[d], preferred_element_type=f32) + f1b[d:d + 1],
                   recip)
        m2 = jnp.dot(m1.astype(bf16), f2w[d], preferred_element_type=f32) + f2b[d:d + 1]
        h = h + m2

    h = _layernorm(h, lnfw_ref[...], lnfb_ref[...])                # final Transformer norm
    out = jnp.dot(h.astype(bf16), ow_ref[...], preferred_element_type=f32) + ob_ref[...]
    o_ref[0] = out + x_all                                         # x = out_proj(trans(proj(x))) + x_all


# ------------------------ pallas_call wrapper ------------------------
def _batched_spec():
    return pl.BlockSpec((1, N, F), lambda b: (b, 0, 0))


def _full_spec(shape):
    nd = len(shape)
    return pl.BlockSpec(shape, lambda b, _n=nd: (0,) * _n)


@jax.jit
def model_forward(x, p):
    in_specs = [
        _batched_spec(),                    # x
        _full_spec((N, 3 * N)),             # merged conv weight  [W[:,:,0] | W[:,:,1] | W[:,:,2]]
        _full_spec((F, 2 * F)),             # merged gcn W (bf16)
        _full_spec((N, 2 * F)),             # gcn M tiled [M | M]
        _full_spec((N, 2 * N)),             # [adj*E | adj*(1-E)]
        _full_spec((1, F)),                 # gcn bias
        _full_spec((F, D)),                 # proj W (bf16)
        _full_spec((N, D)),                 # pos_embed + proj bias
        _full_spec((H * N, D)),             # block-diagonal head mask
        _full_spec((DEPTH, D)),             # ln1 w
        _full_spec((DEPTH, D)),             # ln1 b
        _full_spec((DEPTH, D, 3 * D)),      # qkv W (bf16)
        _full_spec((DEPTH, 3 * D)),         # qkv b
        _full_spec((DEPTH, D, D)),          # attn proj W (bf16)
        _full_spec((DEPTH, D)),             # attn proj b
        _full_spec((DEPTH, D)),             # ln2 w
        _full_spec((DEPTH, D)),             # ln2 b
        _full_spec((DEPTH, D, MLP)),        # fc1 W (bf16)
        _full_spec((DEPTH, MLP)),           # fc1 b
        _full_spec((DEPTH, MLP, D)),        # fc2 W (bf16)
        _full_spec((DEPTH, D)),             # fc2 b
        _full_spec((1, D)),                 # final ln w
        _full_spec((1, D)),                 # final ln b
        _full_spec((D, F)),                 # out_proj W (bf16)
        _full_spec((1, F)),                 # out_proj b
    ]
    out = pl.pallas_call(
        _model_kernel,
        out_shape=jax.ShapeDtypeStruct((B, N, F), jnp.float32),
        grid_spec=pltpu.PrefetchScalarGridSpec(
            num_scalar_prefetch=0, grid=(B,), in_specs=in_specs, out_specs=_batched_spec()),
        compiler_params=pltpu.CompilerParams(dimension_semantics=("parallel",)),
    )(x, p["wc"], p["wg"], p["gcn_m"], p["adj"], p["gcn_b"],
      p["projw"], p["posb"], p["hmask"],
      p["ln1w"], p["ln1b"], p["qkvw"], p["qkvb"], p["aw"], p["ab"],
      p["ln2w"], p["ln2b"], p["f1w"], p["f1b"], p["f2w"], p["f2b"],
      p["lnfw"], p["lnfb"], p["ow"], p["ob"])
    # TODO(synk): self.regressor is a SPIN SMPL Regressor loaded from an external
    # checkpoint and is not defined in the provided source; output is the
    # pre-regressor feature tensor x = out_proj(trans(proj(x))) + x_all.
    return out


# ------------------------ deterministic parameter init ------------------------
def init_params(key):
    ks = jax.random.split(key, 16)
    bf16 = jnp.bfloat16
    p = {}
    # Conv1d(16, 16, k=3, padding=1, bias=False): merged as (out_ch, 3*in_ch)
    wc = jax.random.normal(ks[0], (3, N, N), jnp.float32) * 0.1     # wc[k] = W[:, :, k]
    p["wc"] = jnp.concatenate([wc[0], wc[1], wc[2]], axis=1)        # (N, 3N), pairs with [x_r; x; x_l]
    # ModulatedGraphConv (scaled 2048 -> F)
    bound = 1.414 * (6.0 / (F + F)) ** 0.5                          # xavier_uniform, gain=1.414
    wg = jax.random.uniform(ks[1], (2, F, F), jnp.float32, -bound, bound)
    p["wg"] = jnp.concatenate([wg[0], wg[1]], axis=1).astype(bf16)  # (F, 2F) bf16
    m = jnp.ones((N, F), jnp.float32)                               # M init = ones
    p["gcn_m"] = jnp.concatenate([m, m], axis=1)                    # (N, 2F)
    adj = jnp.ones((N, N), jnp.float32) + 1e-6                      # adj16 + adj2
    adj = (adj.T + adj) / 2.0
    eye = jnp.eye(N, dtype=jnp.float32)
    p["adj"] = jnp.concatenate([adj * eye, adj * (1.0 - eye)], axis=1)  # (N, 2N)
    stdv = 1.0 / (F ** 0.5)
    p["gcn_b"] = jax.random.uniform(ks[2], (1, F), jnp.float32, -stdv, stdv)
    # proj / out_proj
    p["projw"] = (jax.random.normal(ks[3], (F, D), jnp.float32) / (F ** 0.5)).astype(bf16)
    projb = jnp.zeros((1, D), jnp.float32)
    pos = jax.random.normal(ks[5], (N, D), jnp.float32) * 0.02
    p["posb"] = pos + projb                                         # pos_embed + proj bias (folded offline)
    p["ow"] = (jax.random.normal(ks[4], (D, F), jnp.float32) / (D ** 0.5)).astype(bf16)
    p["ob"] = jnp.zeros((1, F), jnp.float32)
    # transformer blocks
    p["ln1w"] = jnp.ones((DEPTH, D), jnp.float32)
    p["ln1b"] = jnp.zeros((DEPTH, D), jnp.float32)
    p["ln2w"] = jnp.ones((DEPTH, D), jnp.float32)
    p["ln2b"] = jnp.zeros((DEPTH, D), jnp.float32)
    p["qkvw"] = (jax.random.normal(ks[6], (DEPTH, D, 3 * D), jnp.float32) / (D ** 0.5)).astype(bf16)
    p["qkvb"] = jax.random.normal(ks[7], (DEPTH, 3 * D), jnp.float32) * 0.01
    p["aw"] = (jax.random.normal(ks[8], (DEPTH, D, D), jnp.float32) / (D ** 0.5)).astype(bf16)
    p["ab"] = jnp.zeros((DEPTH, D), jnp.float32)
    p["f1w"] = (jax.random.normal(ks[9], (DEPTH, D, MLP), jnp.float32) / (D ** 0.5)).astype(bf16)
    p["f1b"] = jnp.zeros((DEPTH, MLP), jnp.float32)
    p["f2w"] = (jax.random.normal(ks[10], (DEPTH, MLP, D), jnp.float32) / (MLP ** 0.5)).astype(bf16)
    p["f2b"] = jnp.zeros((DEPTH, D), jnp.float32)
    p["lnfw"] = jnp.ones((1, D), jnp.float32)
    p["lnfb"] = jnp.zeros((1, D), jnp.float32)
    # block-diagonal head mask: hmask[h*N + n, c] = 1 iff c // HD == h
    row_h = (jnp.arange(H * N, dtype=jnp.int32) // N)[:, None]
    col_h = (jnp.arange(D, dtype=jnp.int32) // HD)[None, :]
    p["hmask"] = (row_h == col_h).astype(jnp.float32)               # (H*N, D)
    return p


# ------------------------ pure-JAX reference (original, un-merged formulation) ------------------------
def reference(x, p):
    f32 = jnp.float32
    with jax.default_matmul_precision("highest"):
        wc0, wc1, wc2 = p["wc"][:, :N], p["wc"][:, N:2 * N], p["wc"][:, 2 * N:]
        x_r = jnp.concatenate([jnp.zeros((B, N, 1), f32), x[:, :, :F - 1]], axis=2)
        x_l = jnp.concatenate([x[:, :, 1:], jnp.zeros((B, N, 1), f32)], axis=2)
        xt = (jnp.einsum("oi,biw->bow", wc0, x_r)
              + jnp.einsum("oi,biw->bow", wc1, x)
              + jnp.einsum("oi,biw->bow", wc2, x_l))
        wg = p["wg"].astype(f32)
        wg0, wg1 = wg[:, :F], wg[:, F:]
        m = p["gcn_m"][:, :F]
        adiag, aoff = p["adj"][:, :N], p["adj"][:, N:]
        h0 = xt @ wg0
        h1 = xt @ wg1
        gcn = (jnp.einsum("nm,bmf->bnf", adiag, m * h0)
               + jnp.einsum("nm,bmf->bnf", aoff, m * h1) + p["gcn_b"])
        x_all = gcn + xt
        h = x @ p["projw"].astype(f32) + p["posb"]
        scale = 1.0 / (HD ** 0.5)
        for d in range(DEPTH):
            y = _layernorm(h, p["ln1w"][d], p["ln1b"][d])
            qkv = y @ p["qkvw"][d].astype(f32) + p["qkvb"][d]
            q = qkv[..., :D].reshape(B, N, H, HD).transpose(0, 2, 1, 3)
            k = qkv[..., D:2 * D].reshape(B, N, H, HD).transpose(0, 2, 1, 3)
            v = qkv[..., 2 * D:].reshape(B, N, H, HD).transpose(0, 2, 1, 3)
            a = jax.nn.softmax(jnp.einsum("bhnd,bhmd->bhnm", q, k) * scale, axis=-1)
            att = jnp.einsum("bhnm,bhmd->bhnd", a, v).transpose(0, 2, 1, 3).reshape(B, N, D)
            h = h + (att @ p["aw"][d].astype(f32) + p["ab"][d])
            y2 = _layernorm(h, p["ln2w"][d], p["ln2b"][d])
            m1 = _gelu(y2 @ p["f1w"][d].astype(f32) + p["f1b"][d])
            h = h + (m1 @ p["f2w"][d].astype(f32) + p["f2b"][d])
        h = _layernorm(h, p["lnfw"], p["lnfb"])
        out = h @ p["ow"].astype(f32) + p["ob"]
        return out + x_all


if __name__ == "__main__":
    key = jax.random.PRNGKey(0)
    pkey, xkey = jax.random.split(key)
    params = init_params(pkey)
    x = jax.random.normal(xkey, (B, N, F), jnp.float32)

    out = jax.block_until_ready(model_forward(x, params))
    assert out.shape == (B, N, F)

    ref = reference(x, params)
    if not bool(jnp.allclose(out, ref, atol=5e-2, rtol=5e-2)):
        raise AssertionError(
            f"kernel/reference mismatch, max abs err = {float(jnp.max(jnp.abs(out - ref)))}")
    print("KERNEL_OK")
</pallas_src>

<mosaic_0001>
module attributes {stable_mosaic.version = 11 : i64} {
  func.func @_model_kernel(%arg0: i32, %arg1: memref<1x16x256xf32, #tpu.memory_space<vmem>>, %arg2: memref<16x48xf32, #tpu.memory_space<vmem>>, %arg3: memref<256x512xbf16, #tpu.memory_space<vmem>>, %arg4: memref<16x512xf32, #tpu.memory_space<vmem>>, %arg5: memref<16x32xf32, #tpu.memory_space<vmem>>, %arg6: memref<1x256xf32, #tpu.memory_space<vmem>>, %arg7: memref<256x64xbf16, #tpu.memory_space<vmem>>, %arg8: memref<16x64xf32, #tpu.memory_space<vmem>>, %arg9: memref<128x64xf32, #tpu.memory_space<vmem>>, %arg10: memref<2x64xf32, #tpu.memory_space<vmem>>, %arg11: memref<2x64xf32, #tpu.memory_space<vmem>>, %arg12: memref<2x64x192xbf16, #tpu.memory_space<vmem>>, %arg13: memref<2x192xf32, #tpu.memory_space<vmem>>, %arg14: memref<2x64x64xbf16, #tpu.memory_space<vmem>>, %arg15: memref<2x64xf32, #tpu.memory_space<vmem>>, %arg16: memref<2x64xf32, #tpu.memory_space<vmem>>, %arg17: memref<2x64xf32, #tpu.memory_space<vmem>>, %arg18: memref<2x64x256xbf16, #tpu.memory_space<vmem>>, %arg19: memref<2x256xf32, #tpu.memory_space<vmem>>, %arg20: memref<2x256x64xbf16, #tpu.memory_space<vmem>>, %arg21: memref<2x64xf32, #tpu.memory_space<vmem>>, %arg22: memref<1x64xf32, #tpu.memory_space<vmem>>, %arg23: memref<1x64xf32, #tpu.memory_space<vmem>>, %arg24: memref<64x256xbf16, #tpu.memory_space<vmem>>, %arg25: memref<1x256xf32, #tpu.memory_space<vmem>>, %arg26: memref<1x16x256xf32, #tpu.memory_space<vmem>>) attributes {dimension_semantics = [#tpu.dimension_semantics<parallel>], iteration_bounds = array<i64: 2>, scalar_prefetch = 0 : i64, scratch_operands = 0 : i64, tpu.core_type = #tpu.core_type<tc>, window_params = [{transform_indices = @transform_0, window_bounds = array<i64: 1, 16, 256>}, {pipeline_mode = #tpu.pipeline_mode<synchronous>, transform_indices = @transform_1, window_bounds = array<i64: 16, 48>}, {pipeline_mode = #tpu.pipeline_mode<synchronous>, transform_indices = @transform_2, window_bounds = array<i64: 256, 512>}, {pipeline_mode = #tpu.pipeline_mode<synchronous>, transform_indices = @transform_3, window_bounds = array<i64: 16, 512>}, {pipeline_mode = #tpu.pipeline_mode<synchronous>, transform_indices = @transform_4, window_bounds = array<i64: 16, 32>}, {pipeline_mode = #tpu.pipeline_mode<synchronous>, transform_indices = @transform_5, window_bounds = array<i64: 1, 256>}, {pipeline_mode = #tpu.pipeline_mode<synchronous>, transform_indices = @transform_6, window_bounds = array<i64: 256, 64>}, {pipeline_mode = #tpu.pipeline_mode<synchronous>, transform_indices = @transform_7, window_bounds = array<i64: 16, 64>}, {pipeline_mode = #tpu.pipeline_mode<synchronous>, transform_indices = @transform_8, window_bounds = array<i64: 128, 64>}, {pipeline_mode = #tpu.pipeline_mode<synchronous>, transform_indices = @transform_9, window_bounds = array<i64: 2, 64>}, {pipeline_mode = #tpu.pipeline_mode<synchronous>, transform_indices = @transform_10, window_bounds = array<i64: 2, 64>}, {pipeline_mode = #tpu.pipeline_mode<synchronous>, transform_indices = @transform_11, window_bounds = array<i64: 2, 64, 192>}, {pipeline_mode = #tpu.pipeline_mode<synchronous>, transform_indices = @transform_12, window_bounds = array<i64: 2, 192>}, {pipeline_mode = #tpu.pipeline_mode<synchronous>, transform_indices = @transform_13, window_bounds = array<i64: 2, 64, 64>}, {pipeline_mode = #tpu.pipeline_mode<synchronous>, transform_indices = @transform_14, window_bounds = array<i64: 2, 64>}, {pipeline_mode = #tpu.pipeline_mode<synchronous>, transform_indices = @transform_15, window_bounds = array<i64: 2, 64>}, {pipeline_mode = #tpu.pipeline_mode<synchronous>, transform_indices = @transform_16, window_bounds = array<i64: 2, 64>}, {pipeline_mode = #tpu.pipeline_mode<synchronous>, transform_indices = @transform_17, window_bounds = array<i64: 2, 64, 256>}, {pipeline_mode = #tpu.pipeline_mode<synchronous>, transform_indices = @transform_18, window_bounds = array<i64: 2, 256>}, {pipeline_mode = #tpu.pipeline_mode<synchronous>, transform_indices = @transform_19, window_bounds = array<i64: 2, 256, 64>}, {pipeline_mode = #tpu.pipeline_mode<synchronous>, transform_indices = @transform_20, window_bounds = array<i64: 2, 64>}, {pipeline_mode = #tpu.pipeline_mode<synchronous>, transform_indices = @transform_21, window_bounds = array<i64: 1, 64>}, {pipeline_mode = #tpu.pipeline_mode<synchronous>, transform_indices = @transform_22, window_bounds = array<i64: 1, 64>}, {pipeline_mode = #tpu.pipeline_mode<synchronous>, transform_indices = @transform_23, window_bounds = array<i64: 64, 256>}, {pipeline_mode = #tpu.pipeline_mode<synchronous>, transform_indices = @transform_24, window_bounds = array<i64: 1, 256>}, {transform_indices = @transform_25, window_bounds = array<i64: 1, 16, 256>}]} {
    %c0 = arith.constant 0 : index
    %c0_0 = arith.constant 0 : index
    %c0_1 = arith.constant 0 : index
    %0 = vector.load %arg1[%c0, %c0_0, %c0_1] : memref<1x16x256xf32, #tpu.memory_space<vmem>>, vector<1x16x256xf32>
    %1 = vector.shape_cast %0 : vector<1x16x256xf32> to vector<16x256xf32>
    %cst = arith.constant 0.000000e+00 : f32
    %2 = vector.broadcast %cst : f32 to vector<16x1xf32>
    %3 = vector.extract_strided_slice %1 {offsets = [0, 0], sizes = [16, 255], strides = [1, 1]} : vector<16x256xf32> to vector<16x255xf32>
    %4 = tpu.concatenate %2, %3 in 1 : vector<16x1xf32>, vector<16x255xf32> -> vector<16x256xf32>
    %5 = vector.extract_strided_slice %1 {offsets = [0, 1], sizes = [16, 255], strides = [1, 1]} : vector<16x256xf32> to vector<16x255xf32>
    %6 = tpu.concatenate %5, %2 in 1 : vector<16x255xf32>, vector<16x1xf32> -> vector<16x256xf32>
    %7 = tpu.concatenate %4, %1, %6 in 0 : vector<16x256xf32>, vector<16x256xf32>, vector<16x256xf32> -> vector<48x256xf32>
    %c0_2 = arith.constant 0 : index
    %c0_3 = arith.constant 0 : index
    %8 = vector.load %arg2[%c0_2, %c0_3] : memref<16x48xf32, #tpu.memory_space<vmem>>, vector<16x48xf32>
    %cst_4 = arith.constant dense<0.000000e+00> : vector<16x256xf32>
    %9 = tpu.matmul %8, %7, %cst_4 {dimension_numbers = #tpu.dot_dimension_numbers<[1], [0], [0], [1], [0, 0, 1, 1], [], []>} : vector<16x48xf32>, vector<48x256xf32>, vector<16x256xf32> -> vector<16x256xf32>
    %c0_5 = arith.constant 0 : index
    %c0_6 = arith.constant 0 : index
    %10 = vector.load %arg3[%c0_5, %c0_6] : memref<256x512xbf16, #tpu.memory_space<vmem>>, vector<256x512xbf16>
    %11 = arith.extf %10 : vector<256x512xbf16> to vector<256x512xf32>
    %cst_7 = arith.constant dense<0.000000e+00> : vector<16x512xf32>
    %12 = tpu.matmul %9, %11, %cst_7 {dimension_numbers = #tpu.dot_dimension_numbers<[1], [0], [0], [1], [0, 0, 1, 1], [], []>} : vector<16x256xf32>, vector<256x512xf32>, vector<16x512xf32> -> vector<16x512xf32>
    %c0_8 = arith.constant 0 : index
    %c0_9 = arith.constant 0 : index
    %13 = vector.load %arg4[%c0_8, %c0_9] : memref<16x512xf32, #tpu.memory_space<vmem>>, vector<16x512xf32>
    %14 = arith.mulf %13, %12 : vector<16x512xf32>
    %15 = vector.extract_strided_slice %14 {offsets = [0, 0], sizes = [16, 256], strides = [1, 1]} : vector<16x512xf32> to vector<16x256xf32>
    %16 = vector.extract_strided_slice %14 {offsets = [0, 256], sizes = [16, 256], strides = [1, 1]} : vector<16x512xf32> to vector<16x256xf32>
    %17 = tpu.concatenate %15, %16 in 0 : vector<16x256xf32>, vector<16x256xf32> -> vector<32x256xf32>
    %c0_10 = arith.constant 0 : index
    %c0_11 = arith.constant 0 : index
    %18 = vector.load %arg5[%c0_10, %c0_11] : memref<16x32xf32, #tpu.memory_space<vmem>>, vector<16x32xf32>
    %cst_12 = arith.constant dense<0.000000e+00> : vector<16x256xf32>
    %19 = tpu.matmul %18, %17, %cst_12 {dimension_numbers = #tpu.dot_dimension_numbers<[1], [0], [0], [1], [0, 0, 1, 1], [], []>} : vector<16x32xf32>, vector<32x256xf32>, vector<16x256xf32> -> vector<16x256xf32>
    %c0_13 = arith.constant 0 : index
    %c0_14 = arith.constant 0 : index
    %20 = vector.load %arg6[%c0_13, %c0_14] : memref<1x256xf32, #tpu.memory_space<vmem>>, vector<1x256xf32>
    %21 = vector.broadcast %20 : vector<1x256xf32> to vector<16x256xf32>
    %22 = arith.addf %19, %21 : vector<16x256xf32>
    %23 = arith.addf %22, %9 : vector<16x256xf32>
    %24 = arith.truncf %1 : vector<16x256xf32> to vector<16x256xbf16>
    %c0_15 = arith.constant 0 : index
    %c0_16 = arith.constant 0 : index
    %25 = vector.load %arg7[%c0_15, %c0_16] : memref<256x64xbf16, #tpu.memory_space<vmem>>, vector<256x64xbf16>
    %cst_17 = arith.constant dense<0.000000e+00> : vector<16x64xf32>
    %26 = tpu.matmul %24, %25, %cst_17 {dimension_numbers = #tpu.dot_dimension_numbers<[1], [0], [0], [1], [0, 0, 1, 1], [], []>} : vector<16x256xbf16>, vector<256x64xbf16>, vector<16x64xf32> -> vector<16x64xf32>
    %c0_18 = arith.constant 0 : index
    %c0_19 = arith.constant 0 : index
    %27 = vector.load %arg8[%c0_18, %c0_19] : memref<16x64xf32, #tpu.memory_space<vmem>>, vector<16x64xf32>
    %28 = arith.addf %26, %27 : vector<16x64xf32>
    %c0_20 = arith.constant 0 : index
    %c0_21 = arith.constant 0 : index
    %29 = vector.load %arg9[%c0_20, %c0_21] : memref<128x64xf32, #tpu.memory_space<vmem>>, vector<128x64xf32>
    %c0_22 = arith.constant 0 : index
    %c0_23 = arith.constant 0 : index
    %30 = vector.load %arg10[%c0_22, %c0_23] : memref<2x64xf32, #tpu.memory_space<vmem>>, vector<2x64xf32>
    %c0_24 = arith.constant 0 : index
    %c0_25 = arith.constant 0 : index
    %31 = vector.load %arg11[%c0_24, %c0_25] : memref<2x64xf32, #tpu.memory_space<vmem>>, vector<2x64xf32>
    %c0_26 = arith.constant 0 : index
    %c0_27 = arith.constant 0 : index
    %c0_28 = arith.constant 0 : index
    %32 = vector.load %arg12[%c0_26, %c0_27, %c0_28] : memref<2x64x192xbf16, #tpu.memory_space<vmem>>, vector<2x64x192xbf16>
    %c0_29 = arith.constant 0 : index
    %c0_30 = arith.constant 0 : index
    %33 = vector.load %arg13[%c0_29, %c0_30] : memref<2x192xf32, #tpu.memory_space<vmem>>, vector<2x192xf32>
    %c0_31 = arith.constant 0 : index
    %c0_32 = arith.constant 0 : index
    %c0_33 = arith.constant 0 : index
    %34 = vector.load %arg14[%c0_31, %c0_32, %c0_33] : memref<2x64x64xbf16, #tpu.memory_space<vmem>>, vector<2x64x64xbf16>
    %c0_34 = arith.constant 0 : index
    %c0_35 = arith.constant 0 : index
    %35 = vector.load %arg15[%c0_34, %c0_35] : memref<2x64xf32, #tpu.memory_space<vmem>>, vector<2x64xf32>
    %c0_36 = arith.constant 0 : index
    %c0_37 = arith.constant 0 : index
    %36 = vector.load %arg16[%c0_36, %c0_37] : memref<2x64xf32, #tpu.memory_space<vmem>>, vector<2x64xf32>
    %c0_38 = arith.constant 0 : index
    %c0_39 = arith.constant 0 : index
    %37 = vector.load %arg17[%c0_38, %c0_39] : memref<2x64xf32, #tpu.memory_space<vmem>>, vector<2x64xf32>
    %c0_40 = arith.constant 0 : index
    %c0_41 = arith.constant 0 : index
    %c0_42 = arith.constant 0 : index
    %38 = vector.load %arg18[%c0_40, %c0_41, %c0_42] : memref<2x64x256xbf16, #tpu.memory_space<vmem>>, vector<2x64x256xbf16>
    %c0_43 = arith.constant 0 : index
    %c0_44 = arith.constant 0 : index
    %39 = vector.load %arg19[%c0_43, %c0_44] : memref<2x256xf32, #tpu.memory_space<vmem>>, vector<2x256xf32>
    %c0_45 = arith.constant 0 : index
    %c0_46 = arith.constant 0 : index
    %c0_47 = arith.constant 0 : index
    %40 = vector.load %arg20[%c0_45, %c0_46, %c0_47] : memref<2x256x64xbf16, #tpu.memory_space<vmem>>, vector<2x256x64xbf16>
    %c0_48 = arith.constant 0 : index
    %c0_49 = arith.constant 0 : index
    %41 = vector.load %arg21[%c0_48, %c0_49] : memref<2x64xf32, #tpu.memory_space<vmem>>, vector<2x64xf32>
    %42 = vector.extract_strided_slice %30 {offsets = [0, 0], sizes = [1, 64], strides = [1, 1]} : vector<2x64xf32> to vector<1x64xf32>
    %43 = vector.extract_strided_slice %31 {offsets = [0, 0], sizes = [1, 64], strides = [1, 1]} : vector<2x64xf32> to vector<1x64xf32>
    %cst_50 = arith.constant dense<0.000000e+00> : vector<16xf32>
    %44 = vector.multi_reduction <add>, %28, %cst_50 [1] : vector<16x64xf32> to vector<16xf32>
    %45 = vector.shape_cast %44 : vector<16xf32> to vector<16x1xf32>
    %cst_51 = arith.constant 6.400000e+01 : f32
    %46 = vector.broadcast %cst_51 : f32 to vector<16x1xf32>
    %47 = arith.divf %45, %46 : vector<16x1xf32>
    %48 = vector.broadcast %47 : vector<16x1xf32> to vector<16x64xf32>
    %49 = arith.subf %28, %48 : vector<16x64xf32>
    %50 = arith.mulf %49, %49 : vector<16x64xf32>
    %cst_52 = arith.constant dense<0.000000e+00> : vector<16xf32>
    %51 = vector.multi_reduction <add>, %50, %cst_52 [1] : vector<16x64xf32> to vector<16xf32>
    %52 = vector.shape_cast %51 : vector<16xf32> to vector<16x1xf32>
    %cst_53 = arith.constant 6.400000e+01 : f32
    %53 = vector.broadcast %cst_53 : f32 to vector<16x1xf32>
    %54 = arith.divf %52, %53 : vector<16x1xf32>
    %55 = vector.broadcast %47 : vector<16x1xf32> to vector<16x64xf32>
    %56 = arith.subf %28, %55 : vector<16x64xf32>
    %cst_54 = arith.constant 9.99999997E-7 : f32
    %57 = vector.broadcast %cst_54 : f32 to vector<16x1xf32>
    %58 = arith.addf %54, %57 : vector<16x1xf32>
    %59 = math.rsqrt %58 : vector<16x1xf32>
    %60 = vector.broadcast %59 : vector<16x1xf32> to vector<16x64xf32>
    %61 = arith.mulf %56, %60 : vector<16x64xf32>
    %62 = vector.broadcast %42 : vector<1x64xf32> to vector<16x64xf32>
    %63 = arith.mulf %61, %62 : vector<16x64xf32>
    %64 = vector.broadcast %43 : vector<1x64xf32> to vector<16x64xf32>
    %65 = arith.addf %63, %64 : vector<16x64xf32>
    %66 = arith.truncf %65 : vector<16x64xf32> to vector<16x64xbf16>
    %67 = vector.extract_strided_slice %32 {offsets = [0, 0, 0], sizes = [1, 64, 192], strides = [1, 1, 1]} : vector<2x64x192xbf16> to vector<1x64x192xbf16>
    %68 = vector.shape_cast %67 : vector<1x64x192xbf16> to vector<64x192xbf16>
    %cst_55 = arith.constant dense<0.000000e+00> : vector<16x192xf32>
    %69 = tpu.matmul %66, %68, %cst_55 {dimension_numbers = #tpu.dot_dimension_numbers<[1], [0], [0], [1], [0, 0, 1, 1], [], []>} : vector<16x64xbf16>, vector<64x192xbf16>, vector<16x192xf32> -> vector<16x192xf32>
    %70 = vector.extract_strided_slice %33 {offsets = [0, 0], sizes = [1, 192], strides = [1, 1]} : vector<2x192xf32> to vector<1x192xf32>
    %71 = vector.broadcast %70 : vector<1x192xf32> to vector<16x192xf32>
    %72 = arith.addf %69, %71 : vector<16x192xf32>
    %73 = vector.extract_strided_slice %72 {offsets = [0, 0], sizes = [16, 64], strides = [1, 1]} : vector<16x192xf32> to vector<16x64xf32>
    %74 = vector.extract_strided_slice %72 {offsets = [0, 64], sizes = [16, 64], strides = [1, 1]} : vector<16x192xf32> to vector<16x64xf32>
    %75 = vector.extract_strided_slice %72 {offsets = [0, 128], sizes = [16, 64], strides = [1, 1]} : vector<16x192xf32> to vector<16x64xf32>
    %76 = tpu.concatenate %73, %73, %73, %73, %73, %73, %73, %73 in 0 : vector<16x64xf32>, vector<16x64xf32>, vector<16x64xf32>, vector<16x64xf32>, vector<16x64xf32>, vector<16x64xf32>, vector<16x64xf32>, vector<16x64xf32> -> vector<128x64xf32>
    %77 = arith.mulf %76, %29 : vector<128x64xf32>
    %cst_56 = arith.constant dense<0.000000e+00> : vector<128x16xf32>
    %78 = tpu.matmul %77, %74, %cst_56 {dimension_numbers = #tpu.dot_dimension_numbers<[1], [1], [0], [0], [0, 0, 1, 0], [], []>} : vector<128x64xf32>, vector<16x64xf32>, vector<128x16xf32> -> vector<128x16xf32>
    %cst_57 = arith.constant 0.353553385 : f32
    %79 = vector.broadcast %cst_57 : f32 to vector<128x16xf32>
    %80 = arith.mulf %78, %79 : vector<128x16xf32>
    %cst_58 = arith.constant dense<0xFF800000> : vector<128xf32>
    %81 = vector.multi_reduction <maximumf>, %80, %cst_58 [1] : vector<128x16xf32> to vector<128xf32>
    %82 = vector.shape_cast %81 : vector<128xf32> to vector<128x1xf32>
    %83 = vector.broadcast %82 : vector<128x1xf32> to vector<128x16xf32>
    %84 = arith.subf %80, %83 : vector<128x16xf32>
    %85 = math.exp %84 : vector<128x16xf32>
    %cst_59 = arith.constant dense<0.000000e+00> : vector<128xf32>
    %86 = vector.multi_reduction <add>, %85, %cst_59 [1] : vector<128x16xf32> to vector<128xf32>
    %87 = vector.shape_cast %86 : vector<128xf32> to vector<128x1xf32>
    %88 = tpu.reciprocal %87 {approx = true} : vector<128x1xf32> -> vector<128x1xf32>
    %89 = vector.broadcast %88 : vector<128x1xf32> to vector<128x16xf32>
    %90 = arith.mulf %85, %89 : vector<128x16xf32>
    %cst_60 = arith.constant dense<0.000000e+00> : vector<128x64xf32>
    %91 = tpu.matmul %90, %75, %cst_60 {dimension_numbers = #tpu.dot_dimension_numbers<[1], [0], [0], [1], [0, 0, 1, 1], [], []>} : vector<128x16xf32>, vector<16x64xf32>, vector<128x64xf32> -> vector<128x64xf32>
    %92 = arith.mulf %91, %29 : vector<128x64xf32>
    %93 = vector.extract_strided_slice %92 {offsets = [0, 0], sizes = [16, 64], strides = [1, 1]} : vector<128x64xf32> to vector<16x64xf32>
    %94 = vector.extract_strided_slice %92 {offsets = [16, 0], sizes = [16, 64], strides = [1, 1]} : vector<128x64xf32> to vector<16x64xf32>
    %95 = arith.addf %93, %94 : vector<16x64xf32>
    %96 = vector.extract_strided_slice %92 {offsets = [32, 0], sizes = [16, 64], strides = [1, 1]} : vector<128x64xf32> to vector<16x64xf32>
    %97 = arith.addf %95, %96 : vector<16x64xf32>
    %98 = vector.extract_strided_slice %92 {offsets = [48, 0], sizes = [16, 64], strides = [1, 1]} : vector<128x64xf32> to vector<16x64xf32>
    %99 = arith.addf %97, %98 : vector<16x64xf32>
    %100 = vector.extract_strided_slice %92 {offsets = [64, 0], sizes = [16, 64], strides = [1, 1]} : vector<128x64xf32> to vector<16x64xf32>
    %101 = arith.addf %99, %100 : vector<16x64xf32>
    %102 = vector.extract_strided_slice %92 {offsets = [80, 0], sizes = [16, 64], strides = [1, 1]} : vector<128x64xf32> to vector<16x64xf32>
    %103 = arith.addf %101, %102 : vector<16x64xf32>
    %104 = vector.extract_strided_slice %92 {offsets = [96, 0], sizes = [16, 64], strides = [1, 1]} : vector<128x64xf32> to vector<16x64xf32>
    %105 = arith.addf %103, %104 : vector<16x64xf32>
    %106 = vector.extract_strided_slice %92 {offsets = [112, 0], sizes = [16, 64], strides = [1, 1]} : vector<128x64xf32> to vector<16x64xf32>
    %107 = arith.addf %105, %106 : vector<16x64xf32>
    %108 = arith.truncf %107 : vector<16x64xf32> to vector<16x64xbf16>
    %109 = vector.extract_strided_slice %34 {offsets = [0, 0, 0], sizes = [1, 64, 64], strides = [1, 1, 1]} : vector<2x64x64xbf16> to vector<1x64x64xbf16>
    %110 = vector.shape_cast %109 : vector<1x64x64xbf16> to vector<64x64xbf16>
    %cst_61 = arith.constant dense<0.000000e+00> : vector<16x64xf32>
    %111 = tpu.matmul %108, %110, %cst_61 {dimension_numbers = #tpu.dot_dimension_numbers<[1], [0], [0], [1], [0, 0, 1, 1], [], []>} : vector<16x64xbf16>, vector<64x64xbf16>, vector<16x64xf32> -> vector<16x64xf32>
    %112 = vector.extract_strided_slice %35 {offsets = [0, 0], sizes = [1, 64], strides = [1, 1]} : vector<2x64xf32> to vector<1x64xf32>
    %113 = vector.broadcast %112 : vector<1x64xf32> to vector<16x64xf32>
    %114 = arith.addf %111, %113 : vector<16x64xf32>
    %115 = arith.addf %28, %114 : vector<16x64xf32>
    %116 = vector.extract_strided_slice %36 {offsets = [0, 0], sizes = [1, 64], strides = [1, 1]} : vector<2x64xf32> to vector<1x64xf32>
    %117 = vector.extract_strided_slice %37 {offsets = [0, 0], sizes = [1, 64], strides = [1, 1]} : vector<2x64xf32> to vector<1x64xf32>
    %cst_62 = arith.constant dense<0.000000e+00> : vector<16xf32>
    %118 = vector.multi_reduction <add>, %115, %cst_62 [1] : vector<16x64xf32> to vector<16xf32>
    %119 = vector.shape_cast %118 : vector<16xf32> to vector<16x1xf32>
    %cst_63 = arith.constant 6.400000e+01 : f32
    %120 = vector.broadcast %cst_63 : f32 to vector<16x1xf32>
    %121 = arith.divf %119, %120 : vector<16x1xf32>
    %122 = vector.broadcast %121 : vector<16x1xf32> to vector<16x64xf32>
    %123 = arith.subf %115, %122 : vector<16x64xf32>
    %124 = arith.mulf %123, %123 : vector<16x64xf32>
    %cst_64 = arith.constant dense<0.000000e+00> : vector<16xf32>
    %125 = vector.multi_reduction <add>, %124, %cst_64 [1] : vector<16x64xf32> to vector<16xf32>
    %126 = vector.shape_cast %125 : vector<16xf32> to vector<16x1xf32>
    %cst_65 = arith.constant 6.400000e+01 : f32
    %127 = vector.broadcast %cst_65 : f32 to vector<16x1xf32>
    %128 = arith.divf %126, %127 : vector<16x1xf32>
    %129 = vector.broadcast %121 : vector<16x1xf32> to vector<16x64xf32>
    %130 = arith.subf %115, %129 : vector<16x64xf32>
    %cst_66 = arith.constant 9.99999997E-7 : f32
    %131 = vector.broadcast %cst_66 : f32 to vector<16x1xf32>
    %132 = arith.addf %128, %131 : vector<16x1xf32>
    %133 = math.rsqrt %132 : vector<16x1xf32>
    %134 = vector.broadcast %133 : vector<16x1xf32> to vector<16x64xf32>
    %135 = arith.mulf %130, %134 : vector<16x64xf32>
    %136 = vector.broadcast %116 : vector<1x64xf32> to vector<16x64xf32>
    %137 = arith.mulf %135, %136 : vector<16x64xf32>
    %138 = vector.broadcast %117 : vector<1x64xf32> to vector<16x64xf32>
    %139 = arith.addf %137, %138 : vector<16x64xf32>
    %140 = arith.truncf %139 : vector<16x64xf32> to vector<16x64xbf16>
    %141 = vector.extract_strided_slice %38 {offsets = [0, 0, 0], sizes = [1, 64, 256], strides = [1, 1, 1]} : vector<2x64x256xbf16> to vector<1x64x256xbf16>
    %142 = vector.shape_cast %141 : vector<1x64x256xbf16> to vector<64x256xbf16>
    %cst_67 = arith.constant dense<0.000000e+00> : vector<16x256xf32>
    %143 = tpu.matmul %140, %142, %cst_67 {dimension_numbers = #tpu.dot_dimension_numbers<[1], [0], [0], [1], [0, 0, 1, 1], [], []>} : vector<16x64xbf16>, vector<64x256xbf16>, vector<16x256xf32> -> vector<16x256xf32>
    %144 = vector.extract_strided_slice %39 {offsets = [0, 0], sizes = [1, 256], strides = [1, 1]} : vector<2x256xf32> to vector<1x256xf32>
    %145 = vector.broadcast %144 : vector<1x256xf32> to vector<16x256xf32>
    %146 = arith.addf %143, %145 : vector<16x256xf32>
    %cst_68 = arith.constant 5.000000e-01 : f32
    %147 = vector.broadcast %cst_68 : f32 to vector<16x256xf32>
    %148 = arith.mulf %147, %146 : vector<16x256xf32>
    %cst_69 = arith.constant 0.707106769 : f32
    %149 = vector.broadcast %cst_69 : f32 to vector<16x256xf32>
    %150 = arith.mulf %146, %149 : vector<16x256xf32>
    %cst_70 = arith.constant 0.000000e+00 : f32
    %151 = vector.broadcast %cst_70 : f32 to vector<16x256xf32>
    %152 = arith.cmpf oge, %150, %151 : vector<16x256xf32>
    %cst_71 = arith.constant 1.000000e+00 : f32
    %cst_72 = arith.constant -1.000000e+00 : f32
    %153 = vector.broadcast %cst_71 : f32 to vector<16x256xf32>
    %154 = vector.broadcast %cst_72 : f32 to vector<16x256xf32>
    %155 = arith.select %152, %153, %154 : vector<16x256xi1>, vector<16x256xf32>
    %156 = math.absf %150 : vector<16x256xf32>
    %cst_73 = arith.constant 0.327591091 : f32
    %157 = vector.broadcast %cst_73 : f32 to vector<16x256xf32>
    %158 = arith.mulf %157, %156 : vector<16x256xf32>
    %cst_74 = arith.constant 1.000000e+00 : f32
    %159 = vector.broadcast %cst_74 : f32 to vector<16x256xf32>
    %160 = arith.addf %159, %158 : vector<16x256xf32>
    %161 = tpu.reciprocal %160 {approx = true} : vector<16x256xf32> -> vector<16x256xf32>
    %cst_75 = arith.constant 1.06140542 : f32
    %162 = vector.broadcast %cst_75 : f32 to vector<16x256xf32>
    %163 = arith.mulf %162, %161 : vector<16x256xf32>
    %cst_76 = arith.constant -1.45315206 : f32
    %164 = vector.broadcast %cst_76 : f32 to vector<16x256xf32>
    %165 = arith.addf %163, %164 : vector<16x256xf32>
    %166 = arith.mulf %165, %161 : vector<16x256xf32>
    %cst_77 = arith.constant 1.42141378 : f32
    %167 = vector.broadcast %cst_77 : f32 to vector<16x256xf32>
    %168 = arith.addf %166, %167 : vector<16x256xf32>
    %169 = arith.mulf %168, %161 : vector<16x256xf32>
    %cst_78 = arith.constant -0.284496725 : f32
    %170 = vector.broadcast %cst_78 : f32 to vector<16x256xf32>
    %171 = arith.addf %169, %170 : vector<16x256xf32>
    %172 = arith.mulf %171, %161 : vector<16x256xf32>
    %cst_79 = arith.constant 0.254829586 : f32
    %173 = vector.broadcast %cst_79 : f32 to vector<16x256xf32>
    %174 = arith.addf %172, %173 : vector<16x256xf32>
    %175 = arith.mulf %174, %161 : vector<16x256xf32>
    %cst_80 = arith.constant 0.000000e+00 : f32
    %176 = vector.broadcast %cst_80 : f32 to vector<16x256xf32>
    %177 = arith.subf %176, %156 : vector<16x256xf32>
    %178 = arith.mulf %177, %156 : vector<16x256xf32>
    %179 = math.exp %178 : vector<16x256xf32>
    %180 = arith.mulf %175, %179 : vector<16x256xf32>
    %cst_81 = arith.constant 1.000000e+00 : f32
    %181 = vector.broadcast %cst_81 : f32 to vector<16x256xf32>
    %182 = arith.subf %181, %180 : vector<16x256xf32>
    %183 = arith.mulf %155, %182 : vector<16x256xf32>
    %cst_82 = arith.constant 1.000000e+00 : f32
    %184 = vector.broadcast %cst_82 : f32 to vector<16x256xf32>
    %185 = arith.addf %184, %183 : vector<16x256xf32>
    %186 = arith.mulf %148, %185 : vector<16x256xf32>
    %187 = arith.truncf %186 : vector<16x256xf32> to vector<16x256xbf16>
    %188 = vector.extract_strided_slice %40 {offsets = [0, 0, 0], sizes = [1, 256, 64], strides = [1, 1, 1]} : vector<2x256x64xbf16> to vector<1x256x64xbf16>
    %189 = vector.shape_cast %188 : vector<1x256x64xbf16> to vector<256x64xbf16>
    %cst_83 = arith.constant dense<0.000000e+00> : vector<16x64xf32>
    %190 = tpu.matmul %187, %189, %cst_83 {dimension_numbers = #tpu.dot_dimension_numbers<[1], [0], [0], [1], [0, 0, 1, 1], [], []>} : vector<16x256xbf16>, vector<256x64xbf16>, vector<16x64xf32> -> vector<16x64xf32>
    %191 = vector.extract_strided_slice %41 {offsets = [0, 0], sizes = [1, 64], strides = [1, 1]} : vector<2x64xf32> to vector<1x64xf32>
    %192 = vector.broadcast %191 : vector<1x64xf32> to vector<16x64xf32>
    %193 = arith.addf %190, %192 : vector<16x64xf32>
    %194 = arith.addf %115, %193 : vector<16x64xf32>
    %195 = vector.extract_strided_slice %30 {offsets = [1, 0], sizes = [1, 64], strides = [1, 1]} : vector<2x64xf32> to vector<1x64xf32>
    %196 = vector.extract_strided_slice %31 {offsets = [1, 0], sizes = [1, 64], strides = [1, 1]} : vector<2x64xf32> to vector<1x64xf32>
    %cst_84 = arith.constant dense<0.000000e+00> : vector<16xf32>
    %197 = vector.multi_reduction <add>, %194, %cst_84 [1] : vector<16x64xf32> to vector<16xf32>
    %198 = vector.shape_cast %197 : vector<16xf32> to vector<16x1xf32>
    %cst_85 = arith.constant 6.400000e+01 : f32
    %199 = vector.broadcast %cst_85 : f32 to vector<16x1xf32>
    %200 = arith.divf %198, %199 : vector<16x1xf32>
    %201 = vector.broadcast %200 : vector<16x1xf32> to vector<16x64xf32>
    %202 = arith.subf %194, %201 : vector<16x64xf32>
    %203 = arith.mulf %202, %202 : vector<16x64xf32>
    %cst_86 = arith.constant dense<0.000000e+00> : vector<16xf32>
    %204 = vector.multi_reduction <add>, %203, %cst_86 [1] : vector<16x64xf32> to vector<16xf32>
    %205 = vector.shape_cast %204 : vector<16xf32> to vector<16x1xf32>
    %cst_87 = arith.constant 6.400000e+01 : f32
    %206 = vector.broadcast %cst_87 : f32 to vector<16x1xf32>
    %207 = arith.divf %205, %206 : vector<16x1xf32>
    %208 = vector.broadcast %200 : vector<16x1xf32> to vector<16x64xf32>
    %209 = arith.subf %194, %208 : vector<16x64xf32>
    %cst_88 = arith.constant 9.99999997E-7 : f32
    %210 = vector.broadcast %cst_88 : f32 to vector<16x1xf32>
    %211 = arith.addf %207, %210 : vector<16x1xf32>
    %212 = math.rsqrt %211 : vector<16x1xf32>
    %213 = vector.broadcast %212 : vector<16x1xf32> to vector<16x64xf32>
    %214 = arith.mulf %209, %213 : vector<16x64xf32>
    %215 = vector.broadcast %195 : vector<1x64xf32> to vector<16x64xf32>
    %216 = arith.mulf %214, %215 : vector<16x64xf32>
    %217 = vector.broadcast %196 : vector<1x64xf32> to vector<16x64xf32>
    %218 = arith.addf %216, %217 : vector<16x64xf32>
    %219 = arith.truncf %218 : vector<16x64xf32> to vector<16x64xbf16>
    %220 = vector.extract_strided_slice %32 {offsets = [1, 0, 0], sizes = [1, 64, 192], strides = [1, 1, 1]} : vector<2x64x192xbf16> to vector<1x64x192xbf16>
    %221 = vector.shape_cast %220 : vector<1x64x192xbf16> to vector<64x192xbf16>
    %cst_89 = arith.constant dense<0.000000e+00> : vector<16x192xf32>
    %222 = tpu.matmul %219, %221, %cst_89 {dimension_numbers = #tpu.dot_dimension_numbers<[1], [0], [0], [1], [0, 0, 1, 1], [], []>} : vector<16x64xbf16>, vector<64x192xbf16>, vector<16x192xf32> -> vector<16x192xf32>
    %223 = vector.extract_strided_slice %33 {offsets = [1, 0], sizes = [1, 192], strides = [1, 1]} : vector<2x192xf32> to vector<1x192xf32>
    %224 = vector.broadcast %223 : vector<1x192xf32> to vector<16x192xf32>
    %225 = arith.addf %222, %224 : vector<16x192xf32>
    %226 = vector.extract_strided_slice %225 {offsets = [0, 0], sizes = [16, 64], strides = [1, 1]} : vector<16x192xf32> to vector<16x64xf32>
    %227 = vector.extract_strided_slice %225 {offsets = [0, 64], sizes = [16, 64], strides = [1, 1]} : vector<16x192xf32> to vector<16x64xf32>
    %228 = vector.extract_strided_slice %225 {offsets = [0, 128], sizes = [16, 64], strides = [1, 1]} : vector<16x192xf32> to vector<16x64xf32>
    %229 = tpu.concatenate %226, %226, %226, %226, %226, %226, %226, %226 in 0 : vector<16x64xf32>, vector<16x64xf32>, vector<16x64xf32>, vector<16x64xf32>, vector<16x64xf32>, vector<16x64xf32>, vector<16x64xf32>, vector<16x64xf32> -> vector<128x64xf32>
    %230 = arith.mulf %229, %29 : vector<128x64xf32>
    %cst_90 = arith.constant dense<0.000000e+00> : vector<128x16xf32>
    %231 = tpu.matmul %230, %227, %cst_90 {dimension_numbers = #tpu.dot_dimension_numbers<[1], [1], [0], [0], [0, 0, 1, 0], [], []>} : vector<128x64xf32>, vector<16x64xf32>, vector<128x16xf32> -> vector<128x16xf32>
    %cst_91 = arith.constant 0.353553385 : f32
    %232 = vector.broadcast %cst_91 : f32 to vector<128x16xf32>
    %233 = arith.mulf %231, %232 : vector<128x16xf32>
    %cst_92 = arith.constant dense<0xFF800000> : vector<128xf32>
    %234 = vector.multi_reduction <maximumf>, %233, %cst_92 [1] : vector<128x16xf32> to vector<128xf32>
    %235 = vector.shape_cast %234 : vector<128xf32> to vector<128x1xf32>
    %236 = vector.broadcast %235 : vector<128x1xf32> to vector<128x16xf32>
    %237 = arith.subf %233, %236 : vector<128x16xf32>
    %238 = math.exp %237 : vector<128x16xf32>
    %cst_93 = arith.constant dense<0.000000e+00> : vector<128xf32>
    %239 = vector.multi_reduction <add>, %238, %cst_93 [1] : vector<128x16xf32> to vector<128xf32>
    %240 = vector.shape_cast %239 : vector<128xf32> to vector<128x1xf32>
    %241 = tpu.reciprocal %240 {approx = true} : vector<128x1xf32> -> vector<128x1xf32>
    %242 = vector.broadcast %241 : vector<128x1xf32> to vector<128x16xf32>
    %243 = arith.mulf %238, %242 : vector<128x16xf32>
    %cst_94 = arith.constant dense<0.000000e+00> : vector<128x64xf32>
    %244 = tpu.matmul %243, %228, %cst_94 {dimension_numbers = #tpu.dot_dimension_numbers<[1], [0], [0], [1], [0, 0, 1, 1], [], []>} : vector<128x16xf32>, vector<16x64xf32>, vector<128x64xf32> -> vector<128x64xf32>
    %245 = arith.mulf %244, %29 : vector<128x64xf32>
    %246 = vector.extract_strided_slice %245 {offsets = [0, 0], sizes = [16, 64], strides = [1, 1]} : vector<128x64xf32> to vector<16x64xf32>
    %247 = vector.extract_strided_slice %245 {offsets = [16, 0], sizes = [16, 64], strides = [1, 1]} : vector<128x64xf32> to vector<16x64xf32>
    %248 = arith.addf %246, %247 : vector<16x64xf32>
    %249 = vector.extract_strided_slice %245 {offsets = [32, 0], sizes = [16, 64], strides = [1, 1]} : vector<128x64xf32> to vector<16x64xf32>
    %250 = arith.addf %248, %249 : vector<16x64xf32>
    %251 = vector.extract_strided_slice %245 {offsets = [48, 0], sizes = [16, 64], strides = [1, 1]} : vector<128x64xf32> to vector<16x64xf32>
    %252 = arith.addf %250, %251 : vector<16x64xf32>
    %253 = vector.extract_strided_slice %245 {offsets = [64, 0], sizes = [16, 64], strides = [1, 1]} : vector<128x64xf32> to vector<16x64xf32>
    %254 = arith.addf %252, %253 : vector<16x64xf32>
    %255 = vector.extract_strided_slice %245 {offsets = [80, 0], sizes = [16, 64], strides = [1, 1]} : vector<128x64xf32> to vector<16x64xf32>
    %256 = arith.addf %254, %255 : vector<16x64xf32>
    %257 = vector.extract_strided_slice %245 {offsets = [96, 0], sizes = [16, 64], strides = [1, 1]} : vector<128x64xf32> to vector<16x64xf32>
    %258 = arith.addf %256, %257 : vector<16x64xf32>
    %259 = vector.extract_strided_slice %245 {offsets = [112, 0], sizes = [16, 64], strides = [1, 1]} : vector<128x64xf32> to vector<16x64xf32>
    %260 = arith.addf %258, %259 : vector<16x64xf32>
    %261 = arith.truncf %260 : vector<16x64xf32> to vector<16x64xbf16>
    %262 = vector.extract_strided_slice %34 {offsets = [1, 0, 0], sizes = [1, 64, 64], strides = [1, 1, 1]} : vector<2x64x64xbf16> to vector<1x64x64xbf16>
    %263 = vector.shape_cast %262 : vector<1x64x64xbf16> to vector<64x64xbf16>
    %cst_95 = arith.constant dense<0.000000e+00> : vector<16x64xf32>
    %264 = tpu.matmul %261, %263, %cst_95 {dimension_numbers = #tpu.dot_dimension_numbers<[1], [0], [0], [1], [0, 0, 1, 1], [], []>} : vector<16x64xbf16>, vector<64x64xbf16>, vector<16x64xf32> -> vector<16x64xf32>
    %265 = vector.extract_strided_slice %35 {offsets = [1, 0], sizes = [1, 64], strides = [1, 1]} : vector<2x64xf32> to vector<1x64xf32>
    %266 = vector.broadcast %265 : vector<1x64xf32> to vector<16x64xf32>
    %267 = arith.addf %264, %266 : vector<16x64xf32>
    %268 = arith.addf %194, %267 : vector<16x64xf32>
    %269 = vector.extract_strided_slice %36 {offsets = [1, 0], sizes = [1, 64], strides = [1, 1]} : vector<2x64xf32> to vector<1x64xf32>
    %270 = vector.extract_strided_slice %37 {offsets = [1, 0], sizes = [1, 64], strides = [1, 1]} : vector<2x64xf32> to vector<1x64xf32>
    %cst_96 = arith.constant dense<0.000000e+00> : vector<16xf32>
    %271 = vector.multi_reduction <add>, %268, %cst_96 [1] : vector<16x64xf32> to vector<16xf32>
    %272 = vector.shape_cast %271 : vector<16xf32> to vector<16x1xf32>
    %cst_97 = arith.constant 6.400000e+01 : f32
    %273 = vector.broadcast %cst_97 : f32 to vector<16x1xf32>
    %274 = arith.divf %272, %273 : vector<16x1xf32>
    %275 = vector.broadcast %274 : vector<16x1xf32> to vector<16x64xf32>
    %276 = arith.subf %268, %275 : vector<16x64xf32>
    %277 = arith.mulf %276, %276 : vector<16x64xf32>
    %cst_98 = arith.constant dense<0.000000e+00> : vector<16xf32>
    %278 = vector.multi_reduction <add>, %277, %cst_98 [1] : vector<16x64xf32> to vector<16xf32>
    %279 = vector.shape_cast %278 : vector<16xf32> to vector<16x1xf32>
    %cst_99 = arith.constant 6.400000e+01 : f32
    %280 = vector.broadcast %cst_99 : f32 to vector<16x1xf32>
    %281 = arith.divf %279, %280 : vector<16x1xf32>
    %282 = vector.broadcast %274 : vector<16x1xf32> to vector<16x64xf32>
    %283 = arith.subf %268, %282 : vector<16x64xf32>
    %cst_100 = arith.constant 9.99999997E-7 : f32
    %284 = vector.broadcast %cst_100 : f32 to vector<16x1xf32>
    %285 = arith.addf %281, %284 : vector<16x1xf32>
    %286 = math.rsqrt %285 : vector<16x1xf32>
    %287 = vector.broadcast %286 : vector<16x1xf32> to vector<16x64xf32>
    %288 = arith.mulf %283, %287 : vector<16x64xf32>
    %289 = vector.broadcast %269 : vector<1x64xf32> to vector<16x64xf32>
    %290 = arith.mulf %288, %289 : vector<16x64xf32>
    %291 = vector.broadcast %270 : vector<1x64xf32> to vector<16x64xf32>
    %292 = arith.addf %290, %291 : vector<16x64xf32>
    %293 = arith.truncf %292 : vector<16x64xf32> to vector<16x64xbf16>
    %294 = vector.extract_strided_slice %38 {offsets = [1, 0, 0], sizes = [1, 64, 256], strides = [1, 1, 1]} : vector<2x64x256xbf16> to vector<1x64x256xbf16>
    %295 = vector.shape_cast %294 : vector<1x64x256xbf16> to vector<64x256xbf16>
    %cst_101 = arith.constant dense<0.000000e+00> : vector<16x256xf32>
    %296 = tpu.matmul %293, %295, %cst_101 {dimension_numbers = #tpu.dot_dimension_numbers<[1], [0], [0], [1], [0, 0, 1, 1], [], []>} : vector<16x64xbf16>, vector<64x256xbf16>, vector<16x256xf32> -> vector<16x256xf32>
    %297 = vector.extract_strided_slice %39 {offsets = [1, 0], sizes = [1, 256], strides = [1, 1]} : vector<2x256xf32> to vector<1x256xf32>
    %298 = vector.broadcast %297 : vector<1x256xf32> to vector<16x256xf32>
    %299 = arith.addf %296, %298 : vector<16x256xf32>
    %cst_102 = arith.constant 5.000000e-01 : f32
    %300 = vector.broadcast %cst_102 : f32 to vector<16x256xf32>
    %301 = arith.mulf %300, %299 : vector<16x256xf32>
    %cst_103 = arith.constant 0.707106769 : f32
    %302 = vector.broadcast %cst_103 : f32 to vector<16x256xf32>
    %303 = arith.mulf %299, %302 : vector<16x256xf32>
    %cst_104 = arith.constant 0.000000e+00 : f32
    %304 = vector.broadcast %cst_104 : f32 to vector<16x256xf32>
    %305 = arith.cmpf oge, %303, %304 : vector<16x256xf32>
    %cst_105 = arith.constant 1.000000e+00 : f32
    %cst_106 = arith.constant -1.000000e+00 : f32
    %306 = vector.broadcast %cst_105 : f32 to vector<16x256xf32>
    %307 = vector.broadcast %cst_106 : f32 to vector<16x256xf32>
    %308 = arith.select %305, %306, %307 : vector<16x256xi1>, vector<16x256xf32>
    %309 = math.absf %303 : vector<16x256xf32>
    %cst_107 = arith.constant 0.327591091 : f32
    %310 = vector.broadcast %cst_107 : f32 to vector<16x256xf32>
    %311 = arith.mulf %310, %309 : vector<16x256xf32>
    %cst_108 = arith.constant 1.000000e+00 : f32
    %312 = vector.broadcast %cst_108 : f32 to vector<16x256xf32>
    %313 = arith.addf %312, %311 : vector<16x256xf32>
    %314 = tpu.reciprocal %313 {approx = true} : vector<16x256xf32> -> vector<16x256xf32>
    %cst_109 = arith.constant 1.06140542 : f32
    %315 = vector.broadcast %cst_109 : f32 to vector<16x256xf32>
    %316 = arith.mulf %315, %314 : vector<16x256xf32>
    %cst_110 = arith.constant -1.45315206 : f32
    %317 = vector.broadcast %cst_110 : f32 to vector<16x256xf32>
    %318 = arith.addf %316, %317 : vector<16x256xf32>
    %319 = arith.mulf %318, %314 : vector<16x256xf32>
    %cst_111 = arith.constant 1.42141378 : f32
    %320 = vector.broadcast %cst_111 : f32 to vector<16x256xf32>
    %321 = arith.addf %319, %320 : vector<16x256xf32>
    %322 = arith.mulf %321, %314 : vector<16x256xf32>
    %cst_112 = arith.constant -0.284496725 : f32
    %323 = vector.broadcast %cst_112 : f32 to vector<16x256xf32>
    %324 = arith.addf %322, %323 : vector<16x256xf32>
    %325 = arith.mulf %324, %314 : vector<16x256xf32>
    %cst_113 = arith.constant 0.254829586 : f32
    %326 = vector.broadcast %cst_113 : f32 to vector<16x256xf32>
    %327 = arith.addf %325, %326 : vector<16x256xf32>
    %328 = arith.mulf %327, %314 : vector<16x256xf32>
    %cst_114 = arith.constant 0.000000e+00 : f32
    %329 = vector.broadcast %cst_114 : f32 to vector<16x256xf32>
    %330 = arith.subf %329, %309 : vector<16x256xf32>
    %331 = arith.mulf %330, %309 : vector<16x256xf32>
    %332 = math.exp %331 : vector<16x256xf32>
    %333 = arith.mulf %328, %332 : vector<16x256xf32>
    %cst_115 = arith.constant 1.000000e+00 : f32
    %334 = vector.broadcast %cst_115 : f32 to vector<16x256xf32>
    %335 = arith.subf %334, %333 : vector<16x256xf32>
    %336 = arith.mulf %308, %335 : vector<16x256xf32>
    %cst_116 = arith.constant 1.000000e+00 : f32
    %337 = vector.broadcast %cst_116 : f32 to vector<16x256xf32>
    %338 = arith.addf %337, %336 : vector<16x256xf32>
    %339 = arith.mulf %301, %338 : vector<16x256xf32>
    %340 = arith.truncf %339 : vector<16x256xf32> to vector<16x256xbf16>
    %341 = vector.extract_strided_slice %40 {offsets = [1, 0, 0], sizes = [1, 256, 64], strides = [1, 1, 1]} : vector<2x256x64xbf16> to vector<1x256x64xbf16>
    %342 = vector.shape_cast %341 : vector<1x256x64xbf16> to vector<256x64xbf16>
    %cst_117 = arith.constant dense<0.000000e+00> : vector<16x64xf32>
    %343 = tpu.matmul %340, %342, %cst_117 {dimension_numbers = #tpu.dot_dimension_numbers<[1], [0], [0], [1], [0, 0, 1, 1], [], []>} : vector<16x256xbf16>, vector<256x64xbf16>, vector<16x64xf32> -> vector<16x64xf32>
    %344 = vector.extract_strided_slice %41 {offsets = [1, 0], sizes = [1, 64], strides = [1, 1]} : vector<2x64xf32> to vector<1x64xf32>
    %345 = vector.broadcast %344 : vector<1x64xf32> to vector<16x64xf32>
    %346 = arith.addf %343, %345 : vector<16x64xf32>
    %347 = arith.addf %268, %346 : vector<16x64xf32>
    %c0_118 = arith.constant 0 : index
    %c0_119 = arith.constant 0 : index
    %348 = vector.load %arg22[%c0_118, %c0_119] : memref<1x64xf32, #tpu.memory_space<vmem>>, vector<1x64xf32>
    %c0_120 = arith.constant 0 : index
    %c0_121 = arith.constant 0 : index
    %349 = vector.load %arg23[%c0_120, %c0_121] : memref<1x64xf32, #tpu.memory_space<vmem>>, vector<1x64xf32>
    %cst_122 = arith.constant dense<0.000000e+00> : vector<16xf32>
    %350 = vector.multi_reduction <add>, %347, %cst_122 [1] : vector<16x64xf32> to vector<16xf32>
    %351 = vector.shape_cast %350 : vector<16xf32> to vector<16x1xf32>
    %cst_123 = arith.constant 6.400000e+01 : f32
    %352 = vector.broadcast %cst_123 : f32 to vector<16x1xf32>
    %353 = arith.divf %351, %352 : vector<16x1xf32>
    %354 = vector.broadcast %353 : vector<16x1xf32> to vector<16x64xf32>
    %355 = arith.subf %347, %354 : vector<16x64xf32>
    %356 = arith.mulf %355, %355 : vector<16x64xf32>
    %cst_124 = arith.constant dense<0.000000e+00> : vector<16xf32>
    %357 = vector.multi_reduction <add>, %356, %cst_124 [1] : vector<16x64xf32> to vector<16xf32>
    %358 = vector.shape_cast %357 : vector<16xf32> to vector<16x1xf32>
    %cst_125 = arith.constant 6.400000e+01 : f32
    %359 = vector.broadcast %cst_125 : f32 to vector<16x1xf32>
    %360 = arith.divf %358, %359 : vector<16x1xf32>
    %361 = vector.broadcast %353 : vector<16x1xf32> to vector<16x64xf32>
    %362 = arith.subf %347, %361 : vector<16x64xf32>
    %cst_126 = arith.constant 9.99999997E-7 : f32
    %363 = vector.broadcast %cst_126 : f32 to vector<16x1xf32>
    %364 = arith.addf %360, %363 : vector<16x1xf32>
    %365 = math.rsqrt %364 : vector<16x1xf32>
    %366 = vector.broadcast %365 : vector<16x1xf32> to vector<16x64xf32>
    %367 = arith.mulf %362, %366 : vector<16x64xf32>
    %368 = vector.broadcast %348 : vector<1x64xf32> to vector<16x64xf32>
    %369 = arith.mulf %367, %368 : vector<16x64xf32>
    %370 = vector.broadcast %349 : vector<1x64xf32> to vector<16x64xf32>
    %371 = arith.addf %369, %370 : vector<16x64xf32>
    %372 = arith.truncf %371 : vector<16x64xf32> to vector<16x64xbf16>
    %c0_127 = arith.constant 0 : index
    %c0_128 = arith.constant 0 : index
    %373 = vector.load %arg24[%c0_127, %c0_128] : memref<64x256xbf16, #tpu.memory_space<vmem>>, vector<64x256xbf16>
    %cst_129 = arith.constant dense<0.000000e+00> : vector<16x256xf32>
    %374 = tpu.matmul %372, %373, %cst_129 {dimension_numbers = #tpu.dot_dimension_numbers<[1], [0], [0], [1], [0, 0, 1, 1], [], []>} : vector<16x64xbf16>, vector<64x256xbf16>, vector<16x256xf32> -> vector<16x256xf32>
    %c0_130 = arith.constant 0 : index
    %c0_131 = arith.constant 0 : index
    %375 = vector.load %arg25[%c0_130, %c0_131] : memref<1x256xf32, #tpu.memory_space<vmem>>, vector<1x256xf32>
    %376 = vector.broadcast %375 : vector<1x256xf32> to vector<16x256xf32>
    %377 = arith.addf %374, %376 : vector<16x256xf32>
    %378 = arith.addf %377, %23 : vector<16x256xf32>
    %c0_132 = arith.constant 0 : index
    %c0_133 = arith.constant 0 : index
    %c0_134 = arith.constant 0 : index
    %379 = vector.load %arg26[%c0_132, %c0_133, %c0_134] : memref<1x16x256xf32, #tpu.memory_space<vmem>>, vector<1x16x256xf32>
    %380 = vector.shape_cast %379 : vector<1x16x256xf32> to vector<16x256xf32>
    %381 = vector.shape_cast %378 : vector<16x256xf32> to vector<1x16x256xf32>
    tpu.vector_store %arg26[%c0_132, %c0_133, %c0_134], %381 {strides = array<i32>} : memref<1x16x256xf32, #tpu.memory_space<vmem>>, vector<1x16x256xf32>,
    return
  }
  func.func @transform_0(%arg0: i32) -> (i32, i32, i32) {
    %c0_i32 = arith.constant 0 : i32
    %c0_i32_0 = arith.constant 0 : i32
    %c0_i32_1 = arith.constant 0 : i32
    return %arg0, %c0_i32, %c0_i32_0 : i32, i32, i32
  }
  func.func @transform_1(%arg0: i32) -> (i32, i32) {
    %c0_i32 = arith.constant 0 : i32
    %c0_i32_0 = arith.constant 0 : i32
    %c0_i32_1 = arith.constant 0 : i32
    return %c0_i32, %c0_i32_0 : i32, i32
  }
  func.func @transform_2(%arg0: i32) -> (i32, i32) {
    %c0_i32 = arith.constant 0 : i32
    %c0_i32_0 = arith.constant 0 : i32
    %c0_i32_1 = arith.constant 0 : i32
    return %c0_i32, %c0_i32_0 : i32, i32
  }
  func.func @transform_3(%arg0: i32) -> (i32, i32) {
    %c0_i32 = arith.constant 0 : i32
    %c0_i32_0 = arith.constant 0 : i32
    %c0_i32_1 = arith.constant 0 : i32
    return %c0_i32, %c0_i32_0 : i32, i32
  }
  func.func @transform_4(%arg0: i32) -> (i32, i32) {
    %c0_i32 = arith.constant 0 : i32
    %c0_i32_0 = arith.constant 0 : i32
    %c0_i32_1 = arith.constant 0 : i32
    return %c0_i32, %c0_i32_0 : i32, i32
  }
  func.func @transform_5(%arg0: i32) -> (i32, i32) {
    %c0_i32 = arith.constant 0 : i32
    %c0_i32_0 = arith.constant 0 : i32
    %c0_i32_1 = arith.constant 0 : i32
    return %c0_i32, %c0_i32_0 : i32, i32
  }
  func.func @transform_6(%arg0: i32) -> (i32, i32) {
    %c0_i32 = arith.constant 0 : i32
    %c0_i32_0 = arith.constant 0 : i32
    %c0_i32_1 = arith.constant 0 : i32
    return %c0_i32, %c0_i32_0 : i32, i32
  }
  func.func @transform_7(%arg0: i32) -> (i32, i32) {
    %c0_i32 = arith.constant 0 : i32
    %c0_i32_0 = arith.constant 0 : i32
    %c0_i32_1 = arith.constant 0 : i32
    return %c0_i32, %c0_i32_0 : i32, i32
  }
  func.func @transform_8(%arg0: i32) -> (i32, i32) {
    %c0_i32 = arith.constant 0 : i32
    %c0_i32_0 = arith.constant 0 : i32
    %c0_i32_1 = arith.constant 0 : i32
    return %c0_i32, %c0_i32_0 : i32, i32
  }
  func.func @transform_9(%arg0: i32) -> (i32, i32) {
    %c0_i32 = arith.constant 0 : i32
    %c0_i32_0 = arith.constant 0 : i32
    %c0_i32_1 = arith.constant 0 : i32
    return %c0_i32, %c0_i32_0 : i32, i32
  }
  func.func @transform_10(%arg0: i32) -> (i32, i32) {
    %c0_i32 = arith.constant 0 : i32
    %c0_i32_0 = arith.constant 0 : i32
    %c0_i32_1 = arith.constant 0 : i32
    return %c0_i32, %c0_i32_0 : i32, i32
  }
  func.func @transform_11(%arg0: i32) -> (i32, i32, i32) {
    %c0_i32 = arith.constant 0 : i32
    %c0_i32_0 = arith.constant 0 : i32
    %c0_i32_1 = arith.constant 0 : i32
    %c0_i32_2 = arith.constant 0 : i32
    return %c0_i32, %c0_i32_0, %c0_i32_1 : i32, i32, i32
  }
  func.func @transform_12(%arg0: i32) -> (i32, i32) {
    %c0_i32 = arith.constant 0 : i32
    %c0_i32_0 = arith.constant 0 : i32
    %c0_i32_1 = arith.constant 0 : i32
    return %c0_i32, %c0_i32_0 : i32, i32
  }
  func.func @transform_13(%arg0: i32) -> (i32, i32, i32) {
    %c0_i32 = arith.constant 0 : i32
    %c0_i32_0 = arith.constant 0 : i32
    %c0_i32_1 = arith.constant 0 : i32
    %c0_i32_2 = arith.constant 0 : i32
    return %c0_i32, %c0_i32_0, %c0_i32_1 : i32, i32, i32
  }
  func.func @transform_14(%arg0: i32) -> (i32, i32) {
    %c0_i32 = arith.constant 0 : i32
    %c0_i32_0 = arith.constant 0 : i32
    %c0_i32_1 = arith.constant 0 : i32
    return %c0_i32, %c0_i32_0 : i32, i32
  }
  func.func @transform_15(%arg0: i32) -> (i32, i32) {
    %c0_i32 = arith.constant 0 : i32
    %c0_i32_0 = arith.constant 0 : i32
    %c0_i32_1 = arith.constant 0 : i32
    return %c0_i32, %c0_i32_0 : i32, i32
  }
  func.func @transform_16(%arg0: i32) -> (i32, i32) {
    %c0_i32 = arith.constant 0 : i32
    %c0_i32_0 = arith.constant 0 : i32
    %c0_i32_1 = arith.constant 0 : i32
    return %c0_i32, %c0_i32_0 : i32, i32
  }
  func.func @transform_17(%arg0: i32) -> (i32, i32, i32) {
    %c0_i32 = arith.constant 0 : i32
    %c0_i32_0 = arith.constant 0 : i32
    %c0_i32_1 = arith.constant 0 : i32
    %c0_i32_2 = arith.constant 0 : i32
    return %c0_i32, %c0_i32_0, %c0_i32_1 : i32, i32, i32
  }
  func.func @transform_18(%arg0: i32) -> (i32, i32) {
    %c0_i32 = arith.constant 0 : i32
    %c0_i32_0 = arith.constant 0 : i32
    %c0_i32_1 = arith.constant 0 : i32
    return %c0_i32, %c0_i32_0 : i32, i32
  }
  func.func @transform_19(%arg0: i32) -> (i32, i32, i32) {
    %c0_i32 = arith.constant 0 : i32
    %c0_i32_0 = arith.constant 0 : i32
    %c0_i32_1 = arith.constant 0 : i32
    %c0_i32_2 = arith.constant 0 : i32
    return %c0_i32, %c0_i32_0, %c0_i32_1 : i32, i32, i32
  }
  func.func @transform_20(%arg0: i32) -> (i32, i32) {
    %c0_i32 = arith.constant 0 : i32
    %c0_i32_0 = arith.constant 0 : i32
    %c0_i32_1 = arith.constant 0 : i32
    return %c0_i32, %c0_i32_0 : i32, i32
  }
  func.func @transform_21(%arg0: i32) -> (i32, i32) {
    %c0_i32 = arith.constant 0 : i32
    %c0_i32_0 = arith.constant 0 : i32
    %c0_i32_1 = arith.constant 0 : i32
    return %c0_i32, %c0_i32_0 : i32, i32
  }
  func.func @transform_22(%arg0: i32) -> (i32, i32) {
    %c0_i32 = arith.constant 0 : i32
    %c0_i32_0 = arith.constant 0 : i32
    %c0_i32_1 = arith.constant 0 : i32
    return %c0_i32, %c0_i32_0 : i32, i32
  }
  func.func @transform_23(%arg0: i32) -> (i32, i32) {
    %c0_i32 = arith.constant 0 : i32
    %c0_i32_0 = arith.constant 0 : i32
    %c0_i32_1 = arith.constant 0 : i32
    return %c0_i32, %c0_i32_0 : i32, i32
  }
  func.func @transform_24(%arg0: i32) -> (i32, i32) {
    %c0_i32 = arith.constant 0 : i32
    %c0_i32_0 = arith.constant 0 : i32
    %c0_i32_1 = arith.constant 0 : i32
    return %c0_i32, %c0_i32_0 : i32, i32
  }
  func.func @transform_25(%arg0: i32) -> (i32, i32, i32) {
    %c0_i32 = arith.constant 0 : i32
    %c0_i32_0 = arith.constant 0 : i32
    %c0_i32_1 = arith.constant 0 : i32
    return %arg0, %c0_i32, %c0_i32_0 : i32, i32, i32
  }
}

</mosaic_0001>

<bundles_post_ra>
// kernel: model_forward.1
= control target key start
LH: loop header
LB: loop body
LE: loop exit
PB: predicated region body
PF: predicated region fallthrough
CT: control target
= control target key end

     0   :  { %s8515_s0 = inlined_call_operand.vmem [shape: f32[2,16,256], index: 0, kind: input, shape index: {}]   ;;  %s8516_s1 = inlined_call_operand.vmem [shape: f32[16,48], index: 1, kind: input, shape index: {}]   ;;  %s8517_s2 = inlined_call_operand.vmem [shape: bf16[256,512], index: 2, kind: input, shape index: {}]   ;;  %s8518_s3 = inlined_call_operand.hbm [shape: f32[16,512], index: 3, kind: input, shape index: {}]   ;;  %s8519_s4 = inlined_call_operand.hbm [shape: f32[16,32], index: 4, kind: input, shape index: {}]   ;;  %s8520_s5 = inlined_call_operand.vmem [shape: f32[1,256], index: 5, kind: input, shape index: {}]   ;;  %s8521_s6 = inlined_call_operand.vmem [shape: bf16[256,64], index: 6, kind: input, shape index: {}]   ;;  %s8522_s7 = inlined_call_operand.hbm [shape: f32[16,64], index: 7, kind: input, shape index: {}]   ;;  %s8523_s8 = inlined_call_operand.vmem [shape: f32[128,64], index: 8, kind: input, shape index: {}]   ;;  %s8524_s9 = inlined_call_operand.hbm [shape: f32[2,64], index: 9, kind: input, shape index: {}]   ;;  %s8525_s10 = inlined_call_operand.hbm [shape: f32[2,64], index: 10, kind: input, shape index: {}]   ;;  %s8526_s11 = inlined_call_operand.vmem [shape: bf16[2,64,192], index: 11, kind: input, shape index: {}]   ;;  %s8527_s12 = inlined_call_operand.vmem [shape: f32[2,192], index: 12, kind: input, shape index: {}]   ;;  %s8528_s13 = inlined_call_operand.hbm [shape: bf16[2,64,64], index: 13, kind: input, shape index: {}]   ;;  %s8529_s14 = inlined_call_operand.hbm [shape: f32[2,64], index: 14, kind: input, shape index: {}]   ;;  %s8530_s15 = inlined_call_operand.hbm [shape: f32[2,64], index: 15, kind: input, shape index: {}]   ;;  %s8531_s16 = inlined_call_operand.hbm [shape: f32[2,64], index: 16, kind: input, shape index: {}]   ;;  %s8532_s17 = inlined_call_operand.vmem [shape: bf16[2,64,256], index: 17, kind: input, shape index: {}]   ;;  %s8533_s18 = inlined_call_operand.vmem [shape: f32[2,256], index: 18, kind: input, shape index: {}]   ;;  %s8534_s19 = inlined_call_operand.vmem [shape: bf16[2,256,64], index: 19, kind: input, shape index: {}]   ;;  %s8535_s20 = inlined_call_operand.hbm [shape: f32[2,64], index: 20, kind: input, shape index: {}]   ;;  %s8536_s21 = inlined_call_operand.hbm [shape: f32[1,64], index: 21, kind: input, shape index: {}]   ;;  %s8537_s22 = inlined_call_operand.hbm [shape: f32[1,64], index: 22, kind: input, shape index: {}]   ;;  %s8538_s23 = inlined_call_operand.hbm [shape: bf16[64,256], index: 23, kind: input, shape index: {}]   ;;  %s8539_s24 = inlined_call_operand.hbm [shape: f32[1,256], index: 24, kind: input, shape index: {}]   ;;  %s8540_s25 = inlined_call_operand.hbm [shape: f32[2,16,256], index: 25, kind: output, shape index: {}]  }
   0x1   :  { %8577 = sst [smem:[#allocation43_spill]] %s8515_s0 }
   0x2   :  { %8578 = sst [smem:[#allocation44_spill]] %s8516_s1 }
   0x3   :  { %8579 = sst [smem:[#allocation45_spill]] %s8517_s2 }
   0x4   :  { %8580 = sst [smem:[#allocation46_spill]] %s8518_s3 }
   0x5   :  { %8581 = sst [smem:[#allocation47_spill]] %s8519_s4 }
   0x6   :  { %8582 = sst [smem:[#allocation48_spill]] %s8520_s5 }
   0x7   :  { %8583 = sst [smem:[#allocation49_spill]] %s8521_s6 }
   0x8   :  { %8584 = sst [smem:[#allocation50_spill]] %s8522_s7 }
   0x9   :  { %8585 = sst [smem:[#allocation51_spill]] %s8523_s8 }
   0xa   :  { %8586 = sst [smem:[#allocation52_spill]] %s8524_s9 }
   0xb   :  { %8587 = sst [smem:[#allocation53_spill]] %s8526_s11 }
   0xc   :  { %8588 = sst [smem:[#allocation54_spill]] %s8527_s12 }
   0xd   :  { %8589 = sst [smem:[#allocation55_spill]] %s8528_s13 }
   0xe   :  { %8590 = sst [smem:[#allocation56_spill]] %s8530_s15 }
   0xf   :  { %8591 = sst [smem:[#allocation57_spill]] %s8532_s17 }
  0x10   :  { %8592 = sst [smem:[#allocation58_spill]] %s8533_s18 }
  0x11   :  { %8593 = sst [smem:[#allocation59_spill]] %s8534_s19 }
  0x12   :  { %8594 = sst [smem:[#allocation60_spill]] %s8540_s25 }
  0x13   :  { %30 = vsyncpa [#allocation3], 0 }
  0x14   :  { %31 = vsyncpa [#allocation6], 0 }
  0x15   :  { %32 = vsyncpa [#allocation9], 0 }
  0x16   :  { %33 = vsyncpa [#allocation12], 0 }
  0x17   :  { %34 = vsyncpa [#allocation15], 0 }
  0x18   :  { %35 = vsyncpa [#allocation18], 0 }
  0x19   :  { %36 = vsyncpa [#allocation21], 0 }
  0x1a   :  { %37 = vsyncpa [#allocation24], 0 }
  0x1b   :  { %38 = vsyncpa [#allocation4], 0 }
  0x1c   :  { %40 = vsyncpa [#allocation4 + $0x1], 0  ;;  %s6747_s29 = smov 0   ;;  %s6749_s2 = smov 0  }
  0x1d   :  { %s6751_s6 = smov 0   ;;  %s6753_s30 = smov 0  }
  0x1e LB: > { %8595 = sst [smem:[#allocation35_spill]] %s6573_s29  ;;  %s6768_s7 = sadd.s32 4294967295, %s6585_s30   ;;  %s6585_s30 = sphi %s6753_s30, %s8660_s30   ;;  %s6581_s6 = sphi %s6751_s6, %s8663_s6   ;;  %s6577_s2 = sphi %s6749_s2, %s8662_s2   ;;  %s6573_s29 = sphi %s6747_s29, %s8661_s29  }
  0x1f   : > { %8596 = sst [smem:[#allocation36_spill]] %s6577_s2  ;;  %s4715_s3 = sadd.s32 4294967294, %s6585_s30  }
  0x20   : > { %8597 = sst [smem:[#allocation37_spill]] %s6581_s6  ;;  %s6772_s26 = sadd.s32 1, %s6585_s30  }
  0x21   : > { %8598 = sst [smem:[#allocation38_spill]] %s6585_s30  ;;  %s583_s1 = sadd.s32 1, %s6581_s6 }
  0x22   : > { %8599 = sst [smem:[#allocation39_spill]] %s6772_s26  ;;  %s580_s8 = ssub.s32 %s6585_s30, %s6772_s26 }
  0x23   : > { %p593_p0 = scmp.ne.s32.totalorder %s6581_s6, %s6577_s2  ;;  %p581_p1 = scmp.eq.s32.totalorder %s580_s8, 0 }
  0x24   : > { %p594_p2 = scmp.eq.s32.totalorder %s6768_s7, 1  ;;  %p599_p3 = scmp.ne.s32.totalorder %s6577_s2, %s6573_s29 }
  0x25   : > { %p600_p4 = scmp.eq.s32.totalorder %s4715_s3, 1  ;;  %p4716_p7 = scmp.ge.s32.totalorder %s6585_s30, 1 }
  0x26   : > { %s6783_s27 = scalar_select %p581_p1, %s6581_s6, %s583_s1  }
  0x27   : > { %p6785_p5 = por %p594_p2, %p593_p0  ;;  %p6789_p6 = por %p600_p4, %p599_p3 }
  0x28   : > { %8600 = sst [smem:[#allocation40_spill]] %s6783_s27  ;;  %p607_p8 = scmp.lt.s32.totalorder %s6585_s30, 3 }
  0x29   : > { %s8601_s4 = scalar_select %p6785_p5, 1, 0 }
  0x2a   : > { %s8603_s28 = scalar_select %p6789_p6, 1, 0 }
  0x2b   : > { %8602 = sst [smem:[#allocation41_spill]] %s8601_s4  ;;  %p8558_p9 = scmp.eq.s32.totalorder %s6768_s7, 0 }
  0x2c   : > { %8604 = sst [smem:[#allocation42_spill]] %s8603_s28  ;;  %p6796_p10 = pnand %p4716_p7, %p607_p8 }
  0x2d   : > { %s6587_s5 = smov [#allocation5]   ;;  %s6588_s1 = smov [#allocation8]  }
  0x2e   : > { %s8605_s9 = scalar_select %p6796_p10, 1, 0 }
  0x2f   : > { %s638_s0 = sshll.u32 %s6587_s5, 4  ;;  %p5516_p11 = pneg %p6796_p10  ;;  %s6802_s0 = int_to_ptr.vmem [resolvable:$true] %s638_s0 }
  0x30   : > { %s674_s8 = sshll.u32 %s6588_s1, 4  ;;  %s6589_s27 = smov [#allocation11]   ;;  %s6810_s8 = int_to_ptr.vmem [resolvable:$true] %s674_s8 }
  0x31   : > { %p6806_p12 = pnand %p8558_p9, %p5516_p11  ;;  %s6812_s6 = sshll.u32 %s6589_s27, 4  ;;  %s702_s6 = int_to_ptr.vmem [resolvable:$true] %s6812_s6 }
  0x32   : > { %s8607_s5 = sld [smem:[#allocation47_spill]] }
  0x33   : > { %p6822_p0 = pneg %p6806_p12 }
  0x38   : > { %s6099_s29 = scalar_lea.hbm %s8607_s5, 256 }
  0x39   : > { %p6100_p13 = scmp.ne.s32.totalorder %s8607_s5, %s6099_s29  ;;  %p6106_p3 = scmp.lt.u32.totalorder %s6099_s29, %s8607_s5 }
  0x3b   : > { %p6102_p1 = pnand %p6822_p0, %p6100_p13 }
  0x3d   : > { %p6103_p2 = pneg %p6102_p1 }
  0x3f   : > { %p6108_p4 = pnand %p6106_p3, %p6103_p2 }
  0x41   : > { %6111 = shalt.err (!%p6108_p4)
}
  0x42   : > { %s6112_s25 = scalar_lea.vmem %s6802_s0, 256  ;;  %p6120_p9 = scmp.lt.s32.totalorder %s6802_s0, %s6802_s0 }
  0x43   : > { %p6113_p7 = scmp.ne.s32.totalorder %s6802_s0, %s6112_s25  ;;  %p6121_p6 = scmp.lt.s32.totalorder %s6112_s25, %s6112_s25 }
  0x45   : > { %p6115_p8 = pnand %p6113_p7, %p6822_p0  ;;  %p6122_p13 = por %p6121_p6, %p6120_p9 }
  0x47   : > { %p6116_p11 = pneg %p6115_p8 }
  0x49   : > { %p6123_p1 = pnand %p6122_p13, %p6116_p11 }
  0x4b   : > { %6126 = shalt.err (!%p6123_p1)
}
  0x4c   : > { %s8567_s30 = smov 128   ;;  %s8569_s29 = smov 8  }
  0x4d   : > { %5522 = dma.hbm_to_vmem [thread:$0]  (!%p6806_p12), %s8607_s5, 256, %s6802_s0, [#allocation6], %s8567_s30, %s8567_s30, %s8569_s29  }
  0x4e   : > { %s8609_s2 = sld [smem:[#allocation52_spill]] }
  0x54   : > { %s8610_s18 = smov %s8609_s2  ;;  %s6127_s25 = scalar_lea.hbm %s8609_s2, 32 }
  0x55   : > { %p6128_p6 = scmp.ne.s32.totalorder %s8610_s18, %s6127_s25  ;;  %p6134_p3 = scmp.lt.u32.totalorder %s6127_s25, %s8610_s18 }
  0x57   : > { %p6130_p9 = pnand %p6128_p6, %p6822_p0 }
  0x59   : > { %p6131_p2 = pneg %p6130_p9 }
  0x5b   : > { %p6136_p4 = pnand %p6134_p3, %p6131_p2 }
  0x5d   : > { %6139 = shalt.err (!%p6136_p4)
}
  0x5e   : > { %s6140_s0 = scalar_lea.vmem %s6810_s8, 32  ;;  %p6148_p13 = scmp.lt.s32.totalorder %s6810_s8, %s6810_s8 }
  0x5f   : > { %p6141_p7 = scmp.ne.s32.totalorder %s6810_s8, %s6140_s0  ;;  %p6149_p1 = scmp.lt.s32.totalorder %s6140_s0, %s6140_s0 }
  0x61   : > { %p6143_p8 = pnand %p6141_p7, %p6822_p0  ;;  %p6150_p6 = por %p6149_p1, %p6148_p13 }
  0x63   : > { %p6144_p11 = pneg %p6143_p8 }
  0x65   : > { %p6151_p9 = pnand %p6150_p6, %p6144_p11 }
  0x67   : > { %6154 = shalt.err (!%p6151_p9)
}
  0x68   : > { %5528 = dma.hbm_to_vmem [thread:$0]  (!%p6806_p12), %s8610_s18, 32, %s6810_s8, [#allocation9]  }
  0x69   : > { %s8611_s13 = sld [smem:[#allocation55_spill]] }
  0x6f   : > { %s6155_s2 = scalar_lea.hbm %s8611_s13, 1024 }
  0x70   : > { %p6156_p2 = scmp.ne.s32.totalorder %s8611_s13, %s6155_s2  ;;  %p6162_p7 = scmp.lt.u32.totalorder %s6155_s2, %s8611_s13 }
  0x72   : > { %p6158_p3 = pnand %p6156_p2, %p6822_p0 }
  0x74   : > { %p6159_p4 = pneg %p6158_p3 }
  0x76   : > { %p6164_p8 = pnand %p6162_p7, %p6159_p4 }
  0x78   : > { %6167 = shalt.err (!%p6164_p8)
}
  0x79   : > { %s6168_s25 = scalar_lea.vmem %s702_s6, 1024  ;;  %p6176_p6 = scmp.lt.s32.totalorder %s702_s6, %s702_s6 }
  0x7a   : > { %p6169_p11 = scmp.ne.s32.totalorder %s702_s6, %s6168_s25  ;;  %p6177_p9 = scmp.lt.s32.totalorder %s6168_s25, %s6168_s25 }
  0x7c   : > { %p6171_p13 = pnand %p6169_p11, %p6822_p0  ;;  %p6178_p5 = por %p6177_p9, %p6176_p6 }
  0x7e   : > { %p6172_p1 = pneg %p6171_p13 }
  0x80   : > { %p6179_p10 = pnand %p6178_p5, %p6172_p1 }
  0x82   : > { %6182 = shalt.err (!%p6179_p10)
}
  0x83   : > { %s6592_s8 = smov 64   ;;  %s6593_s0 = smov 4  }
  0x84   : > { %5534 = dma.hbm_to_vmem [thread:$0]  (!%p6806_p12), %s8611_s13, 1024, %s702_s6, [#allocation12], %s6592_s8, %s6592_s8, %s6593_s0  }
  0x85   : > { %s6594_s17 = smov [#allocation14]   ;;  %s6595_s2 = smov [#allocation17]  }
  0x86   : > { %s726_s19 = sshll.u32 %s6594_s17, 4  ;;  %s757_s26 = sshll.u32 %s6595_s2, 4  ;;  %s727_s19 = int_to_ptr.vmem [resolvable:$true] %s726_s19  ;;  %s758_s26 = int_to_ptr.vmem [resolvable:$true] %s757_s26 }
  0x87   : > { %s8612_s15 = sld [smem:[#allocation56_spill]] }
  0x8d   : > { %s6183_s27 = scalar_lea.hbm %s8612_s15, 32 }
  0x8e   : > { %p6184_p5 = scmp.ne.s32.totalorder %s8612_s15, %s6183_s27  ;;  %p6190_p3 = scmp.lt.u32.totalorder %s6183_s27, %s8612_s15 }
  0x90   : > { %p6186_p10 = pnand %p6184_p5, %p6822_p0 }
  0x92   : > { %p6187_p2 = pneg %p6186_p10 }
  0x94   : > { %p6192_p4 = pnand %p6190_p3, %p6187_p2 }
  0x96   : > { %6195 = shalt.err (!%p6192_p4)
}
  0x97   : > { %s6196_s6 = scalar_lea.vmem %s727_s19, 32  ;;  %p6204_p13 = scmp.lt.s32.totalorder %s727_s19, %s727_s19 }
  0x98   : > { %p6197_p7 = scmp.ne.s32.totalorder %s727_s19, %s6196_s6  ;;  %p6205_p1 = scmp.lt.s32.totalorder %s6196_s6, %s6196_s6 }
  0x9a   : > { %p6199_p8 = pnand %p6197_p7, %p6822_p0  ;;  %p6206_p6 = por %p6205_p1, %p6204_p13 }
  0x9c   : > { %p6200_p11 = pneg %p6199_p8 }
  0x9e   : > { %p6207_p9 = pnand %p6206_p6, %p6200_p11 }
  0xa0   : > { %6210 = shalt.err (!%p6207_p9)
}
  0xa1   : > { %5540 = dma.hbm_to_vmem [thread:$0]  (!%p6806_p12), %s8612_s15, 32, %s727_s19, [#allocation15]  }
  0xa2   : > { %s6211_s0 = scalar_lea.hbm %s8535_s20, 32 }
  0xa3   : > { %p6212_p5 = scmp.ne.s32.totalorder %s8535_s20, %s6211_s0  ;;  %p6218_p3 = scmp.lt.u32.totalorder %s6211_s0, %s8535_s20 }
  0xa5   : > { %p6214_p10 = pnand %p6212_p5, %p6822_p0 }
  0xa7   : > { %p6215_p2 = pneg %p6214_p10 }
  0xa9   : > { %p6220_p4 = pnand %p6218_p3, %p6215_p2 }
  0xab   : > { %6223 = shalt.err (!%p6220_p4)
}
  0xac   : > { %s6224_s28 = scalar_lea.vmem %s758_s26, 32  ;;  %p6232_p13 = scmp.lt.s32.totalorder %s758_s26, %s758_s26 }
  0xad   : > { %p6225_p7 = scmp.ne.s32.totalorder %s758_s26, %s6224_s28  ;;  %p6233_p1 = scmp.lt.s32.totalorder %s6224_s28, %s6224_s28 }
  0xaf   : > { %p6227_p8 = pnand %p6225_p7, %p6822_p0  ;;  %p6234_p6 = por %p6233_p1, %p6232_p13 }
  0xb1   : > { %p6228_p11 = pneg %p6227_p8 }
  0xb3   : > { %p6235_p9 = pnand %p6234_p6, %p6228_p11 }
  0xb5   : > { %6238 = shalt.err (!%p6235_p9)
}
  0xb6   : > { %5546 = dma.hbm_to_vmem [thread:$0]  (!%p6806_p12), %s8535_s20, 32, %s758_s26, [#allocation18]  }
  0xb7   : > { %s6596_s27 = smov [#allocation20]   ;;  %s6597_s6 = smov [#allocation2]  }
  0xb8   : > { %s779_s25 = sshll.u32 %s6596_s27, 4  ;;  %s625_s30 = sshll.u32 %s6597_s6, 4  ;;  %s780_s25 = int_to_ptr.vmem [resolvable:$true] %s779_s25  ;;  %s626_s30 = int_to_ptr.vmem [resolvable:$true] %s625_s30 }
  0xb9   : > { %s6239_s29 = scalar_lea.hbm %s8537_s22, 16 }
  0xba   : > { %p6240_p5 = scmp.ne.s32.totalorder %s8537_s22, %s6239_s29  ;;  %p6246_p3 = scmp.lt.u32.totalorder %s6239_s29, %s8537_s22 }
  0xbc   : > { %p6242_p10 = pnand %p6240_p5, %p6822_p0 }
  0xbe   : > { %p6243_p2 = pneg %p6242_p10 }
  0xc0   : > { %p6248_p4 = pnand %p6246_p3, %p6243_p2 }
  0xc2   : > { %6251 = shalt.err (!%p6248_p4)
}
  0xc3   : > { %s6252_s26 = scalar_lea.vmem %s780_s25, 16  ;;  %s6259_s2 = scalar_lea.vmem %s780_s25, 32 }
  0xc4   : > { %p6253_p7 = scmp.ne.s32.totalorder %s780_s25, %s6252_s26  ;;  %p6260_p13 = scmp.lt.s32.totalorder %s780_s25, %s780_s25 }
  0xc5   : > { %p6261_p1 = scmp.lt.s32.totalorder %s6259_s2, %s6252_s26 }
  0xc6   : > { %p6255_p8 = pnand %p6253_p7, %p6822_p0 }
  0xc7   : > { %p6262_p6 = por %p6261_p1, %p6260_p13 }
  0xc8   : > { %p6256_p11 = pneg %p6255_p8 }
  0xca   : > { %p6263_p9 = pnand %p6262_p6, %p6256_p11 }
  0xcc   : > { %6266 = shalt.err (!%p6263_p9)
}
  0xcd   : > { %5552 = dma.hbm_to_vmem [thread:$0]  (!%p6806_p12), %s8537_s22, 16, %s780_s25, [#allocation21]  }
  0xce   : > { %s8613_s6 = sld [smem:[#allocation46_spill]] }
  0xd4   : > { %s8614_s8 = smov %s8613_s6  ;;  %s6267_s5 = scalar_lea.hbm %s8613_s6, 1024 }
  0xd5   : > { %p6268_p5 = scmp.ne.s32.totalorder %s8614_s8, %s6267_s5  ;;  %p6274_p3 = scmp.lt.u32.totalorder %s6267_s5, %s8614_s8 }
  0xd7   : > { %p6270_p10 = pnand %p6268_p5, %p6822_p0 }
  0xd9   : > { %p6271_p2 = pneg %p6270_p10 }
  0xdb   : > { %p6276_p4 = pnand %p6274_p3, %p6271_p2 }
  0xdd   : > { %6279 = shalt.err (!%p6276_p4)
}
  0xde   : > { %s6280_s17 = scalar_lea.vmem %s626_s30, 1024  ;;  %p6288_p13 = scmp.lt.s32.totalorder %s626_s30, %s626_s30 }
  0xdf   : > { %p6281_p7 = scmp.ne.s32.totalorder %s626_s30, %s6280_s17  ;;  %p6289_p1 = scmp.lt.s32.totalorder %s6280_s17, %s6280_s17 }
  0xe1   : > { %p6283_p8 = pnand %p6281_p7, %p6822_p0  ;;  %p6290_p6 = por %p6289_p1, %p6288_p13 }
  0xe3   : > { %p6284_p11 = pneg %p6283_p8 }
  0xe5   : > { %p6291_p9 = pnand %p6290_p6, %p6284_p11 }
  0xe7   : > { %6294 = shalt.err (!%p6291_p9)
}
  0xe8   : > { %s6598_s25 = smov 512   ;;  %s6599_s26 = smov 32  }
  0xe9   : > { %5519 = dma.hbm_to_vmem [thread:$0]  (!%p6806_p12), %s8614_s8, 1024, %s626_s30, [#allocation3], %s6598_s25, %s6598_s25, %s6599_s26  }
  0xea   : > { %s6600_s19 = smov [#allocation7]   ;;  %s6601_s27 = smov [#allocation10]  }
  0xeb   : > { %s657_s1 = sshll.u32 %s6600_s19, 4  ;;  %s685_s6 = sshll.u32 %s6601_s27, 4  ;;  %s658_s1 = int_to_ptr.vmem [resolvable:$true] %s657_s1  ;;  %s686_s6 = int_to_ptr.vmem [resolvable:$true] %s685_s6 }
  0xec   : > { %s8615_s0 = sld [smem:[#allocation50_spill]] }
  0xf2   : > { %s6295_s11 = scalar_lea.hbm %s8615_s0, 256 }
  0xf3   : > { %p6296_p5 = scmp.ne.s32.totalorder %s8615_s0, %s6295_s11  ;;  %p6302_p3 = scmp.lt.u32.totalorder %s6295_s11, %s8615_s0 }
  0xf5   : > { %p6298_p10 = pnand %p6296_p5, %p6822_p0 }
  0xf7   : > { %p6299_p2 = pneg %p6298_p10 }
  0xf9   : > { %p6304_p4 = pnand %p6302_p3, %p6299_p2 }
  0xfb   : > { %6307 = shalt.err (!%p6304_p4)
}
  0xfc   : > { %s6308_s30 = scalar_lea.vmem %s658_s1, 256  ;;  %p6316_p13 = scmp.lt.s32.totalorder %s658_s1, %s658_s1 }
  0xfd   : > { %p6309_p7 = scmp.ne.s32.totalorder %s658_s1, %s6308_s30  ;;  %p6317_p1 = scmp.lt.s32.totalorder %s6308_s30, %s6308_s30 }
  0xff   : > { %p6311_p8 = pnand %p6309_p7, %p6822_p0  ;;  %p6318_p6 = por %p6317_p1, %p6316_p13 }
 0x101   : > { %p6312_p11 = pneg %p6311_p8 }
 0x103   : > { %p6319_p9 = pnand %p6318_p6, %p6312_p11 }
 0x105   : > { %6322 = shalt.err (!%p6319_p9)
}
 0x106   : > { %s8616_s25 = smov 8   ;;  %s8617_s26 = smov 128  }
 0x107   : > { %5525 = dma.hbm_to_vmem [thread:$0]  (!%p6806_p12), %s8615_s0, 256, %s658_s1, [#allocation6], %s8617_s26, %s8617_s26, %s8616_s25  }
 0x108   : > { %s6323_s19 = scalar_lea.hbm %s8525_s10, 32 }
 0x109   : > { %p6324_p5 = scmp.ne.s32.totalorder %s8525_s10, %s6323_s19  ;;  %p6330_p3 = scmp.lt.u32.totalorder %s6323_s19, %s8525_s10 }
 0x10b   : > { %p6326_p10 = pnand %p6324_p5, %p6822_p0 }
 0x10d   : > { %p6327_p2 = pneg %p6326_p10 }
 0x10f   : > { %p6332_p4 = pnand %p6330_p3, %p6327_p2 }
 0x111   : > { %6335 = shalt.err (!%p6332_p4)
}
 0x112   : > { %s6336_s12 = scalar_lea.vmem %s686_s6, 32  ;;  %p6344_p13 = scmp.lt.s32.totalorder %s686_s6, %s686_s6 }
 0x113   : > { %p6337_p7 = scmp.ne.s32.totalorder %s686_s6, %s6336_s12  ;;  %p6345_p1 = scmp.lt.s32.totalorder %s6336_s12, %s6336_s12 }
 0x115   : > { %p6339_p8 = pnand %p6337_p7, %p6822_p0  ;;  %p6346_p6 = por %p6345_p1, %p6344_p13 }
 0x117   : > { %p6340_p11 = pneg %p6339_p8 }
 0x119   : > { %p6347_p9 = pnand %p6346_p6, %p6340_p11 }
 0x11b   : > { %6350 = shalt.err (!%p6347_p9)
}
 0x11c   : > { %5531 = dma.hbm_to_vmem [thread:$0]  (!%p6806_p12), %s8525_s10, 32, %s686_s6, [#allocation9]  }
 0x11d   : > { %s6602_s30 = smov [#allocation13]   ;;  %s6603_s15 = smov [#allocation16]  }
 0x11e   : > { %s715_s13 = sshll.u32 %s6602_s30, 4  ;;  %s737_s2 = sshll.u32 %s6603_s15, 4  ;;  %s716_s13 = int_to_ptr.vmem [resolvable:$true] %s715_s13  ;;  %s738_s2 = int_to_ptr.vmem [resolvable:$true] %s737_s2 }
 0x11f   : > { %s6351_s27 = scalar_lea.hbm %s8529_s14, 32 }
 0x120   : > { %p6352_p5 = scmp.ne.s32.totalorder %s8529_s14, %s6351_s27  ;;  %p6358_p3 = scmp.lt.u32.totalorder %s6351_s27, %s8529_s14 }
 0x122   : > { %p6354_p10 = pnand %p6352_p5, %p6822_p0 }
 0x124   : > { %p6355_p2 = pneg %p6354_p10 }
 0x126   : > { %p6360_p4 = pnand %p6358_p3, %p6355_p2 }
 0x128   : > { %6363 = shalt.err (!%p6360_p4)
}
 0x129   : > { %s6364_s6 = scalar_lea.vmem %s716_s13, 32  ;;  %p6372_p13 = scmp.lt.s32.totalorder %s716_s13, %s716_s13 }
 0x12a   : > { %p6365_p7 = scmp.ne.s32.totalorder %s716_s13, %s6364_s6  ;;  %p6373_p1 = scmp.lt.s32.totalorder %s6364_s6, %s6364_s6 }
 0x12c   : > { %p6367_p8 = pnand %p6365_p7, %p6822_p0  ;;  %p6374_p6 = por %p6373_p1, %p6372_p13 }
 0x12e   : > { %p6368_p11 = pneg %p6367_p8 }
 0x130   : > { %p6375_p9 = pnand %p6374_p6, %p6368_p11 }
 0x132   : > { %6378 = shalt.err (!%p6375_p9)
}
 0x133   : > { %5537 = dma.hbm_to_vmem [thread:$0]  (!%p6806_p12), %s8529_s14, 32, %s716_s13, [#allocation12]  }
 0x134   : > { %s6379_s28 = scalar_lea.hbm %s8531_s16, 32 }
 0x135   : > { %p6380_p5 = scmp.ne.s32.totalorder %s8531_s16, %s6379_s28  ;;  %p6386_p3 = scmp.lt.u32.totalorder %s6379_s28, %s8531_s16 }
 0x137   : > { %p6382_p10 = pnand %p6380_p5, %p6822_p0 }
 0x139   : > { %p6383_p2 = pneg %p6382_p10 }
 0x13b   : > { %p6388_p4 = pnand %p6386_p3, %p6383_p2 }
 0x13d   : > { %6391 = shalt.err (!%p6388_p4)
}
 0x13e   : > { %s6392_s11 = scalar_lea.vmem %s738_s2, 32  ;;  %p6400_p13 = scmp.lt.s32.totalorder %s738_s2, %s738_s2 }
 0x13f   : > { %p6393_p7 = scmp.ne.s32.totalorder %s738_s2, %s6392_s11  ;;  %p6401_p1 = scmp.lt.s32.totalorder %s6392_s11, %s6392_s11 }
 0x141   : > { %p6395_p8 = pnand %p6393_p7, %p6822_p0  ;;  %p6402_p6 = por %p6401_p1, %p6400_p13 }
 0x143   : > { %p6396_p11 = pneg %p6395_p8 }
 0x145   : > { %p6403_p9 = pnand %p6402_p6, %p6396_p11 }
 0x147   : > { %6406 = shalt.err (!%p6403_p9)
}
 0x148   : > { %5543 = dma.hbm_to_vmem [thread:$0]  (!%p6806_p12), %s8531_s16, 32, %s738_s2, [#allocation15]  }
 0x149   : > { %s6604_s6 = smov [#allocation19]   ;;  %s6605_s17 = smov [#allocation22]  }
 0x14a   : > { %s768_s1 = sshll.u32 %s6604_s6, 4  ;;  %s789_s30 = sshll.u32 %s6605_s17, 4  ;;  %s769_s1 = int_to_ptr.vmem [resolvable:$true] %s768_s1  ;;  %s790_s30 = int_to_ptr.vmem [resolvable:$true] %s789_s30 }
 0x14b   : > { %s6407_s19 = scalar_lea.hbm %s8536_s21, 16 }
 0x14c   : > { %p6408_p5 = scmp.ne.s32.totalorder %s8536_s21, %s6407_s19  ;;  %p6414_p3 = scmp.lt.u32.totalorder %s6407_s19, %s8536_s21 }
 0x14e   : > { %p6410_p10 = pnand %p6408_p5, %p6822_p0 }
 0x150   : > { %p6411_p2 = pneg %p6410_p10 }
 0x152   : > { %p6416_p4 = pnand %p6414_p3, %p6411_p2 }
 0x154   : > { %6419 = shalt.err (!%p6416_p4)
}
 0x155   : > { %s6420_s2 = scalar_lea.vmem %s769_s1, 16  ;;  %s6427_s13 = scalar_lea.vmem %s769_s1, 32 }
 0x156   : > { %p6421_p7 = scmp.ne.s32.totalorder %s769_s1, %s6420_s2  ;;  %p6428_p13 = scmp.lt.s32.totalorder %s769_s1, %s769_s1 }
 0x157   : > { %p6429_p1 = scmp.lt.s32.totalorder %s6427_s13, %s6420_s2 }
 0x158   : > { %p6423_p8 = pnand %p6421_p7, %p6822_p0 }
 0x159   : > { %p6430_p6 = por %p6429_p1, %p6428_p13 }
 0x15a   : > { %p6424_p11 = pneg %p6423_p8 }
 0x15c   : > { %p6431_p9 = pnand %p6430_p6, %p6424_p11 }
 0x15e   : > { %6434 = shalt.err (!%p6431_p9)
}
 0x15f   : > { %5549 = dma.hbm_to_vmem [thread:$0]  (!%p6806_p12), %s8536_s21, 16, %s769_s1, [#allocation18]  }
 0x160   : > { %s6435_s28 = scalar_lea.hbm %s8538_s23, 1024 }
 0x161   : > { %p6436_p5 = scmp.ne.s32.totalorder %s8538_s23, %s6435_s28  ;;  %p6442_p3 = scmp.lt.u32.totalorder %s6435_s28, %s8538_s23 }
 0x163   : > { %p6438_p10 = pnand %p6436_p5, %p6822_p0 }
 0x165   : > { %p6439_p2 = pneg %p6438_p10 }
 0x167   : > { %p6444_p4 = pnand %p6442_p3, %p6439_p2 }
 0x169   : > { %6447 = shalt.err (!%p6444_p4)
}
 0x16a   : > { %s6448_s11 = scalar_lea.vmem %s790_s30, 1024  ;;  %p6456_p13 = scmp.lt.s32.totalorder %s790_s30, %s790_s30 }
 0x16b   : > { %p6449_p7 = scmp.ne.s32.totalorder %s790_s30, %s6448_s11  ;;  %p6457_p1 = scmp.lt.s32.totalorder %s6448_s11, %s6448_s11 }
 0x16d   : > { %p6451_p8 = pnand %p6449_p7, %p6822_p0  ;;  %p6458_p6 = por %p6457_p1, %p6456_p13 }
 0x16f   : > { %p6452_p11 = pneg %p6451_p8 }
 0x171   : > { %p6459_p9 = pnand %p6458_p6, %p6452_p11 }
 0x173   : > { %6462 = shalt.err (!%p6459_p9)
}
 0x174   : > { %5555 = dma.hbm_to_vmem [thread:$0]  (!%p6806_p12), %s8538_s23, 1024, %s790_s30, [#allocation21], %s8617_s26, %s8617_s26, %s8616_s25  }
 0x175   : > { %s6606_s13 = smov [#allocation23]   ;;  %s6463_s15 = scalar_lea.hbm %s8539_s24, 32 }
 0x176   : > { %s803_s12 = sshll.u32 %s6606_s13, 4  ;;  %p6464_p5 = scmp.ne.s32.totalorder %s8539_s24, %s6463_s15  ;;  %s804_s12 = int_to_ptr.vmem [resolvable:$true] %s803_s12 }
 0x177   : > { %p6470_p3 = scmp.lt.u32.totalorder %s6463_s15, %s8539_s24 }
 0x178   : > { %p6466_p10 = pnand %p6464_p5, %p6822_p0 }
 0x17a   : > { %p6467_p2 = pneg %p6466_p10 }
 0x17c   : > { %p6472_p4 = pnand %p6470_p3, %p6467_p2 }
 0x17e   : > { %6475 = shalt.err (!%p6472_p4)
}
 0x17f   : > { %s6476_s25 = scalar_lea.vmem %s804_s12, 32  ;;  %p6484_p13 = scmp.lt.s32.totalorder %s804_s12, %s804_s12 }
 0x180   : > { %p6477_p7 = scmp.ne.s32.totalorder %s804_s12, %s6476_s25  ;;  %p6485_p1 = scmp.lt.s32.totalorder %s6476_s25, %s6476_s25 }
 0x182   : > { %p6479_p8 = pnand %p6477_p7, %p6822_p0  ;;  %p6486_p6 = por %p6485_p1, %p6484_p13 }
 0x184   : > { %p6480_p11 = pneg %p6479_p8 }
 0x186   : > { %p6487_p9 = pnand %p6486_p6, %p6480_p11 }
 0x188   : > { %6490 = shalt.err (!%p6487_p9)
}
 0x189   : > { %5558 = dma.hbm_to_vmem [thread:$0]  (!%p6806_p12), %s8539_s24, 32, %s804_s12, [#allocation24]  }
 0x18a   : > { %p8618_p5 = scmp.ne.s32.totalorder %s8605_s9, 0 }
 0x18b   : > { %p8619_p10 = scmp.eq.s32.totalorder (!%p8618_p5), %s6768_s7, 0 }
 0x18c   : > { %824 = sbr.rel (%p8618_p5) target bundleno = 6548 (0x1994), region = 120 }
 0x193   : > { %6536 = dma.done.wait (%p8619_p10), [#allocation3], 1024   ;;  %p8620_p0 = pmov %p8619_p10 }
 0x195   : > { %6538 = vsyncadd (%p8620_p0), [#allocation3], 4294966272  ;;  %p8621_p2 = pmov %p8620_p0 }
 0x196   : > { %p8622_p3 = pmov %p8620_p0 }
 0x197   : > { %6540 = dma.done.wait (%p8621_p2), [#allocation6], 512  }
 0x198   : > { %6542 = vsyncadd (%p8622_p3), [#allocation6], 4294966784  ;;  %p8623_p4 = pmov %p8620_p0 }
 0x199   : > { %p8624_p12 = pmov %p8620_p0 }
 0x19a   : > { %6544 = dma.done.wait (%p8623_p4), [#allocation9], 64  }
 0x19b   : > { %6546 = vsyncadd (%p8624_p12), [#allocation9], 4294967232  ;;  %p8625_p7 = pmov %p8620_p0 }
 0x19c   : > { %p8626_p8 = pmov %p8620_p0 }
 0x19d   : > { %6548 = dma.done.wait (%p8625_p7), [#allocation12], 1056  }
 0x19e   : > { %6550 = vsyncadd (%p8626_p8), [#allocation12], 4294966240  ;;  %p8627_p11 = pmov %p8620_p0 }
 0x19f   : > { %p8628_p13 = pmov %p8620_p0 }
 0x1a0   : > { %6552 = dma.done.wait (%p8627_p11), [#allocation15], 64  }
 0x1a1   : > { %6554 = vsyncadd (%p8628_p13), [#allocation15], 4294967232  ;;  %p8629_p1 = pmov %p8620_p0 }
 0x1a2   : > { %p8630_p6 = pmov %p8620_p0 }
 0x1a3   : > { %6556 = dma.done.wait (%p8629_p1), [#allocation18], 48  }
 0x1a4   : > { %6558 = vsyncadd (%p8630_p6), [#allocation18], 4294967248  ;;  %p8631_p9 = pmov %p8620_p0 }
 0x1a5   : > { %p8632_p5 = pmov %p8620_p0 }
 0x1a6   : > { %6560 = dma.done.wait (%p8631_p9), [#allocation21], 1040  }
 0x1a7   : > { %6562 = vsyncadd (%p8632_p5), [#allocation21], 4294966256  ;;  %p8633_p10 = pmov %p8620_p0 }
 0x1a9   : > { %6564 = dma.done.wait (%p8633_p10), [#allocation24], 32  }
 0x1aa   : > { %6566 = vsyncadd (%p8620_p0), [#allocation24], 4294967264  ;;  %p944_p2 = scmp.lt.s32.totalorder %s6768_s7, 1  ;;  %s8634_s11 = sld [smem:[#allocation43_spill]]  ;;  %v6609_v8 = vmov 0.0   ;;  %vm966_vm0 = vcmask 7168  }
 0x1ab   : > { %s6607_s2 = smov 1   ;;  %s6608_s13 = smov 127   ;;  %1065 = vmatprep.mubr.f32.mxu0 %v6609_v8  ;;  %vm4750_vm1 = vmneg %vm966_vm0  ;;  %vm983_vm3 = vcmask 1039360   ;;  %vm994_vm5 = vcmask 392192   ;;  %vm1454_vm6 = vcmask 261120   ;;  %vm1851_vm7 = vcmask 523264  }
 0x1ac   : > { %s945_s4 = scalar_select %p944_p2, %s6768_s7, 1  ;;  %vm5227_vm2 = vmpackc.low %vm4750_vm1, %vm4750_vm1  ;;  %vm2232_vm9 = vcmask 130048   ;;  %vm6612_vm10 = vmmov 0  }
 0x1ad   : > { %s8635_s17 = sld [smem:[#allocation45_spill]]  ;;  %vm5234_vm4 = vmpackc.low %vm983_vm3, %vm983_vm3  ;;  %s8637_s3 = sld [smem:[#allocation49_spill]] }
 0x1ae   : > { %s4938_s9 = sshll.u32 %s945_s4, 5  ;;  %s8638_s29 = sld [smem:[#allocation53_spill]]  ;;  %vm7492_vm8 = vmpackc.low %vm1851_vm7, %vm1851_vm7 }
 0x1af   : > { %s8640_s4 = sld [smem:[#allocation48_spill]]  ;;  %s8641_s15 = sld [smem:[#allocation54_spill]] }
 0x1b0   : > { %s948_s1 = scalar_lea.vmem %s8634_s11, %s4938_s9  ;;  %s8636_s11 = sld [smem:[#allocation44_spill]] }
 0x1b1   : > { %v950_v0 = vld [vmem:[%s948_s1] sm:$0xff]  ;;  %v951_v1 = vld [vmem:[%s948_s1 + $0x8] sm:$0xff]  ;;  %v952_v2 = vld [vmem:[%s948_s1 + $0x10] sm:$0xff]  ;;  %s8642_s27 = sld [smem:[#allocation51_spill]]  ;;  %s8572_s5 = smov 64  }
 0x1b2   : > { %v5653_v3 = vpack.i.bf16 %v951_v1, %v950_v0  ;;  %v953_v4 = vld [vmem:[%s948_s1 + $0x18] sm:$0xff]  ;;  %v7131_v5 = vpack.c.bf16 %v952_v2, %v950_v0  ;;  %s8645_s12 = sld [smem:[#allocation57_spill]]  ;;  %s8646_s30 = sld [smem:[#allocation59_spill]] }
 0x1b3   : > { %v7133_v6 = vpack.c.bf16 %v953_v4, %v951_v1  ;;  %v5658_v7 = vpack.i.bf16 %v953_v4, %v952_v2  ;;  %v5683_v9 = vld [vmem:[%s8635_s17 + $0x4] ss:$16 sps:$4 sm:$0xff]   ;;  %v5685_v10 = vld [vmem:[%s8635_s17] ss:$16 sps:$4 sm:$0xff]   ;;  %v5686_v60 = vld [vmem:[%s8635_s17 + $0xc] ss:$16 sps:$4 sm:$0xff]  }
 0x1b4   : > { %5654 = vrot.lane.b32.xlu0 %v5653_v3, %s6607_s2  ;;  %5664 = vrot.lane.b32.xlu1 %v5653_v3, %s6608_s13  ;;  %v5689_v11 = vld [vmem:[%s8635_s17 + $0x24] ss:$16 sps:$4 sm:$0xff]   ;;  %v5691_v12 = vld [vmem:[%s8635_s17 + $0x20] ss:$16 sps:$4 sm:$0xff]   ;;  %s8639_s1 = smov %s8638_s29  ;;  %s8652_s19 = sld [smem:[#allocation41_spill]] }
 0x1b5   : > { %5239 = vmatprep.subr.bf16.mxu1 %v5683_v9  ;;  %v5695_v13 = vld [vmem:[%s8635_s17 + $0x44] ss:$16 sps:$4 sm:$0xff]   ;;  %v5697_v14 = vld [vmem:[%s8635_s17 + $0x40] ss:$16 sps:$4 sm:$0xff]   ;;  %v5688_v63 = vld [vmem:[%s8635_s17 + $0x8] ss:$16 sps:$4 sm:$0xff]  }
 0x1b6   : > { %5241 = vmatpush1.bf16.msra.mxu1 %v5685_v10  ;;  %v5701_v15 = vld [vmem:[%s8635_s17 + $0x64] ss:$16 sps:$4 sm:$0xff]   ;;  %v5703_v16 = vld [vmem:[%s8635_s17 + $0x60] ss:$16 sps:$4 sm:$0xff]   ;;  %v5692_v0 = vld [vmem:[%s8635_s17 + $0x2c] ss:$16 sps:$4 sm:$0xff]  }
 0x1b7   : > { %5243 = vmatprep.subr.bf16.mxu1 %v5689_v11  ;;  %v5707_v17 = vld [vmem:[%s8635_s17 + $0x84] ss:$16 sps:$4 sm:$0xff]   ;;  %v5709_v18 = vld [vmem:[%s8635_s17 + $0x80] ss:$16 sps:$4 sm:$0xff]   ;;  %v993_v1 = vld [vmem:[%s8636_s11 + $0x8] sm:$0xff]  ;;  %s4939_s25 = sshll.u32 %s6768_s7, 9 }
 0x1b8   : > { %5659 = vrot.lane.b32.xlu0 %v5658_v7, %s6607_s2  ;;  %5669 = vrot.lane.b32.xlu1 %v5658_v7, %s6608_s13  ;;  %v5713_v19 = vld [vmem:[%s8635_s17 + $0xa4] ss:$16 sps:$4 sm:$0xff]   ;;  %v5715_v20 = vld [vmem:[%s8635_s17 + $0xa0] ss:$16 sps:$4 sm:$0xff]   ;;  %s8651_s2 = sld [smem:[#allocation36_spill]] }
 0x1b9   : > { %v5719_v21 = vld [vmem:[%s8635_s17 + $0xc4] ss:$16 sps:$4 sm:$0xff]   ;;  %v5721_v22 = vld [vmem:[%s8635_s17 + $0xc0] ss:$16 sps:$4 sm:$0xff]   ;;  %v5694_v2 = vld [vmem:[%s8635_s17 + $0x28] ss:$16 sps:$4 sm:$0xff]  }
 0x1ba   : > { %5245 = vmatpush1.bf16.msra.mxu1 %v5691_v12  ;;  %v5725_v23 = vld [vmem:[%s8635_s17 + $0xe4] ss:$16 sps:$4 sm:$0xff]   ;;  %v5727_v24 = vld [vmem:[%s8635_s17 + $0xe0] ss:$16 sps:$4 sm:$0xff]   ;;  %v5698_v3 = vld [vmem:[%s8635_s17 + $0x4c] ss:$16 sps:$4 sm:$0xff]  }
 0x1bb   : > { %5247 = vmatprep.subr.bf16.mxu1 %v5695_v13  ;;  %v5731_v25 = vld [vmem:[%s8635_s17 + $0x104] ss:$16 sps:$4 sm:$0xff]   ;;  %v5733_v26 = vld [vmem:[%s8635_s17 + $0x100] ss:$16 sps:$4 sm:$0xff]   ;;  %v5700_v4 = vld [vmem:[%s8635_s17 + $0x48] ss:$16 sps:$4 sm:$0xff]  }
 0x1bc   : > { %v5737_v27 = vld [vmem:[%s8635_s17 + $0x124] ss:$16 sps:$4 sm:$0xff]   ;;  %v5739_v28 = vld [vmem:[%s8635_s17 + $0x120] ss:$16 sps:$4 sm:$0xff]   ;;  %v5704_v7 = vld [vmem:[%s8635_s17 + $0x6c] ss:$16 sps:$4 sm:$0xff]  }
 0x1bd   : > { %v5743_v29 = vld [vmem:[%s8635_s17 + $0x144] ss:$16 sps:$4 sm:$0xff]   ;;  %v5745_v30 = vld [vmem:[%s8635_s17 + $0x140] ss:$16 sps:$4 sm:$0xff]   ;;  %v5706_v9 = vld [vmem:[%s8635_s17 + $0x68] ss:$16 sps:$4 sm:$0xff]  }
 0x1be   : > { %5249 = vmatpush1.bf16.msra.mxu1 %v5697_v14  ;;  %v5749_v31 = vld [vmem:[%s8635_s17 + $0x164] ss:$16 sps:$4 sm:$0xff]   ;;  %v5751_v32 = vld [vmem:[%s8635_s17 + $0x160] ss:$16 sps:$4 sm:$0xff]   ;;  %v5710_v10 = vld [vmem:[%s8635_s17 + $0x8c] ss:$16 sps:$4 sm:$0xff]  }
 0x1bf   : > { %5251 = vmatprep.subr.bf16.mxu1 %v5701_v15  ;;  %v5755_v33 = vld [vmem:[%s8635_s17 + $0x184] ss:$16 sps:$4 sm:$0xff]   ;;  %v5757_v34 = vld [vmem:[%s8635_s17 + $0x180] ss:$16 sps:$4 sm:$0xff]   ;;  %v5712_v11 = vld [vmem:[%s8635_s17 + $0x88] ss:$16 sps:$4 sm:$0xff]  }
 0x1c0   : > { %v5761_v35 = vld [vmem:[%s8635_s17 + $0x1a4] ss:$16 sps:$4 sm:$0xff]   ;;  %v5763_v36 = vld [vmem:[%s8635_s17 + $0x1a0] ss:$16 sps:$4 sm:$0xff]   ;;  %v5716_v12 = vld [vmem:[%s8635_s17 + $0xac] ss:$16 sps:$4 sm:$0xff]  }
 0x1c1   : > { %v5767_v37 = vld [vmem:[%s8635_s17 + $0x1c4] ss:$16 sps:$4 sm:$0xff]   ;;  %v5769_v38 = vld [vmem:[%s8635_s17 + $0x1c0] ss:$16 sps:$4 sm:$0xff]   ;;  %v5718_v13 = vld [vmem:[%s8635_s17 + $0xa8] ss:$16 sps:$4 sm:$0xff]  }
 0x1c2   : > { %5253 = vmatpush1.bf16.msra.mxu1 %v5703_v16  ;;  %v5773_v39 = vld [vmem:[%s8635_s17 + $0x1e4] ss:$16 sps:$4 sm:$0xff]   ;;  %v5775_v40 = vld [vmem:[%s8635_s17 + $0x1e0] ss:$16 sps:$4 sm:$0xff]   ;;  %v5722_v14 = vld [vmem:[%s8635_s17 + $0xcc] ss:$16 sps:$4 sm:$0xff]  }
 0x1c3   : > { %5255 = vmatprep.subr.bf16.mxu1 %v5707_v17  ;;  %v992_v62 = vld [vmem:[%s8636_s11] sm:$0xff]  ;;  %v5724_v15 = vld [vmem:[%s8635_s17 + $0xc8] ss:$16 sps:$4 sm:$0xff]   ;;  %v5728_v16 = vld [vmem:[%s8635_s17 + $0xec] ss:$16 sps:$4 sm:$0xff]   ;;  %s941_s13 = sand.u32 1, %s8651_s2  }
 0x1c4   : > { %v5730_v17 = vld [vmem:[%s8635_s17 + $0xe8] ss:$16 sps:$4 sm:$0xff]   ;;  %s4747_s6 = sshll.u32 %s941_s13, 5  ;;  %s8474_s7 = scalar_lea.sflag [#allocation4], %s941_s13 }
 0x1c5   : > { %p8655_p4 = scmp.ne.s32.totalorder %s8652_s19, 0 }
 0x1c6   : > { %5257 = vmatpush1.bf16.msra.mxu1 %v5709_v18  ;;  %v5734_v18 = vld [vmem:[%s8635_s17 + $0x10c] ss:$16 sps:$4 sm:$0xff]  }
 0x1c7   : > { %5259 = vmatprep.subr.bf16.mxu1 %v5713_v19  ;;  %v5736_v19 = vld [vmem:[%s8635_s17 + $0x108] ss:$16 sps:$4 sm:$0xff]  }
 0x1ca   : > { %5261 = vmatpush1.bf16.msra.mxu1 %v5715_v20  ;;  %v5740_v20 = vld [vmem:[%s8635_s17 + $0x12c] ss:$16 sps:$4 sm:$0xff]  }
 0x1cb   : > { %5263 = vmatprep.subr.bf16.mxu1 %v5719_v21  ;;  %v5742_v21 = vld [vmem:[%s8635_s17 + $0x128] ss:$16 sps:$4 sm:$0xff]  }
 0x1ce   : > { %5265 = vmatpush1.bf16.msra.mxu1 %v5721_v22  ;;  %v5746_v22 = vld [vmem:[%s8635_s17 + $0x14c] ss:$16 sps:$4 sm:$0xff]  }
 0x1cf   : > { %5267 = vmatprep.subr.bf16.mxu1 %v5725_v23  ;;  %v5748_v23 = vld [vmem:[%s8635_s17 + $0x148] ss:$16 sps:$4 sm:$0xff]  }
 0x1d2   : > { %5269 = vmatpush1.bf16.msra.mxu1 %v5727_v24  ;;  %v5752_v24 = vld [vmem:[%s8635_s17 + $0x16c] ss:$16 sps:$4 sm:$0xff]  }
 0x1d3   : > { %5271 = vmatprep.subr.bf16.mxu1 %v5731_v25  ;;  %v5754_v25 = vld [vmem:[%s8635_s17 + $0x168] ss:$16 sps:$4 sm:$0xff]  }
 0x1d6   : > { %5273 = vmatpush1.bf16.msra.mxu1 %v5733_v26  ;;  %v5758_v26 = vld [vmem:[%s8635_s17 + $0x18c] ss:$16 sps:$4 sm:$0xff]  }
 0x1d7   : > { %5275 = vmatprep.subr.bf16.mxu1 %v5737_v27  ;;  %v5760_v27 = vld [vmem:[%s8635_s17 + $0x188] ss:$16 sps:$4 sm:$0xff]  }
 0x1da   : > { %5277 = vmatpush1.bf16.msra.mxu1 %v5739_v28  ;;  %v5764_v28 = vld [vmem:[%s8635_s17 + $0x1ac] ss:$16 sps:$4 sm:$0xff]  }
 0x1db   : > { %5279 = vmatprep.subr.bf16.mxu1 %v5743_v29  ;;  %v5766_v29 = vld [vmem:[%s8635_s17 + $0x1a8] ss:$16 sps:$4 sm:$0xff]  }
 0x1de   : > { %5281 = vmatpush1.bf16.msra.mxu1 %v5745_v30  ;;  %v5770_v30 = vld [vmem:[%s8635_s17 + $0x1cc] ss:$16 sps:$4 sm:$0xff]  }
 0x1df   : > { %5283 = vmatprep.subr.bf16.mxu1 %v5749_v31  ;;  %v5772_v31 = vld [vmem:[%s8635_s17 + $0x1c8] ss:$16 sps:$4 sm:$0xff]  }
 0x1e2   : > { %5285 = vmatpush1.bf16.msra.mxu1 %v5751_v32  ;;  %v5776_v32 = vld [vmem:[%s8635_s17 + $0x1ec] ss:$16 sps:$4 sm:$0xff]  }
 0x1e3   : > { %5287 = vmatprep.subr.bf16.mxu1 %v5755_v33  ;;  %v5778_v33 = vld [vmem:[%s8635_s17 + $0x1e8] ss:$16 sps:$4 sm:$0xff]  }
 0x1e6   : > { %5289 = vmatpush1.bf16.msra.mxu1 %v5757_v34  ;;  %v5779_v34 = vld [vmem:[%s8637_s3 + $0x40] sm:$0xff]  }
 0x1e7   : > { %5291 = vmatprep.subr.bf16.mxu1 %v5761_v35 }
 0x1ea   : > { %5293 = vmatpush1.bf16.msra.mxu1 %v5763_v36  ;;  %v5780_v36 = vld [vmem:[%s8637_s3] sm:$0xff]  }
 0x1eb   : > { %5295 = vmatprep.subr.bf16.mxu1 %v5767_v37 }
 0x1ee   : > { %5297 = vmatpush1.bf16.msra.mxu1 %v5769_v38  ;;  %v5781_v38 = vld [vmem:[%s8637_s3 + $0x48] sm:$0xff]  }
 0x1ef   : > { %5299 = vmatprep.subr.bf16.mxu1 %v5773_v39 }
 0x1f2   : > { %5301 = vmatpush1.bf16.msra.mxu1 %v5775_v40  ;;  %v5782_v40 = vld [vmem:[%s8637_s3 + $0x8] sm:$0xff]  }
 0x1f3   : > { %4940 = vmatprep.subr.bf16.mxu1 %v5779_v34 }
 0x226   : > { %v5655_v41 = vpop.permute.xlu0 %5654  ;;  %v5665_v42 = vpop.permute.xlu1 %5664 }
 0x227   : > { %v5657_v43 = vunpack.i.h.bf16 %v5655_v41  ;;  %v5656_v44 = vunpack.i.l.bf16 %v5655_v41  ;;  %v5667_v53 = vunpack.i.h.bf16 %v5665_v42  ;;  %v5666_v54 = vunpack.i.l.bf16 %v5665_v42  ;;  %v5783_v42 = vld [vmem:[%s8637_s3 + $0x50] sm:$0xff]  }
 0x229   : > { %v967_v49 = vsel %vm966_vm0, %v5656_v44, %v5657_v43  ;;  %v984_v58 = vsel %vm983_vm3, %v5666_v54, %v5667_v53  ;;  %v5784_v43 = vld [vmem:[%s8637_s3 + $0x10] sm:$0xff]  }
 0x22a   : > { %v5660_v45 = vpop.permute.xlu0 %5659  ;;  %v5670_v48 = vpop.permute.xlu1 %5669 }
 0x22b   : > { %v5662_v46 = vunpack.i.h.bf16 %v5660_v45  ;;  %v5661_v47 = vunpack.i.l.bf16 %v5660_v45  ;;  %v5672_v55 = vunpack.i.h.bf16 %v5670_v48  ;;  %v5671_v56 = vunpack.i.l.bf16 %v5670_v48  ;;  %v5786_v45 = vld [vmem:[%s8637_s3 + $0x18] sm:$0xff]   ;;  %v5790_v48 = vld [vmem:[%s8637_s3 + $0x28] sm:$0xff]  }
 0x22d   : > { %v968_v50 = vsel %vm966_vm0, %v5661_v47, %v5662_v46  ;;  %v5226_v52 = vpack.c.bf16 %v5661_v47, %v5656_v44  ;;  %v5233_v57 = vpack.c.bf16 %v5672_v55, %v5667_v53  ;;  %v985_v59 = vsel %vm983_vm3, %v5671_v56, %v5672_v55  ;;  %v5785_v44 = vld [vmem:[%s8637_s3 + $0x58] sm:$0xff]   ;;  %v5787_v46 = vld [vmem:[%s8637_s3 + $0x60] sm:$0xff]   ;;  %v5789_v47 = vld [vmem:[%s8637_s3 + $0x68] sm:$0xff]  }
 0x22e   : > { %v5224_v51 = vpack.c.bf16 %v968_v50, %v967_v49  ;;  %v5236_v61 = vpack.c.bf16 %v985_v59, %v984_v58  ;;  %v5791_v49 = vld [vmem:[%s8637_s3 + $0x70] sm:$0xff]   ;;  %v1424_v55 = vld [vmem:[#allocation2] sm:$0xff]  ;;  %v1425_v59 = vld [vmem:[#allocation2 + $0x8] sm:$0xff] }
 0x22f   : > { %v5792_v50 = vld [vmem:[%s8637_s3 + $0x30] sm:$0xff]  }
 0x230   : > { %5225 = vmatprep.subr.bf16.mxu0 %v5224_v51  ;;  %v5793_v51 = vld [vmem:[%s8637_s3 + $0x78] sm:$0xff]   ;;  %v1426_v56 = vld [vmem:[#allocation2 + $0x10] sm:$0xff] }
 0x231   : > { %5228 = vmatpush1.bf16.msk.msra.mxu0 %vm5227_vm2, %v5226_v52  ;;  %v5794_v52 = vld [vmem:[%s8637_s3 + $0x38] sm:$0xff]  }
 0x232   : > { %5230 = vmatprep.subr.bf16.mxu0 %v7133_v6 }
 0x235   : > { %5232 = vmatpush1.bf16.msra.mxu0 %v7131_v5 }
 0x236   : > { %5235 = vmatprep.subr.msk.bf16.mxu0 %vm5234_vm4, %v5233_v57 }
 0x239   : > { %5237 = vmatpush1.bf16.msra.mxu0 %v5236_v61  ;;  %v1430_v61 = vld [vmem:[#allocation2 + $0x30] sm:$0xff] }
 0x23a   : > { %5303 = vmatprep.subr.bf16.mxu0 %v5686_v60  ;;  %v1428_v60 = vld [vmem:[#allocation2 + $0x20] sm:$0xff] }
 0x23c   : > { %4756 = vmatmul.mubr.msk.f32.vlgmr.msra.gmra.mrb[0].mxu0 %vm994_vm5, %v992_v62  ;;  %v1427_v62 = vld [vmem:[#allocation2 + $0x18] sm:$0xff] }
 0x23d   : > { %1071 = vmatprep.mubr.f32.mxu0 %v6609_v8  ;;  %5305 = vmatpush1.bf16.msra.mxu0 %v5688_v63  ;;  %v1429_v63 = vld [vmem:[#allocation2 + $0x28] sm:$0xff] }
 0x23e   : > { %5307 = vmatprep.subr.bf16.mxu0 %v5692_v0  ;;  %v1431_v0 = vld [vmem:[#allocation2 + $0x38] sm:$0xff] }
 0x240   : > { %4757 = vmatmul.mubr.msk.f32.gmra.mrb[2].mxu0 %vm994_vm5, %v993_v1 }
 0x241   : > { %5309 = vmatpush1.bf16.msra.mxu0 %v5694_v2 }
 0x242   : > { %5311 = vmatprep.subr.bf16.mxu0 %v5698_v3 }
 0x245   : > { %5313 = vmatpush1.bf16.msra.mxu0 %v5700_v4 }
 0x246   : > { %5315 = vmatprep.subr.bf16.mxu0 %v5704_v7 }
 0x249   : > { %5317 = vmatpush1.bf16.msra.mxu0 %v5706_v9 }
 0x24a   : > { %5319 = vmatprep.subr.bf16.mxu0 %v5710_v10 }
 0x24d   : > { %5321 = vmatpush1.bf16.msra.mxu0 %v5712_v11 }
 0x24e   : > { %5323 = vmatprep.subr.bf16.mxu0 %v5716_v12 }
 0x251   : > { %5325 = vmatpush1.bf16.msra.mxu0 %v5718_v13 }
 0x252   : > { %5327 = vmatprep.subr.bf16.mxu0 %v5722_v14 }
 0x255   : > { %5329 = vmatpush1.bf16.msra.mxu0 %v5724_v15 }
 0x256   : > { %5331 = vmatprep.subr.bf16.mxu0 %v5728_v16 }
 0x259   : > { %5333 = vmatpush1.bf16.msra.mxu0 %v5730_v17 }
 0x25a   : > { %5335 = vmatprep.subr.bf16.mxu0 %v5734_v18 }
 0x25d   : > { %5337 = vmatpush1.bf16.msra.mxu0 %v5736_v19  ;;  %v1440_v19 = vld [vmem:[#allocation5] sm:$0xff] }
 0x25e   : > { %5339 = vmatprep.subr.bf16.mxu0 %v5740_v20  ;;  %v1441_v20 = vld [vmem:[#allocation5 + $0x8] sm:$0xff] }
 0x261   : > { %5341 = vmatpush1.bf16.msra.mxu0 %v5742_v21 }
 0x262   : > { %5343 = vmatprep.subr.bf16.mxu0 %v5746_v22  ;;  %v1576_v22 = vld [vmem:[#allocation7] sm:$0xff] }
 0x265   : > { %5345 = vmatpush1.bf16.msra.mxu0 %v5748_v23 }
 0x266   : > { %5347 = vmatprep.subr.bf16.mxu0 %v5752_v24 }
 0x269   : > { %5349 = vmatpush1.bf16.msra.mxu0 %v5754_v25 }
 0x26a   : > { %5351 = vmatprep.subr.bf16.mxu0 %v5758_v26  ;;  %v1577_v26 = vld [vmem:[#allocation7 + $0x8] sm:$0xff] }
 0x26d   : > { %5353 = vmatpush1.bf16.msra.mxu0 %v5760_v27 }
 0x26e   : > { %5355 = vmatprep.subr.bf16.mxu0 %v5764_v28 }
 0x271   : > { %5357 = vmatpush1.bf16.msra.mxu0 %v5766_v29 }
 0x272   : > { %5359 = vmatprep.subr.bf16.mxu0 %v5770_v30 }
 0x275   : > { %5361 = vmatpush1.bf16.msra.mxu0 %v5772_v31 }
 0x276   : > { %5363 = vmatprep.subr.bf16.mxu0 %v5776_v32 }
 0x279   : > { %5365 = vmatpush1.bf16.msra.mxu0 %v5778_v33 }
 0x30f   : > { %v7340_v35 = vpop.f32.mrb[0].mxu0 }
 0x310   : > { %v7345_v37 = vpop.f32.mrb[1].mxu0 }
 0x311   : > { %1334 = vmatprep.mubr.f32.mxu1 %v7345_v37  ;;  %1411 = vmatprep.mubr.f32.mxu0 %v7345_v37 }
 0x312   : > { %1335 = vmatmul.mubr.f32.vlgmr.msra.gmra.mrb[0].mxu1 %v7340_v35  ;;  %1412 = vmatmul.mubr.f32.vlgmr.msra.gmra.mrb[4].mxu0 %v7340_v35 }
 0x313   : > { %4941 = vmatpush3.bf16.msra.mxu1 %v5780_v36  ;;  %v7354_v39 = vpop.f32.mrb[2].mxu0 }
 0x314   : > { %v7359_v41 = vpop.f32.mrb[3].mxu0  ;;  %4942 = vmatprep.subr.bf16.mxu1 %v5781_v38 }
 0x315   : > { %1340 = vmatprep.mubr.f32.mxu1 %v7359_v41  ;;  %1417 = vmatprep.mubr.f32.mxu0 %v7359_v41 }
 0x316   : > { %1341 = vmatmul.mubr.f32.gmra.mrb[2].mxu1 %v7354_v39  ;;  %1418 = vmatmul.mubr.f32.gmra.mrb[6].mxu0 %v7354_v39 }
 0x317   : > { %4943 = vmatpush3.bf16.msra.mxu1 %v5782_v40  ;;  %1706 = vmatprep.mubr.bf16.mxu1 %v7133_v6  ;;  %v5788_v6 = vld [vmem:[%s8637_s3 + $0x20] sm:$0xff]  }
 0x318   : > { %4944 = vmatprep.subr.bf16.mxu1 %v5783_v42  ;;  %1525 = vmatprep.mubr.f32.mxu0 %v6609_v8 }
 0x31b   : > { %4945 = vmatpush3.bf16.msra.mxu1 %v5784_v43 }
 0x31c   : > { %4946 = vmatprep.subr.bf16.mxu1 %v5785_v44 }
 0x31f   : > { %4947 = vmatpush3.bf16.msra.mxu1 %v5786_v45 }
 0x320   : > { %4948 = vmatprep.subr.bf16.mxu1 %v5787_v46 }
 0x323   : > { %4949 = vmatpush3.bf16.msra.mxu1 %v5788_v6  ;;  %v5797_v6 = vld [vmem:[%s8638_s29 + $0x4] ss:$8 sps:$4 sm:$0xff]   ;;  %s8650_s29 = smov 64  }
 0x324   : > { %4950 = vmatprep.subr.bf16.mxu1 %v5789_v47  ;;  %v5795_v47 = vld [vmem:[%s8639_s1] ss:$8 sps:$4 sm:$0xff]  }
 0x327   : > { %4951 = vmatpush3.bf16.msra.mxu1 %v5790_v48  ;;  %v1444_v48 = vlaneseq }
 0x328   : > { %4952 = vmatprep.subr.bf16.mxu1 %v5791_v49  ;;  %v5800_v49 = vld [vmem:[%s8639_s1 + $0x14] ss:$8 sps:$4 sm:$0xff]  }
 0x32b   : > { %4953 = vmatpush3.bf16.msra.mxu1 %v5792_v50  ;;  %v5798_v50 = vld [vmem:[%s8639_s1 + $0x10] ss:$8 sps:$4 sm:$0xff]  }
 0x32c   : > { %4954 = vmatprep.subr.bf16.mxu1 %v5793_v51  ;;  %v7429_v51 = vshrl.u32 %v1444_v48, 7 }
 0x32f   : > { %4955 = vmatpush3.bf16.msra.mxu1 %v5794_v52  ;;  %v5803_v52 = vld [vmem:[%s8639_s1 + $0x24] ss:$8 sps:$4 sm:$0xff]  }
 0x332   : > { %1707 = vmatmul.mubr.bf16.vlgmr.msra.gmra.mrb[4].mxu1 %v7131_v5 }
 0x3e5   : > { %v1336_v53 = vpop.f32.mrb[0].mxu1  ;;  %v1413_v54 = vpop.f32.mrb[4].mxu0 }
 0x3e6   : > { %v1338_v57 = vpop.f32.mrb[1].mxu1  ;;  %v1415_v58 = vpop.f32.mrb[5].mxu0  ;;  %v1432_v3 = vmul.f32 %v1424_v55, %v1336_v53  ;;  %v1434_v4 = vmul.f32 %v1426_v56, %v1413_v54  ;;  %v5801_v53 = vld [vmem:[%s8639_s1 + $0x20] ss:$8 sps:$4 sm:$0xff]   ;;  %v7438_v54 = vsub.s32 0, %v7429_v51  ;;  %v7444_v56 = vsub.s32 1, %v7429_v51 }
 0x3e7   : > { %v1433_v11 = vmul.f32 %v1425_v59, %v1338_v57  ;;  %v1435_v12 = vmul.f32 %v1427_v62, %v1415_v58  ;;  %v1442_v55 = vld [vmem:[%s8640_s4] sm:$0x3]  ;;  %v5806_v57 = vld [vmem:[%s8639_s1 + $0x34] ss:$8 sps:$4 sm:$0xff]   ;;  %v5804_v58 = vld [vmem:[%s8639_s1 + $0x30] ss:$8 sps:$4 sm:$0xff]   ;;  %s8647_s4 = smov %s8646_s30 }
 0x3e8   : > { %v1447_v59 = vrot.slane %v1442_v55, %v7438_v54 }
 0x3e9   : > { %v1342_v1 = vpop.f32.mrb[2].mxu1  ;;  %v1419_v2 = vpop.f32.mrb[6].mxu0 }
 0x3ea   : > { %v1436_v7 = vmul.f32 %v1428_v60, %v1342_v1  ;;  %v1438_v9 = vmul.f32 %v1430_v61, %v1419_v2  ;;  %v1344_v10 = vpop.f32.mrb[3].mxu1  ;;  %v1421_v5 = vpop.f32.mrb[7].mxu0  ;;  %v6610_v60 = vmov 0   ;;  %v1451_v61 = vrot.slane %v1442_v55, %v7444_v56  ;;  %v8029_v55 = vld [vmem:[%s8642_s27 + $0x18] sm:$0xff] }
 0x3eb   : > { %v1437_v13 = vmul.f32 %v1429_v63, %v1344_v10  ;;  %v1439_v14 = vmul.f32 %v1431_v0, %v1421_v5 }
 0x3ec   : > { %v5368_v15 = vpack.c.bf16 %v1436_v7, %v1432_v3  ;;  %v5372_v16 = vpack.c.bf16 %v1438_v9, %v1434_v4 }
 0x3ed   : > { %v5366_v17 = vpack.c.bf16 %v1437_v13, %v1433_v11  ;;  %v5370_v18 = vpack.c.bf16 %v1439_v14, %v1435_v12 }
 0x3ef   : > { %5367 = vmatprep.subr.bf16.mxu0 %v5366_v17 }
 0x3f0   : > { %5369 = vmatpush1.bf16.msra.mxu0 %v5368_v15 }
 0x3f1   : > { %5371 = vmatprep.subr.bf16.mxu0 %v5370_v18 }
 0x3f4   : > { %5373 = vmatpush1.bf16.msra.mxu0 %v5372_v16 }
 0x3f5   : > { %1954 = vmatprep.subr.bf16.mxu0 %v5797_v6 }
 0x3f7   : > { %4758 = vmatmul.mubr.msk.f32.vlgmr.msra.gmra.mrb[8].mxu0 %vm1454_vm6, %v1440_v19 }
 0x3f8   : > { %1531 = vmatprep.mubr.f32.mxu0 %v6609_v8  ;;  %1955 = vmatpush1.bf16.msra.mxu0 %v5795_v47 }
 0x3f9   : > { %1956 = vmatprep.subr.bf16.mxu0 %v5800_v49 }
 0x3fb   : > { %4759 = vmatmul.mubr.msk.f32.gmra.mrb[10].mxu0 %vm1454_vm6, %v1441_v20  ;;  %v1732_v20 = vld [vmem:[#allocation10] sm:$0x3] }
 0x3fc   : > { %1957 = vmatpush1.bf16.msra.mxu0 %v5798_v50  ;;  %1986 = vmatprep.mubr.bf16.mxu0 %v6610_v60 }
 0x3fd   : > { %1958 = vmatprep.subr.bf16.mxu0 %v5803_v52 }
 0x400   : > { %1959 = vmatpush1.bf16.msra.mxu0 %v5801_v53 }
 0x401   : > { %1960 = vmatprep.subr.bf16.mxu0 %v5806_v57 }
 0x404   : > { %1961 = vmatpush1.bf16.msra.mxu0 %v5804_v58  ;;  %v7504_v58 = vld [vmem:[%s8642_s27 + $0x8] sm:$0xff] }
 0x405   : > { %v4956_v21 = vpop.f32.mrb[4].mxu1 }
 0x406   : > { %v4957_v23 = vpop.f32.mrb[5].mxu1 }
 0x407   : > { %v4958_v24 = vadd.f32 %v4957_v23, %v4956_v21  ;;  %v4959_v25 = vpop.f32.mrb[6].mxu1 }
 0x408   : > { %v4960_v27 = vpop.f32.mrb[7].mxu1 }
 0x409   : > { %v7405_v28 = vadd.f32 %v4958_v24, %v1576_v22  ;;  %v4961_v29 = vadd.f32 %v4960_v27, %v4959_v25  ;;  %v1749_v27 = vld [vmem:[%s8641_s15] sm:$0xf] }
 0x40b   : > { %v7407_v30 = vadd.f32 %v4961_v29, %v1577_v26  ;;  %v1852_v31 = vsel %vm1851_vm7, %v7405_v28, 0.0  ;;  %v1899_v29 = vsub.s32 2, %v7429_v51 }
 0x40c   : > { %1853 = vadd.xlane.f32.xlu0 %v1852_v31  ;;  %v1896_v31 = vrot.slane %v1749_v27, %v7438_v54 }
 0x40d   : > { %v1855_v32 = vsel %vm1851_vm7, %v7407_v30, 0.0 }
 0x40e   : > { %1856 = vadd.xlane.f32.xlu1 %v1855_v32  ;;  %v1900_v32 = vrot.slane %v1749_v27, %v1899_v29 }
 0x499   : > { %v1854_v33 = vpop.xlane.xlu0 %1853 }
 0x49a   : > { %v1859_v34 = vmul.f32 0.015625, %v1854_v33  ;;  %v1906_v33 = vrot.slane %v1896_v31, %v7438_v54 }
 0x49b   : > { %v1857_v36 = vpop.xlane.xlu1 %1856 }
 0x49c   : > { %v1861_v38 = vsub.f32 %v7405_v28, %v1859_v34  ;;  %v1860_v40 = vmul.f32 0.015625, %v1857_v36  ;;  %v1910_v36 = vrot.slane %v1900_v32, %v7438_v54 }
 0x49e   : > { %v1862_v42 = vsub.f32 %v7407_v30, %v1860_v40  ;;  %v1863_v43 = vmul.f32 %v1861_v38, %v1861_v38 }
 0x4a0   : > { %v1865_v44 = vsel %vm1851_vm7, %v1863_v43, 0.0  ;;  %v1864_v45 = vmul.f32 %v1862_v42, %v1862_v42 }
 0x4a1   : > { %1866 = vadd.xlane.f32.xlu0 %v1865_v44 }
 0x4a2   : > { %v1868_v46 = vsel %vm1851_vm7, %v1864_v45, 0.0 }
 0x4a5   : > { %1869 = vadd.xlane.f32.xlu0 %v1868_v46 }
 0x4ca   : > { %v1527_v62 = vpop.f32.mrb[8].mxu0 }
 0x4cb   : > { %v1528_v63 = vadd.f32 %v1527_v62, %v1447_v59  ;;  %v1529_v0 = vpop.f32.mrb[9].mxu0 }
 0x4cc   : > { %v1530_v1 = vadd.f32 %v1529_v0, %v1451_v61  ;;  %v7523_v0 = vld [vmem:[%s8642_s27 + $0x20] sm:$0xff] }
 0x4cd   : > { %v7456_v2 = vadd.f32 %v1528_v63, %v7340_v35  ;;  %v7517_v63 = vld [vmem:[%s8642_s27 + $0x18] sm:$0xff] }
 0x4ce   : > { %v7459_v3 = vadd.f32 %v1530_v1, %v7345_v37  ;;  %v1533_v4 = vpop.f32.mrb[10].mxu0  ;;  %v1731_v37 = vld [vmem:[#allocation8] sm:$0x3] }
 0x4cf   : > { %v1534_v7 = vadd.f32 %v1533_v4, %v1447_v59  ;;  %v1535_v9 = vpop.f32.mrb[11].mxu0  ;;  %v1882_v18 = vrot.slane %v1731_v37, %v7438_v54  ;;  %v7509_v59 = vld [vmem:[%s8642_s27 + $0x10] sm:$0xff] }
 0x4d0   : > { %v1536_v10 = vadd.f32 %v1535_v9, %v1451_v61  ;;  %v7538_v9 = vld [vmem:[%s8642_s27 + $0x30] sm:$0xff] }
 0x4d1   : > { %v7462_v5 = vadd.f32 %v1534_v7, %v7354_v39  ;;  %v1888_v39 = vrot.slane %v1732_v20, %v7438_v54  ;;  %v7532_v7 = vld [vmem:[%s8642_s27 + $0x28] sm:$0xff]  ;;  %v7568_v37 = vld [vmem:[%s8642_s27 + $0x50] sm:$0xff]  ;;  %v7583_v20 = vld [vmem:[%s8642_s27 + $0x60] sm:$0xff] }
 0x4d2   : > { %v7465_v11 = vadd.f32 %v1536_v10, %v7359_v41 }
 0x52e   : > { %v1867_v12 = vpop.xlane.xlu0 %1866 }
 0x52f   : > { %v1871_v13 = vmul.f32 0.015625, %v1867_v12 }
 0x531   : > { %v1873_v14 = vadd.f32 1e-06, %v1871_v13  ;;  %v7547_v13 = vld [vmem:[%s8642_s27 + $0x38] sm:$0xff] }
 0x532   : > { %v1870_v15 = vpop.xlane.xlu0 %1869 }
 0x533   : > { %5895 = vrsqrt.f32 %v1873_v14  ;;  %v1872_v35 = vmul.f32 0.015625, %v1870_v15  ;;  %v7553_v14 = vld [vmem:[%s8642_s27 + $0x40] sm:$0xff] }
 0x535   : > { %v1874_v16 = vadd.f32 1e-06, %v1872_v35 }
 0x537   : > { %5897 = vrsqrt.f32 %v1874_v16  ;;  %v7562_v16 = vld [vmem:[%s8642_s27 + $0x48] sm:$0xff] }
 0x53d   : > { %v5896_v17 = vpop.eup %5895 }
 0x53e   : > { %v1877_v19 = vmul.f32 %v5896_v17, %v1861_v38  ;;  %v7482_v38 = vld [vmem:[%s8642_s27] sm:$0xff] }
 0x540   : > { %v1883_v22 = vmul.f32 %v1882_v18, %v1877_v19  ;;  %v7577_v19 = vld [vmem:[%s8642_s27 + $0x58] sm:$0xff] }
 0x541   : > { %v5898_v21 = vpop.eup %5897 }
 0x542   : > { %v1878_v41 = vmul.f32 %v5898_v21, %v1862_v42  ;;  %v1889_v24 = vadd.f32 %v1888_v39, %v1883_v22  ;;  %v7592_v22 = vld [vmem:[%s8642_s27 + $0x68] sm:$0xff] }
 0x544   : > { %v1884_v23 = vmul.f32 %v1882_v18, %v1878_v41  ;;  %v7598_v41 = vld [vmem:[%s8642_s27 + $0x70] sm:$0xff] }
 0x546   : > { %v1890_v25 = vadd.f32 %v1888_v39, %v1884_v23 }
 0x548   : > { %v1891_v26 = vpack.c.bf16 %v1890_v25, %v1889_v24  ;;  %v7607_v25 = vld [vmem:[%s8642_s27 + $0x78] sm:$0xff] }
 0x54a   : > { %4784 = vmatmul.mubr.msk.bf16.vlgmr.msra.gmra.mrb[12].mxu0 %vm1851_vm7, %v1891_v26 }
 0x61d   : > { %v1988_v34 = vpop.f32.mrb[12].mxu0 }
 0x61e   : > { %v1989_v40 = vadd.f32 %v1988_v34, %v1906_v33  ;;  %v1990_v42 = vpop.f32.mrb[13].mxu0 }
 0x61f   : > { %v1992_v43 = vpop.f32.mrb[14].mxu0  ;;  %v1991_v6 = vadd.f32 %v1990_v42, %v1910_v36 }
 0x620   : > { %v7484_v44 = vadd.f32 %v1992_v43, %v1906_v33  ;;  %v1994_v45 = vpop.f32.mrb[15].mxu0  ;;  %v1997_v46 = vmul.f32 %v1989_v40, %v7482_v38  ;;  %v1999_v62 = vmul.f32 %v1989_v40, %v7509_v59  ;;  %v2001_v4 = vmul.f32 %v1989_v40, %v7523_v0 }
 0x621   : > { %v1995_v47 = vadd.f32 %v1994_v45, %v1910_v36  ;;  %v2003_v12 = vmul.f32 %v1989_v40, %v7538_v9  ;;  %v2005_v35 = vmul.f32 %v1989_v40, %v7553_v14  ;;  %v2007_v18 = vmul.f32 %v1989_v40, %v7568_v37 }
 0x622   : > { %5092 = vmatprep.mubr.msk.f32.mxu0 %vm1851_vm7, %v1997_v46  ;;  %v5673_v48 = vpack.i.bf16 %v7484_v44, %v1989_v40  ;;  %v1998_v61 = vmul.f32 %v7484_v44, %v7504_v58  ;;  %v2000_v1 = vmul.f32 %v7484_v44, %v7517_v63  ;;  %v2002_v10 = vmul.f32 %v7484_v44, %v7532_v7 }
 0x623   : > { %v5380_v49 = vpack.c.bf16 %v1995_v47, %v1991_v6  ;;  %v2004_v15 = vmul.f32 %v7484_v44, %v7547_v13  ;;  %v2006_v17 = vmul.f32 %v7484_v44, %v7562_v16  ;;  %v2008_v21 = vmul.f32 %v7484_v44, %v7577_v19 }
 0x624   : > { %5674 = vrot.lane.b32.xlu1 %v5673_v48, %s8572_s5  ;;  %v2009_v39 = vmul.f32 %v1989_v40, %v7583_v20  ;;  %v2010_v23 = vmul.f32 %v7484_v44, %v7592_v22  ;;  %v2011_v24 = vmul.f32 %v1989_v40, %v7598_v41  ;;  %v2012_v26 = vmul.f32 %v7484_v44, %v7607_v25  ;;  %s943_s5 = scalar_lea.vmem [#allocation25], %s4747_s6 }
 0x625   : > { %5381 = vmatprep.subr.bf16.mxu1 %v5380_v49  ;;  %s4517_s28 = sshll.u32 %s943_s5, 4  ;;  %s8465_s28 = int_to_ptr.vmem [resolvable:$true] %s4517_s28 }
 0x626   : > { %5383 = vmatpush3.bf16.msra.mxu1 %v5380_v49  ;;  %s6491_s6 = scalar_lea.vmem %s8465_s28, 512 }
 0x627   : > { %p6492_p3 = scmp.ne.s32.totalorder %s8465_s28, %s6491_s6 }
 0x629   : > { %p6493_p12 = pnand %p6492_p3, %p8655_p4 }
 0x62b   : > { %p6494_p7 = pneg %p6493_p12 }
 0x696   : > { %v5675_v50 = vpop.permute.xlu1 %5674 }
 0x697   : > { %v5677_v52 = vunpack.i.h.bf16 %v5675_v50  ;;  %v5676_v53 = vunpack.i.l.bf16 %v5675_v50 }
 0x699   : > { %v5374_v57 = vpack.c.bf16 %v5677_v52, %v5676_v53 }
 0x69b   : > { %5376 = vmatprep.subr.msk.bf16.mxu0 %vm7492_vm8, %v5374_v57 }
 0x69c   : > { %5379 = vmatpush3.bf16.xpose.msk.msra.mxu0 %vm7492_vm8, %v5374_v57 }
 0x69d   : > { %5144 = vmatprep.subr.bf16.mxu0 %v6609_v8 }
 0x6a3   : > { %5093 = vmatmul.mubr.msk.f32.vlgmr.msra.gmra.mrb[16].mxu0 %vm1851_vm7, %v1998_v61 }
 0x6a4   : > { %5095 = vmatprep.mubr.msk.f32.mxu0 %vm1851_vm7, %v1999_v62 }
 0x6a7   : > { %5096 = vmatmul.mubr.msk.f32.gmra.mrb[18].mxu0 %vm1851_vm7, %v2000_v1 }
 0x6a8   : > { %5098 = vmatprep.mubr.msk.f32.mxu0 %vm1851_vm7, %v2001_v4 }
 0x6ab   : > { %5099 = vmatmul.mubr.msk.f32.gmra.mrb[20].mxu0 %vm1851_vm7, %v2002_v10 }
 0x6ac   : > { %5101 = vmatprep.mubr.msk.f32.mxu0 %vm1851_vm7, %v2003_v12 }
 0x6af   : > { %5102 = vmatmul.mubr.msk.f32.gmra.mrb[22].mxu0 %vm1851_vm7, %v2004_v15 }
 0x6b0   : > { %5104 = vmatprep.mubr.msk.f32.mxu0 %vm1851_vm7, %v2005_v35 }
 0x6b3   : > { %5105 = vmatmul.mubr.msk.f32.gmra.mrb[24].mxu0 %vm1851_vm7, %v2006_v17 }
 0x6b4   : > { %5107 = vmatprep.mubr.msk.f32.mxu0 %vm1851_vm7, %v2007_v18 }
 0x6b7   : > { %5108 = vmatmul.mubr.msk.f32.gmra.mrb[26].mxu0 %vm1851_vm7, %v2008_v21 }
 0x6b8   : > { %5110 = vmatprep.mubr.msk.f32.mxu0 %vm1851_vm7, %v2009_v39 }
 0x6bb   : > { %5111 = vmatmul.mubr.msk.f32.gmra.mrb[28].mxu0 %vm1851_vm7, %v2010_v23 }
 0x6bc   : > { %5113 = vmatprep.mubr.msk.f32.mxu0 %vm1851_vm7, %v2011_v24 }
 0x6bf   : > { %5114 = vmatmul.mubr.msk.f32.gmra.mrb[30].mxu0 %vm1851_vm7, %v2012_v26 }
 0x6c0   : > { %5152 = vmatprep.mubr.msk.bf16.mxu0 %vm6612_vm10, %v6609_v8 }
 0x776   : > { %v5094_v27 = vpop.f32.mrb[16].mxu0 }
 0x777   : > { %v7614_v31 = vmul.f32 0.35355338, %v5094_v27  ;;  %v2137_v32 = vpop.f32.mrb[17].mxu0 }
 0x778   : > { %v7616_v33 = vmul.f32 0.35355338, %v2137_v32 }
 0x779   : > { %v2236_v34 = vsel %vm2232_vm9, %v7614_v31, -inf }
 0x77a   : > { %2237 = vmax.xlane.f32.xlu0 %v2236_v34  ;;  %v5097_v36 = vpop.f32.mrb[18].mxu0  ;;  %v2233_v43 = vsel %vm2232_vm9, %v7616_v33, -inf }
 0x77b   : > { %v2147_v40 = vpop.f32.mrb[19].mxu0  ;;  %v7620_v42 = vmul.f32 0.35355338, %v5097_v36 }
 0x77c   : > { %v7626_v6 = vmul.f32 0.35355338, %v2147_v40 }
 0x77d   : > { %v2242_v47 = vsel %vm2232_vm9, %v7620_v42, -inf }
 0x77e   : > { %2234 = vmax.xlane.f32.xlu0 %v2233_v43  ;;  %v5100_v44 = vpop.f32.mrb[20].mxu0  ;;  %v2239_v53 = vsel %vm2232_vm9, %v7626_v6, -inf }
 0x77f   : > { %v2157_v45 = vpop.f32.mrb[21].mxu0  ;;  %v7632_v52 = vmul.f32 0.35355338, %v5100_v44 }
 0x780   : > { %v7624_v46 = vmul.f32 0.35355338, %v2157_v45 }
 0x781   : > { %v2248_v1 = vsel %vm2232_vm9, %v7632_v52, -inf }
 0x782   : > { %2243 = vmax.xlane.f32.xlu0 %v2242_v47  ;;  %v5103_v48 = vpop.f32.mrb[22].mxu0  ;;  %v2245_v49 = vsel %vm2232_vm9, %v7624_v46, -inf }
 0x783   : > { %2246 = vmax.xlane.f32.xlu1 %v2245_v49  ;;  %v2167_v50 = vpop.f32.mrb[23].mxu0  ;;  %v7636_v62 = vmul.f32 0.35355338, %v5103_v48 }
 0x784   : > { %v7640_v12 = vmul.f32 0.35355338, %v2167_v50 }
 0x785   : > { %v2254_v15 = vsel %vm2232_vm9, %v7636_v62, -inf }
 0x786   : > { %2240 = vmax.xlane.f32.xlu0 %v2239_v53  ;;  %v5106_v57 = vpop.f32.mrb[24].mxu0  ;;  %v2251_v21 = vsel %vm2232_vm9, %v7640_v12, -inf }
 0x787   : > { %v2177_v61 = vpop.f32.mrb[25].mxu0  ;;  %v7644_v18 = vmul.f32 0.35355338, %v5106_v57 }
 0x788   : > { %v7650_v26 = vmul.f32 0.35355338, %v2177_v61 }
 0x789   : > { %v2260_v27 = vsel %vm2232_vm9, %v7644_v18, -inf }
 0x78a   : > { %2249 = vmax.xlane.f32.xlu0 %v2248_v1  ;;  %v5109_v4 = vpop.f32.mrb[26].mxu0  ;;  %v2257_v36 = vsel %vm2232_vm9, %v7650_v26, -inf }
 0x78b   : > { %v2187_v10 = vpop.f32.mrb[27].mxu0  ;;  %v7656_v34 = vmul.f32 0.35355338, %v5109_v4 }
 0x78c   : > { %v7660_v40 = vmul.f32 0.35355338, %v2187_v10 }
 0x78d   : > { %v2266_v43 = vsel %vm2232_vm9, %v7656_v34, -inf }
 0x78e   : > { %2255 = vmax.xlane.f32.xlu0 %v2254_v15  ;;  %v5112_v35 = vpop.f32.mrb[28].mxu0  ;;  %v2263_v45 = vsel %vm2232_vm9, %v7660_v40, -inf }
 0x78f   : > { %v2197_v17 = vpop.f32.mrb[29].mxu0  ;;  %v7668_v47 = vmul.f32 0.35355338, %v5112_v35 }
 0x790   : > { %v7664_v44 = vmul.f32 0.35355338, %v2197_v17 }
 0x791   : > { %v2272_v50 = vsel %vm2232_vm9, %v7668_v47, -inf }
 0x792   : > { %2252 = vmax.xlane.f32.xlu0 %v2251_v21  ;;  %v5115_v39 = vpop.f32.mrb[30].mxu0  ;;  %v2269_v48 = vsel %vm2232_vm9, %v7664_v44, -inf }
 0x793   : > { %v2207_v23 = vpop.f32.mrb[31].mxu0  ;;  %v7672_v49 = vmul.f32 0.35355338, %v5115_v39 }
 0x794   : > { %v7648_v24 = vmul.f32 0.35355338, %v2207_v23 }
 0x795   : > { %v2278_v53 = vsel %vm2232_vm9, %v7672_v49, -inf }
 0x796   : > { %2261 = vmax.xlane.f32.xlu0 %v2260_v27  ;;  %v2275_v32 = vsel %vm2232_vm9, %v7648_v24, -inf }
 0x797   : > { %2276 = vmax.xlane.f32.xlu1 %v2275_v32 }
 0x79a   : > { %2258 = vmax.xlane.f32.xlu0 %v2257_v36 }
 0x79e   : > { %2267 = vmax.xlane.f32.xlu0 %v2266_v43 }
 0x7a2   : > { %2264 = vmax.xlane.f32.xlu0 %v2263_v45 }
 0x7a6   : > { %2270 = vmax.xlane.f32.xlu0 %v2269_v48 }
 0x7aa   : > { %2273 = vmax.xlane.f32.xlu0 %v2272_v50 }
 0x7ae   : > { %2279 = vmax.xlane.f32.xlu0 %v2278_v53 }
 0x807   : > { %v2238_v57 = vpop.xlane.xlu0 %2237 }
 0x808   : > { %v2282_v61 = vsub.f32 %v7614_v31, %v2238_v57 }
 0x80a   : > { %v2299_v1 = vmul.f32 1.442695, %v2282_v61 }
 0x80b   : > { %v2235_v4 = vpop.xlane.xlu0 %2234 }
 0x80c   : > { %5899 = vpow2.f32 %v2299_v1  ;;  %v2281_v10 = vsub.f32 %v7616_v33, %v2235_v4 }
 0x80e   : > { %v2297_v15 = vmul.f32 1.442695, %v2281_v10 }
 0x80f   : > { %v2244_v35 = vpop.xlane.xlu0 %2243 }
 0x810   : > { %5901 = vpow2.f32 %v2297_v15  ;;  %v2284_v17 = vsub.f32 %v7620_v42, %v2244_v35  ;;  %v2247_v21 = vpop.xlane.xlu1 %2246 }
 0x811   : > { %v2285_v23 = vsub.f32 %v7624_v46, %v2247_v21 }
 0x812   : > { %v2303_v39 = vmul.f32 1.442695, %v2284_v17 }
 0x813   : > { %v2241_v27 = vpop.xlane.xlu0 %2240  ;;  %v2305_v31 = vmul.f32 1.442695, %v2285_v23 }
 0x814   : > { %5903 = vpow2.f32 %v2303_v39  ;;  %v2283_v32 = vsub.f32 %v7626_v6, %v2241_v27 }
 0x816   : > { %v7683_v36 = vpop.eup %5899  ;;  %v2301_v43 = vmul.f32 1.442695, %v2283_v32 }
 0x817   : > { %v2250_v45 = vpop.xlane.xlu0 %2249  ;;  %v2332_v33 = vsel %vm2232_vm9, %v7683_v36, 0.0 }
 0x818   : > { %5905 = vpow2.f32 %v2301_v43  ;;  %v2286_v48 = vsub.f32 %v7632_v52, %v2250_v45  ;;  %2333 = vadd.xlane.f32.xlu0 %v2332_v33 }
 0x819   : > { %5907 = vpow2.f32 %v2305_v31 }
 0x81a   : > { %v7688_v42 = vpop.eup %5901  ;;  %v2307_v46 = vmul.f32 1.442695, %v2286_v48 }
 0x81b   : > { %v2256_v50 = vpop.xlane.xlu0 %2255  ;;  %v2329_v6 = vsel %vm2232_vm9, %v7688_v42, 0.0 }
 0x81c   : > { %5909 = vpow2.f32 %v2307_v46  ;;  %v2288_v53 = vsub.f32 %v7636_v62, %v2256_v50  ;;  %2330 = vadd.xlane.f32.xlu1 %v2329_v6 }
 0x81e   : > { %v7693_v57 = vpop.eup %5903  ;;  %v2311_v61 = vmul.f32 1.442695, %v2288_v53 }
 0x81f   : > { %v2253_v1 = vpop.xlane.xlu0 %2252  ;;  %v2338_v52 = vsel %vm2232_vm9, %v7693_v57, 0.0 }
 0x820   : > { %5911 = vpow2.f32 %v2311_v61  ;;  %v2287_v4 = vsub.f32 %v7640_v12, %v2253_v1  ;;  %2339 = vadd.xlane.f32.xlu0 %v2338_v52 }
 0x822   : > { %v7698_v10 = vpop.eup %5905  ;;  %v2309_v15 = vmul.f32 1.442695, %v2287_v4 }
 0x823   : > { %v2262_v35 = vpop.xlane.xlu0 %2261  ;;  %v2335_v17 = vsel %vm2232_vm9, %v7698_v10, 0.0  ;;  %v7702_v62 = vpop.eup %5907 }
 0x824   : > { %5913 = vpow2.f32 %v2309_v15  ;;  %v2290_v21 = vsub.f32 %v7644_v18, %v2262_v35  ;;  %2336 = vadd.xlane.f32.xlu1 %v2335_v17  ;;  %v2341_v32 = vsel %vm2232_vm9, %v7702_v62, 0.0  ;;  %v2277_v6 = vpop.xlane.xlu1 %2276 }
 0x825   : > { %v2295_v52 = vsub.f32 %v7648_v24, %v2277_v6 }
 0x826   : > { %v7705_v39 = vpop.eup %5909  ;;  %v2315_v23 = vmul.f32 1.442695, %v2290_v21 }
 0x827   : > { %v2259_v27 = vpop.xlane.xlu0 %2258  ;;  %v2344_v12 = vsel %vm2232_vm9, %v7705_v39, 0.0  ;;  %v2325_v21 = vmul.f32 1.442695, %v2295_v52 }
 0x828   : > { %5915 = vpow2.f32 %v2315_v23  ;;  %v2289_v31 = vsub.f32 %v7650_v26, %v2259_v27  ;;  %2345 = vadd.xlane.f32.xlu0 %v2344_v12  ;;  %2342 = vadd.xlane.f32.xlu1 %v2341_v32 }
 0x82a   : > { %v7712_v43 = vpop.eup %5911  ;;  %v2313_v45 = vmul.f32 1.442695, %v2289_v31 }
 0x82b   : > { %v2268_v18 = vpop.xlane.xlu0 %2267  ;;  %v2350_v33 = vsel %vm2232_vm9, %v7712_v43, 0.0 }
 0x82c   : > { %5917 = vpow2.f32 %v2313_v45  ;;  %v2292_v48 = vsub.f32 %v7656_v34, %v2268_v18  ;;  %2351 = vadd.xlane.f32.xlu0 %v2350_v33 }
 0x82e   : > { %v7717_v46 = vpop.eup %5913  ;;  %v2319_v50 = vmul.f32 1.442695, %v2292_v48 }
 0x82f   : > { %v2265_v53 = vpop.xlane.xlu0 %2264  ;;  %v2347_v26 = vsel %vm2232_vm9, %v7717_v46, 0.0 }
 0x830   : > { %5919 = vpow2.f32 %v2319_v50  ;;  %v2291_v61 = vsub.f32 %v7660_v40, %v2265_v53  ;;  %2348 = vadd.xlane.f32.xlu1 %v2347_v26 }
 0x832   : > { %v7722_v1 = vpop.eup %5915  ;;  %v2317_v4 = vmul.f32 1.442695, %v2291_v61 }
 0x833   : > { %v2271_v15 = vpop.xlane.xlu0 %2270  ;;  %v2356_v34 = vsel %vm2232_vm9, %v7722_v1, 0.0 }
 0x834   : > { %5921 = vpow2.f32 %v2317_v4  ;;  %v2293_v35 = vsub.f32 %v7664_v44, %v2271_v15  ;;  %2357 = vadd.xlane.f32.xlu0 %v2356_v34 }
 0x836   : > { %v7728_v17 = vpop.eup %5917  ;;  %v2321_v23 = vmul.f32 1.442695, %v2293_v35 }
 0x837   : > { %v2274_v27 = vpop.xlane.xlu0 %2273  ;;  %v2353_v40 = vsel %vm2232_vm9, %v7728_v17, 0.0 }
 0x838   : > { %5923 = vpow2.f32 %v2321_v23  ;;  %v2294_v24 = vsub.f32 %v7668_v47, %v2274_v27  ;;  %2354 = vadd.xlane.f32.xlu1 %v2353_v40 }
 0x839   : > { %5925 = vpow2.f32 %v2325_v21 }
 0x83a   : > { %v7733_v12 = vpop.eup %5919  ;;  %v2323_v32 = vmul.f32 1.442695, %v2294_v24 }
 0x83b   : > { %v2280_v31 = vpop.xlane.xlu0 %2279  ;;  %v2362_v44 = vsel %vm2232_vm9, %v7733_v12, 0.0 }
 0x83c   : > { %5927 = vpow2.f32 %v2323_v32  ;;  %v2296_v45 = vsub.f32 %v7672_v49, %v2280_v31  ;;  %2363 = vadd.xlane.f32.xlu0 %v2362_v44 }
 0x83e   : > { %v7738_v18 = vpop.eup %5921  ;;  %v2327_v33 = vmul.f32 1.442695, %v2296_v45 }
 0x83f   : > { %v2359_v48 = vsel %vm2232_vm9, %v7738_v18, 0.0 }
 0x840   : > { %5929 = vpow2.f32 %v2327_v33  ;;  %2360 = vadd.xlane.f32.xlu1 %v2359_v48 }
 0x842   : > { %v7742_v47 = vpop.eup %5923 }
 0x843   : > { %v2365_v50 = vsel %vm2232_vm9, %v7742_v47, 0.0  ;;  %v7746_v6 = vpop.eup %5925 }
 0x844   : > { %2366 = vadd.xlane.f32.xlu1 %v2365_v50  ;;  %v2371_v26 = vsel %vm2232_vm9, %v7746_v6, 0.0 }
 0x846   : > { %v7748_v53 = vpop.eup %5927 }
 0x847   : > { %v2368_v49 = vsel %vm2232_vm9, %v7748_v53, 0.0 }
 0x848   : > { %2369 = vadd.xlane.f32.xlu0 %v2368_v49  ;;  %2372 = vadd.xlane.f32.xlu1 %v2371_v26 }
 0x84a   : > { %v7754_v61 = vpop.eup %5929 }
 0x84b   : > { %v2374_v52 = vsel %vm2232_vm9, %v7754_v61, 0.0 }
 0x84c   : > { %2375 = vadd.xlane.f32.xlu0 %v2374_v52 }
 0x8a5   : > { %v2334_v4 = vpop.xlane.xlu0 %2333 }
 0x8a6   : > { %5931 = vrcp.f32 %v2334_v4 }
 0x8a9   : > { %v2331_v15 = vpop.xlane.xlu1 %2330 }
 0x8aa   : > { %5933 = vrcp.f32 %v2331_v15 }
 0x8ad   : > { %v2340_v34 = vpop.xlane.xlu0 %2339 }
 0x8ae   : > { %5935 = vrcp.f32 %v2340_v34 }
 0x8b0   : > { %v5932_v21 = vpop.eup %5931 }
 0x8b1   : > { %v2337_v35 = vpop.xlane.xlu1 %2336  ;;  %v2394_v32 = vmul.f32 %v5932_v21, %v7683_v36 }
 0x8b2   : > { %5937 = vrcp.f32 %v2337_v35 }
 0x8b4   : > { %v5934_v23 = vpop.eup %5933 }
 0x8b5   : > { %v2346_v27 = vpop.xlane.xlu0 %2345  ;;  %v2343_v40 = vpop.xlane.xlu1 %2342  ;;  %v2393_v24 = vmul.f32 %v5934_v23, %v7688_v42 }
 0x8b6   : > { %5939 = vrcp.f32 %v2346_v27 }
 0x8b7   : > { %5941 = vrcp.f32 %v2343_v40  ;;  %5120 = vmatprep.mubr.msk.f32.mxu1 %vm2232_vm9, %v2393_v24 }
 0x8b8   : > { %5121 = vmatmul.mubr.msk.f32.vlgmr.msra.gmra.mrb[8].mxu1 %vm2232_vm9, %v2394_v32  ;;  %v5936_v44 = vpop.eup %5935 }
 0x8b9   : > { %v2352_v31 = vpop.xlane.xlu0 %2351  ;;  %v2396_v50 = vmul.f32 %v5936_v44, %v7693_v57 }
 0x8ba   : > { %5943 = vrcp.f32 %v2352_v31 }
 0x8bc   : > { %v5938_v45 = vpop.eup %5937 }
 0x8bd   : > { %v2349_v33 = vpop.xlane.xlu1 %2348  ;;  %v2395_v48 = vmul.f32 %v5938_v45, %v7698_v10 }
 0x8be   : > { %5945 = vrcp.f32 %v2349_v33 }
 0x8bf   : > { %5123 = vmatprep.mubr.msk.f32.mxu1 %vm2232_vm9, %v2395_v48 }
 0x8c0   : > { %v5940_v42 = vpop.eup %5939  ;;  %5124 = vmatmul.mubr.msk.f32.gmra.mrb[10].mxu1 %vm2232_vm9, %v2396_v50 }
 0x8c1   : > { %v5942_v36 = vpop.eup %5941  ;;  %v2398_v49 = vmul.f32 %v5940_v42, %v7705_v39  ;;  %v2358_v26 = vpop.xlane.xlu0 %2357 }
 0x8c2   : > { %v2397_v52 = vmul.f32 %v5942_v36, %v7702_v62  ;;  %5947 = vrcp.f32 %v2358_v26  ;;  %v5808_v36 = vld [vmem:[#allocation11 + $0x8] sm:$0xff]  }
 0x8c4   : > { %5126 = vmatprep.mubr.msk.f32.mxu1 %vm2232_vm9, %v2397_v52  ;;  %v5944_v4 = vpop.eup %5943 }
 0x8c5   : > { %5127 = vmatmul.mubr.msk.f32.gmra.mrb[12].mxu1 %vm2232_vm9, %v2398_v49  ;;  %v2355_v10 = vpop.xlane.xlu1 %2354  ;;  %v2400_v35 = vmul.f32 %v5944_v4, %v7712_v43 }
 0x8c6   : > { %5949 = vrcp.f32 %v2355_v10 }
 0x8c8   : > { %v5946_v57 = vpop.eup %5945 }
 0x8c9   : > { %v2399_v15 = vmul.f32 %v5946_v57, %v7717_v46  ;;  %v2364_v34 = vpop.xlane.xlu0 %2363 }
 0x8ca   : > { %5951 = vrcp.f32 %v2364_v34 }
 0x8cb   : > { %5129 = vmatprep.mubr.msk.f32.mxu1 %vm2232_vm9, %v2399_v15 }
 0x8cc   : > { %5130 = vmatmul.mubr.msk.f32.gmra.mrb[14].mxu1 %vm2232_vm9, %v2400_v35  ;;  %v5948_v39 = vpop.eup %5947 }
 0x8cd   : > { %v2361_v62 = vpop.xlane.xlu1 %2360  ;;  %v2402_v40 = vmul.f32 %v5948_v39, %v7722_v1 }
 0x8ce   : > { %5953 = vrcp.f32 %v2361_v62 }
 0x8d0   : > { %v5950_v21 = vpop.eup %5949 }
 0x8d1   : > { %v2367_v23 = vpop.xlane.xlu1 %2366  ;;  %v2401_v27 = vmul.f32 %v5950_v21, %v7728_v17 }
 0x8d2   : > { %5955 = vrcp.f32 %v2367_v23 }
 0x8d3   : > { %5132 = vmatprep.mubr.msk.f32.mxu1 %vm2232_vm9, %v2401_v27 }
 0x8d4   : > { %5133 = vmatmul.mubr.msk.f32.gmra.mrb[16].mxu1 %vm2232_vm9, %v2402_v40  ;;  %v5952_v24 = vpop.eup %5951 }
 0x8d5   : > { %v2370_v43 = vpop.xlane.xlu0 %2369  ;;  %v2373_v46 = vpop.xlane.xlu1 %2372  ;;  %v2404_v45 = vmul.f32 %v5952_v24, %v7733_v12 }
 0x8d6   : > { %5957 = vrcp.f32 %v2370_v43 }
 0x8d7   : > { %5959 = vrcp.f32 %v2373_v46 }
 0x8d8   : > { %v5954_v32 = vpop.eup %5953 }
 0x8d9   : > { %v2376_v31 = vpop.xlane.xlu0 %2375  ;;  %v2403_v44 = vmul.f32 %v5954_v32, %v7738_v18 }
 0x8da   : > { %5961 = vrcp.f32 %v2376_v31 }
 0x8db   : > { %5135 = vmatprep.mubr.msk.f32.mxu1 %vm2232_vm9, %v2403_v44 }
 0x8dc   : > { %v5956_v17 = vpop.eup %5955  ;;  %5136 = vmatmul.mubr.msk.f32.gmra.mrb[18].mxu1 %vm2232_vm9, %v2404_v45 }
 0x8dd   : > { %v2405_v1 = vmul.f32 %v5956_v17, %v7742_v47  ;;  %v5807_v47 = vld [vmem:[#allocation11] sm:$0xff]  }
 0x8de   : > { %5145 = vmatpush3.bf16.msra.mxu0 %v5807_v47 }
 0x8df   : > { %5138 = vmatprep.mubr.msk.f32.mxu1 %vm2232_vm9, %v2405_v1  ;;  %5146 = vmatprep.subr.bf16.mxu0 %v6609_v8 }
 0x8e0   : > { %v5958_v33 = vpop.eup %5957 }
 0x8e1   : > { %v5960_v48 = vpop.eup %5959  ;;  %v2406_v50 = vmul.f32 %v5958_v33, %v7748_v53  ;;  %v5810_v53 = vld [vmem:[#allocation11 + $0x18] sm:$0xff]  }
 0x8e2   : > { %v2407_v42 = vmul.f32 %v5960_v48, %v7746_v6  ;;  %5147 = vmatpush3.bf16.msra.mxu0 %v5808_v36  ;;  %v5809_v6 = vld [vmem:[#allocation11 + $0x10] sm:$0xff]  }
 0x8e3   : > { %5139 = vmatmul.mubr.msk.f32.gmra.mrb[20].mxu1 %vm2232_vm9, %v2406_v50  ;;  %5148 = vmatprep.subr.bf16.mxu0 %v6609_v8 }
 0x8e4   : > { %v5962_v18 = vpop.eup %5961  ;;  %5141 = vmatprep.mubr.msk.f32.mxu1 %vm2232_vm9, %v2407_v42 }
 0x8e5   : > { %v2408_v12 = vmul.f32 %v5962_v18, %v7754_v61 }
 0x8e6   : > { %5149 = vmatpush3.bf16.msra.mxu0 %v5809_v6 }
 0x8e7   : > { %5142 = vmatmul.mubr.msk.f32.gmra.mrb[22].mxu1 %vm2232_vm9, %v2408_v12  ;;  %5150 = vmatprep.subr.bf16.mxu0 %v6609_v8 }
 0x8e8   : > { %2840 = vmatprep.mubr.bf16.mxu1 %v6610_v60 }
 0x8ea   : > { %5151 = vmatpush3.bf16.msra.mxu0 %v5810_v53 }
 0x98b   : > { %v5122_v61 = vpop.f32.mrb[8].mxu1 }
 0x98c   : > { %v2523_v49 = vpop.f32.mrb[9].mxu1  ;;  %v2603_v52 = vmul.f32 %v5122_v61, %v7504_v58 }
 0x98d   : > { %v2602_v57 = vmul.f32 %v2523_v49, %v7482_v38 }
 0x993   : > { %v5125_v26 = vpop.f32.mrb[10].mxu1 }
 0x994   : > { %v2605_v10 = vmul.f32 %v5125_v26, %v7517_v63  ;;  %v2533_v4 = vpop.f32.mrb[11].mxu1 }
 0x995   : > { %v2604_v15 = vmul.f32 %v2533_v4, %v7509_v59 }
 0x996   : > { %v2619_v34 = vadd.f32 %v2605_v10, %v2603_v52 }
 0x997   : > { %v2618_v35 = vadd.f32 %v2604_v15, %v2602_v57 }
 0x998   : > { %v5128_v62 = vpop.f32.mrb[12].mxu1 }
 0x999   : > { %v2607_v39 = vmul.f32 %v5128_v62, %v7532_v7  ;;  %v2543_v21 = vpop.f32.mrb[13].mxu1 }
 0x99a   : > { %v2606_v23 = vmul.f32 %v2543_v21, %v7523_v0 }
 0x99b   : > { %v2621_v27 = vadd.f32 %v2619_v34, %v2607_v39  ;;  %v5811_v34 = vld [vmem:[%s8645_s12] ss:$8 sps:$4 sm:$0xff]  }
 0x99c   : > { %v2620_v40 = vadd.f32 %v2618_v35, %v2606_v23 }
 0x99f   : > { %v5131_v43 = vpop.f32.mrb[14].mxu1 }
 0x9a0   : > { %v2609_v58 = vmul.f32 %v5131_v43, %v7547_v13  ;;  %v2553_v46 = vpop.f32.mrb[15].mxu1 }
 0x9a1   : > { %v2608_v63 = vmul.f32 %v2553_v46, %v7538_v9  ;;  %v5816_v46 = vld [vmem:[%s8645_s12 + $0x14] ss:$8 sps:$4 sm:$0xff]  }
 0x9a2   : > { %v2623_v24 = vadd.f32 %v2621_v27, %v2609_v58 }
 0x9a3   : > { %v2622_v38 = vadd.f32 %v2620_v40, %v2608_v63  ;;  %v5814_v63 = vld [vmem:[%s8645_s12 + $0x10] ss:$8 sps:$4 sm:$0xff]  }
 0x9a7   : > { %v5134_v32 = vpop.f32.mrb[16].mxu1 }
 0x9a8   : > { %v2611_v59 = vmul.f32 %v5134_v32, %v7562_v16  ;;  %v2563_v31 = vpop.f32.mrb[17].mxu1  ;;  %v5822_v32 = vld [vmem:[%s8645_s12 + $0x34] ss:$8 sps:$4 sm:$0xff]  }
 0x9a9   : > { %v2610_v44 = vmul.f32 %v2563_v31, %v7553_v14 }
 0x9aa   : > { %v2625_v7 = vadd.f32 %v2623_v24, %v2611_v59  ;;  %v5819_v24 = vld [vmem:[%s8645_s12 + $0x24] ss:$8 sps:$4 sm:$0xff]   ;;  %v5820_v59 = vld [vmem:[%s8645_s12 + $0x30] ss:$8 sps:$4 sm:$0xff]  }
 0x9ab   : > { %v2624_v45 = vadd.f32 %v2622_v38, %v2610_v44  ;;  %v5817_v38 = vld [vmem:[%s8645_s12 + $0x20] ss:$8 sps:$4 sm:$0xff]  }
 0x9af   : > { %v5137_v17 = vpop.f32.mrb[18].mxu1 }
 0x9b0   : > { %v2613_v0 = vmul.f32 %v5137_v17, %v7577_v19  ;;  %v2573_v1 = vpop.f32.mrb[19].mxu1 }
 0x9b1   : > { %v2612_v33 = vmul.f32 %v2573_v1, %v7568_v37  ;;  %v1766_v37 = vld [vmem:[#allocation13] sm:$0x3]  ;;  %v1767_v1 = vld [vmem:[#allocation14] sm:$0x3] }
 0x9b2   : > { %v2627_v13 = vadd.f32 %v2625_v7, %v2613_v0  ;;  %v2636_v49 = vrot.slane %v1766_v37, %v7438_v54  ;;  %v5827_v37 = vld [vmem:[%s8647_s4 + $0x50] sm:$0xff]  }
 0x9b3   : > { %v2626_v48 = vadd.f32 %v2624_v45, %v2612_v33  ;;  %v2736_v33 = vrot.slane %v1767_v1, %v7438_v54 }
 0x9b6   : > { %v5140_v50 = vpop.f32.mrb[20].mxu1 }
 0x9b7   : > { %v2615_v9 = vmul.f32 %v5140_v50, %v7592_v22  ;;  %v2583_v42 = vpop.f32.mrb[21].mxu1 }
 0x9b8   : > { %v2614_v18 = vmul.f32 %v2583_v42, %v7583_v20 }
 0x9b9   : > { %v2629_v16 = vadd.f32 %v2627_v13, %v2615_v9 }
 0x9ba   : > { %v2628_v12 = vadd.f32 %v2626_v48, %v2614_v18  ;;  %v5143_v47 = vpop.f32.mrb[22].mxu1  ;;  %v1768_v48 = vld [vmem:[#allocation16] sm:$0x3] }
 0x9bb   : > { %v2617_v14 = vmul.f32 %v5143_v47, %v7607_v25  ;;  %v2593_v36 = vpop.f32.mrb[23].mxu1  ;;  %v2742_v42 = vrot.slane %v1768_v48, %v7438_v54 }
 0x9bc   : > { %v2616_v6 = vmul.f32 %v2593_v36, %v7598_v41 }
 0x9bd   : > { %v2631_v19 = vadd.f32 %v2629_v16, %v2617_v14 }
 0x9be   : > { %v2630_v53 = vadd.f32 %v2628_v12, %v2616_v6  ;;  %v5823_v6 = vld [vmem:[%s8646_s30 + $0x40] sm:$0xff]   ;;  %s8648_s30 = sld [smem:[#allocation58_spill]] }
 0x9bf   : > { %5003 = vmatprep.subr.bf16.mxu0 %v5823_v6 }
 0x9c0   : > { %v2632_v61 = vpack.c.bf16 %v2631_v19, %v2630_v53  ;;  %v5824_v19 = vld [vmem:[%s8647_s4] sm:$0xff]   ;;  %v5825_v53 = vld [vmem:[%s8647_s4 + $0x48] sm:$0xff]  }
 0x9c2   : > { %5153 = vmatmul.mubr.msk.bf16.vlgmr.msra.gmra.mrb[32].mxu0 %vm1851_vm7, %v2632_v61  ;;  %v5826_v61 = vld [vmem:[%s8647_s4 + $0x8] sm:$0xff]  }
 0x9c3   : > { %5004 = vmatpush3.bf16.msra.mxu0 %v5824_v19 }
 0x9c4   : > { %5005 = vmatprep.subr.bf16.mxu0 %v5825_v53  ;;  %s8649_s9 = smov %s8648_s30 }
 0x9c7   : > { %5006 = vmatpush3.bf16.msra.mxu0 %v5826_v61 }
 0x9c8   : > { %5007 = vmatprep.subr.bf16.mxu0 %v5827_v37 }
 0xa95   : > { %v2698_v22 = vpop.f32.mrb[32].mxu0 }
 0xa96   : > { %v2699_v26 = vadd.f32 %v2698_v22, %v2636_v49  ;;  %v5154_v52 = vpop.f32.mrb[33].mxu0  ;;  %v5829_v22 = vld [vmem:[%s8647_s4 + $0x58] sm:$0xff]  }
 0xa97   : > { %v2701_v20 = vpop.f32.mrb[34].mxu0  ;;  %v5831_v52 = vld [vmem:[%s8647_s4 + $0x60] sm:$0xff]  }
 0xa98   : > { %v7815_v10 = vadd.f32 %v2699_v26, %v7405_v28  ;;  %v2702_v4 = vadd.f32 %v2701_v20, %v2636_v49  ;;  %v5155_v25 = vpop.f32.mrb[35].mxu0  ;;  %v5813_v28 = vld [vmem:[%s8645_s12 + $0x4] ss:$8 sps:$4 sm:$0xff]   ;;  %v5828_v49 = vld [vmem:[%s8647_s4 + $0x10] sm:$0xff]   ;;  %v5830_v26 = vld [vmem:[%s8647_s4 + $0x18] sm:$0xff]  }
 0xa99   : > { %2808 = vmatprep.subr.bf16.mxu1 %v5813_v28  ;;  %5008 = vmatpush3.bf16.msra.mxu0 %v5828_v49  ;;  %v5832_v20 = vld [vmem:[%s8647_s4 + $0x20] sm:$0xff]   ;;  %v5834_v25 = vld [vmem:[%s8647_s4 + $0x28] sm:$0xff]   ;;  %v5838_v28 = vld [vmem:[%s8647_s4 + $0x38] sm:$0xff]  }
 0xa9a   : > { %v7818_v57 = vadd.f32 %v2702_v4, %v7407_v30  ;;  %v2707_v41 = vsel %vm1851_vm7, %v7815_v10, 0.0  ;;  %2809 = vmatpush1.bf16.msra.mxu1 %v5811_v34  ;;  %5009 = vmatprep.subr.bf16.mxu0 %v5829_v22  ;;  %v5833_v4 = vld [vmem:[%s8647_s4 + $0x68] sm:$0xff]   ;;  %v5837_v34 = vld [vmem:[%s8647_s4 + $0x78] sm:$0xff]  }
 0xa9b   : > { %2708 = vadd.xlane.f32.xlu1 %v2707_v41  ;;  %2810 = vmatprep.subr.bf16.mxu1 %v5816_v46  ;;  %v5835_v41 = vld [vmem:[%s8647_s4 + $0x70] sm:$0xff]  }
 0xa9c   : > { %v2710_v15 = vsel %vm1851_vm7, %v7818_v57, 0.0 }
 0xa9d   : > { %2711 = vadd.xlane.f32.xlu0 %v2710_v15  ;;  %5010 = vmatpush3.bf16.msra.mxu0 %v5830_v26  ;;  %v5836_v15 = vld [vmem:[%s8647_s4 + $0x30] sm:$0xff]  }
 0xa9e   : > { %2811 = vmatpush1.bf16.msra.mxu1 %v5814_v63  ;;  %5011 = vmatprep.subr.bf16.mxu0 %v5831_v52 }
 0xa9f   : > { %2812 = vmatprep.subr.bf16.mxu1 %v5819_v24 }
 0xaa1   : > { %5012 = vmatpush3.bf16.msra.mxu0 %v5832_v20 }
 0xaa2   : > { %2813 = vmatpush1.bf16.msra.mxu1 %v5817_v38  ;;  %5013 = vmatprep.subr.bf16.mxu0 %v5833_v4 }
 0xaa3   : > { %2814 = vmatprep.subr.bf16.mxu1 %v5822_v32 }
 0xaa5   : > { %5014 = vmatpush3.bf16.msra.mxu0 %v5834_v25 }
 0xaa6   : > { %2815 = vmatpush1.bf16.msra.mxu1 %v5820_v59  ;;  %5015 = vmatprep.subr.bf16.mxu0 %v5835_v41 }
 0xaa9   : > { %5016 = vmatpush3.bf16.msra.mxu0 %v5836_v15 }
 0xaaa   : > { %5017 = vmatprep.subr.bf16.mxu0 %v5837_v34 }
 0xaad   : > { %5018 = vmatpush3.bf16.msra.mxu0 %v5838_v28 }
 0xb28   : > { %v2709_v30 = vpop.xlane.xlu1 %2708 }
 0xb29   : > { %v2713_v35 = vmul.f32 0.015625, %v2709_v30  ;;  %v1785_v30 = vld [vmem:[%s8648_s30] sm:$0xf] }
 0xb2a   : > { %v2712_v62 = vpop.xlane.xlu0 %2711 }
 0xb2b   : > { %v2715_v39 = vsub.f32 %v7815_v10, %v2713_v35  ;;  %v2714_v21 = vmul.f32 0.015625, %v2712_v62  ;;  %v2750_v35 = vrot.slane %v1785_v30, %v7438_v54  ;;  %v2754_v62 = vrot.slane %v1785_v30, %v1899_v29 }
 0xb2d   : > { %v2716_v23 = vsub.f32 %v7818_v57, %v2714_v21  ;;  %v2717_v27 = vmul.f32 %v2715_v39, %v2715_v39  ;;  %v2764_v21 = vrot.slane %v2754_v62, %v7438_v54 }
 0xb2f   : > { %v2719_v40 = vsel %vm1851_vm7, %v2717_v27, 0.0  ;;  %v2718_v43 = vmul.f32 %v2716_v23, %v2716_v23 }
 0xb30   : > { %2720 = vadd.xlane.f32.xlu1 %v2719_v40 }
 0xb31   : > { %v2722_v58 = vsel %vm1851_vm7, %v2718_v43, 0.0 }
 0xb32   : > { %2723 = vadd.xlane.f32.xlu0 %v2722_v58 }
 0xbbd   : > { %v2721_v31 = vpop.xlane.xlu1 %2720 }
 0xbbe   : > { %v2725_v44 = vmul.f32 0.015625, %v2721_v31 }
 0xbbf   : > { %v2724_v7 = vpop.xlane.xlu0 %2723 }
 0xbc0   : > { %v2727_v45 = vadd.f32 1e-06, %v2725_v44  ;;  %v2726_v17 = vmul.f32 0.015625, %v2724_v7 }
 0xbc2   : > { %5963 = vrsqrt.f32 %v2727_v45  ;;  %v2728_v0 = vadd.f32 1e-06, %v2726_v17 }
 0xbc4   : > { %5965 = vrsqrt.f32 %v2728_v0 }
 0xbcc   : > { %v5964_v13 = vpop.eup %5963 }
 0xbcd   : > { %v2731_v50 = vmul.f32 %v5964_v13, %v2715_v39  ;;  %v2760_v39 = vrot.slane %v2750_v35, %v7438_v54 }
 0xbce   : > { %v5966_v9 = vpop.eup %5965 }
 0xbcf   : > { %v2737_v18 = vmul.f32 %v2736_v33, %v2731_v50  ;;  %v2732_v16 = vmul.f32 %v5966_v9, %v2716_v23 }
 0xbd1   : > { %v2738_v12 = vmul.f32 %v2736_v33, %v2732_v16  ;;  %v2743_v47 = vadd.f32 %v2742_v42, %v2737_v18 }
 0xbd3   : > { %v2744_v14 = vadd.f32 %v2742_v42, %v2738_v12 }
 0xbd5   : > { %v2745_v36 = vpack.c.bf16 %v2744_v14, %v2743_v47 }
 0xbd7   : > { %4832 = vmatmul.mubr.msk.bf16.vlgmr.msra.gmra.mrb[24].mxu1 %vm1851_vm7, %v2745_v36 }
 0xbd8   : > { %3232 = vmatprep.mubr.bf16.mxu1 %v6610_v60 }
 0xcaa   : > { %v2842_v23 = vpop.f32.mrb[24].mxu1 }
 0xcab   : > { %v7912_v27 = vadd.f32 %v2842_v23, %v2760_v39  ;;  %v2844_v40 = vpop.f32.mrb[25].mxu1 }
 0xcac   : > { %v7914_v43 = vadd.f32 %v2844_v40, %v2764_v21  ;;  %v2846_v58 = vpop.f32.mrb[26].mxu1 }
 0xcad   : > { %v7917_v46 = vmul.f32 0.70710677, %v7912_v27  ;;  %v7919_v63 = vadd.f32 %v2846_v58, %v2760_v39  ;;  %v2848_v24 = vpop.f32.mrb[27].mxu1 }
 0xcae   : > { %v7922_v38 = vmul.f32 0.70710677, %v7914_v43  ;;  %v7928_v59 = vadd.f32 %v2848_v24, %v2764_v21 }
 0xcaf   : > { %v2867_v29 = vand.u32 2147483647, %v7917_v46  ;;  %v7926_v32 = vmul.f32 0.70710677, %v7919_v63  ;;  %vm2859_vm11 = vcmp.ge.f32.partialorder %v7917_v46, 0.0 }
 0xcb0   : > { %v2868_v31 = vand.u32 2147483647, %v7922_v38  ;;  %v7933_v0 = vmul.f32 0.70710677, %v7928_v59  ;;  %vm2860_vm12 = vcmp.ge.f32.partialorder %v7922_v38, 0.0 }
 0xcb1   : > { %v2871_v44 = vmul.f32 0.3275911, %v2867_v29  ;;  %v2869_v45 = vand.u32 2147483647, %v7926_v32  ;;  %v2919_v42 = vsub.f32 0.0, %v2867_v29  ;;  %vm2861_vm13 = vcmp.ge.f32.partialorder %v7926_v32, 0.0 }
 0xcb2   : > { %v2872_v7 = vmul.f32 0.3275911, %v2868_v31  ;;  %v2870_v13 = vand.u32 2147483647, %v7933_v0  ;;  %v2920_v18 = vsub.f32 0.0, %v2868_v31  ;;  %vm2862_vm14 = vcmp.ge.f32.partialorder %v7933_v0, 0.0 }
 0xcb3   : > { %v2875_v17 = vadd.f32 1.0, %v2871_v44  ;;  %v2873_v33 = vmul.f32 0.3275911, %v2869_v45  ;;  %v2923_v12 = vmul.f32 %v2919_v42, %v2867_v29  ;;  %v2921_v47 = vsub.f32 0.0, %v2869_v45 }
 0xcb4   : > { %v2876_v1 = vadd.f32 1.0, %v2872_v7  ;;  %v2874_v50 = vmul.f32 0.3275911, %v2870_v13  ;;  %v2924_v6 = vmul.f32 %v2920_v18, %v2868_v31  ;;  %v2922_v53 = vsub.f32 0.0, %v2870_v13 }
 0xcb5   : > { %5967 = vrcp.f32 %v2875_v17  ;;  %v2877_v48 = vadd.f32 1.0, %v2873_v33  ;;  %v2927_v49 = vmul.f32 1.442695, %v2923_v12  ;;  %v2925_v26 = vmul.f32 %v2921_v47, %v2869_v45 }
 0xcb6   : > { %5969 = vrcp.f32 %v2876_v1  ;;  %v2878_v9 = vadd.f32 1.0, %v2874_v50  ;;  %v2929_v20 = vmul.f32 1.442695, %v2924_v6  ;;  %v2926_v15 = vmul.f32 %v2922_v53, %v2870_v13 }
 0xcb7   : > { %5971 = vrcp.f32 %v2877_v48  ;;  %v2931_v62 = vmul.f32 1.442695, %v2925_v26  ;;  %v2854_v0 = vmul.f32 0.5, %v7928_v59 }
 0xcb8   : > { %5973 = vrcp.f32 %v2878_v9  ;;  %v2933_v58 = vmul.f32 1.442695, %v2926_v15 }
 0xcb9   : > { %5975 = vpow2.f32 %v2927_v49 }
 0xcba   : > { %5977 = vpow2.f32 %v2929_v20  ;;  %v6613_v20 = vmov -1.0  }
 0xcbb   : > { %5979 = vpow2.f32 %v2931_v62 }
 0xcbc   : > { %5981 = vpow2.f32 %v2933_v58 }
 0xcbf   : > { %v5968_v16 = vpop.eup %5967 }
 0xcc0   : > { %v5970_v14 = vpop.eup %5969  ;;  %v2883_v36 = vmul.f32 1.0614054, %v5968_v16 }
 0xcc1   : > { %v2884_v19 = vmul.f32 1.0614054, %v5970_v14  ;;  %v5972_v37 = vpop.eup %5971 }
 0xcc2   : > { %v2887_v61 = vadd.f32 -1.4531521, %v2883_v36  ;;  %v2885_v4 = vmul.f32 1.0614054, %v5972_v37  ;;  %v5974_v25 = vpop.eup %5973 }
 0xcc3   : > { %v2888_v22 = vadd.f32 -1.4531521, %v2884_v19  ;;  %v2886_v30 = vmul.f32 1.0614054, %v5974_v25  ;;  %v5976_v12 = vpop.eup %5975 }
 0xcc4   : > { %v2891_v52 = vmul.f32 %v5968_v16, %v2887_v61  ;;  %v2889_v28 = vadd.f32 -1.4531521, %v2885_v4  ;;  %v5978_v36 = vpop.eup %5977 }
 0xcc5   : > { %v2892_v41 = vmul.f32 %v5970_v14, %v2888_v22  ;;  %v2890_v23 = vadd.f32 -1.4531521, %v2886_v30 }
 0xcc6   : > { %v2895_v34 = vadd.f32 1.4214138, %v2891_v52  ;;  %v2893_v21 = vmul.f32 %v5972_v37, %v2889_v28  ;;  %v5980_v52 = vpop.eup %5979 }
 0xcc7   : > { %v2896_v35 = vadd.f32 1.4214138, %v2892_v41  ;;  %v2894_v31 = vmul.f32 %v5974_v25, %v2890_v23  ;;  %v5982_v46 = vpop.eup %5981  ;;  %v2866_v23 = vsel %vm2862_vm14, 1.0, %v6613_v20 }
 0xcc8   : > { %v2899_v39 = vmul.f32 %v5968_v16, %v2895_v34  ;;  %v2897_v29 = vadd.f32 1.4214138, %v2893_v21  ;;  %v2864_v34 = vsel %vm2860_vm12, 1.0, %v6613_v20  ;;  %v2851_v21 = vmul.f32 0.5, %v7912_v27  ;;  %v1850_v27 = vld [vmem:[#allocation17] sm:$0x3] }
 0xcc9   : > { %v2900_v40 = vmul.f32 %v5970_v14, %v2896_v35  ;;  %v2898_v17 = vadd.f32 1.4214138, %v2894_v31 }
 0xcca   : > { %v2903_v24 = vadd.f32 -0.28449672, %v2899_v39  ;;  %v2901_v45 = vmul.f32 %v5972_v37, %v2897_v29 }
 0xccb   : > { %v2904_v44 = vadd.f32 -0.28449672, %v2900_v40  ;;  %v2902_v48 = vmul.f32 %v5974_v25, %v2898_v17 }
 0xccc   : > { %v2907_v7 = vmul.f32 %v5968_v16, %v2903_v24  ;;  %v2905_v13 = vadd.f32 -0.28449672, %v2901_v45  ;;  %v2852_v24 = vmul.f32 0.5, %v7914_v43 }
 0xccd   : > { %v2908_v1 = vmul.f32 %v5970_v14, %v2904_v44  ;;  %v2906_v18 = vadd.f32 -0.28449672, %v2902_v48 }
 0xcce   : > { %v2911_v33 = vadd.f32 0.2548296, %v2907_v7  ;;  %v2909_v42 = vmul.f32 %v5972_v37, %v2905_v13  ;;  %v2960_v13 = vrot.slane %v1850_v27, %v7438_v54 }
 0xccf   : > { %v2912_v50 = vadd.f32 0.2548296, %v2908_v1  ;;  %v2910_v53 = vmul.f32 %v5974_v25, %v2906_v18 }
 0xcd0   : > { %v2915_v9 = vmul.f32 %v5968_v16, %v2911_v33  ;;  %v2913_v19 = vadd.f32 0.2548296, %v2909_v42  ;;  %v2863_v16 = vsel %vm2859_vm11, 1.0, %v6613_v20 }
 0xcd1   : > { %v2916_v47 = vmul.f32 %v5970_v14, %v2912_v50  ;;  %v2914_v26 = vadd.f32 0.2548296, %v2910_v53 }
 0xcd2   : > { %v2935_v6 = vmul.f32 %v5976_v12, %v2915_v9  ;;  %v2917_v22 = vmul.f32 %v5972_v37, %v2913_v19  ;;  %v2865_v37 = vsel %vm2861_vm13, 1.0, %v6613_v20 }
 0xcd3   : > { %v2936_v61 = vmul.f32 %v5978_v36, %v2916_v47  ;;  %v2918_v15 = vmul.f32 %v5974_v25, %v2914_v26  ;;  %v2853_v25 = vmul.f32 0.5, %v7919_v63 }
 0xcd4   : > { %v2939_v49 = vsub.f32 1.0, %v2935_v6  ;;  %v2937_v14 = vmul.f32 %v5980_v52, %v2917_v22 }
 0xcd5   : > { %v2940_v4 = vsub.f32 1.0, %v2936_v61  ;;  %v2938_v38 = vmul.f32 %v5982_v46, %v2918_v15  ;;  %v5847_v15 = vld [vmem:[%s8639_s1 + $0x64] ss:$8 sps:$4 sm:$0xff]   ;;  %v5845_v46 = vld [vmem:[%s8639_s1 + $0x60] ss:$8 sps:$4 sm:$0xff]  }
 0xcd6   : > { %v2943_v41 = vmul.f32 %v2939_v49, %v2863_v16  ;;  %v2941_v30 = vsub.f32 1.0, %v2937_v14  ;;  %v5841_v16 = vld [vmem:[%s8639_s1 + $0x44] ss:$8 sps:$4 sm:$0xff]   ;;  %v5842_v14 = vld [vmem:[%s8639_s1 + $0x50] ss:$8 sps:$4 sm:$0xff]  }
 0xcd7   : > { %v2944_v28 = vmul.f32 %v2940_v4, %v2864_v34  ;;  %v2942_v39 = vsub.f32 1.0, %v2938_v38  ;;  %v5839_v4 = vld [vmem:[%s8639_s1 + $0x40] ss:$8 sps:$4 sm:$0xff]   ;;  %3200 = vmatprep.subr.bf16.mxu1 %v5841_v16  ;;  %v5848_v34 = vld [vmem:[%s8639_s1 + $0x70] ss:$8 sps:$4 sm:$0xff]  }
 0xcd8   : > { %v2947_v35 = vadd.f32 1.0, %v2943_v41  ;;  %v2945_v62 = vmul.f32 %v2941_v30, %v2865_v37  ;;  %3201 = vmatpush1.bf16.msra.mxu1 %v5839_v4  ;;  %v5844_v41 = vld [vmem:[%s8639_s1 + $0x54] ss:$8 sps:$4 sm:$0xff]  }
 0xcd9   : > { %v2948_v32 = vadd.f32 1.0, %v2944_v28  ;;  %v2946_v58 = vmul.f32 %v2942_v39, %v2866_v23  ;;  %3202 = vmatprep.subr.bf16.mxu1 %v5844_v41  ;;  %v5850_v28 = vld [vmem:[%s8639_s1 + $0x74] ss:$8 sps:$4 sm:$0xff]   ;;  %s6614_s1 = smov [#allocation25]  }
 0xcda   : > { %v2949_v40 = vadd.f32 1.0, %v2945_v62  ;;  %v2951_v29 = vmul.f32 %v2947_v35, %v2851_v21  ;;  %v6075_v21 = vld [vmem:[#allocation8] sm:$0x3]  ;;  %v8021_v16 = vld [vmem:[%s8642_s27 + $0x10] sm:$0xff]  ;;  %s6495_s3 = sshll.u32 %s6614_s1, 4  ;;  %s6496_s3 = int_to_ptr.vmem [resolvable:$false] %s6495_s3 }
 0xcdb   : > { %v2950_v44 = vadd.f32 1.0, %v2946_v58  ;;  %v2952_v7 = vmul.f32 %v2948_v32, %v2852_v24  ;;  %v3129_v23 = vrot.slane %v6075_v21, %v7444_v56  ;;  %p6498_p8 = scmp.lt.s32.totalorder %s8465_s28, %s6496_s3 }
 0xcdc   : > { %v2953_v31 = vmul.f32 %v2949_v40, %v2853_v25  ;;  %3203 = vmatpush1.bf16.msra.mxu1 %v5842_v14  ;;  %v8035_v14 = vld [vmem:[%s8642_s27 + $0x20] sm:$0xff] }
 0xcdd   : > { %v2954_v17 = vmul.f32 %v2950_v44, %v2854_v0  ;;  %3204 = vmatprep.subr.bf16.mxu1 %v5847_v15 }
 0xcde   : > { %v2955_v45 = vpack.c.bf16 %v2953_v31, %v2951_v29  ;;  %v6076_v29 = vld [vmem:[#allocation10] sm:$0x3] }
 0xcdf   : > { %v2956_v1 = vpack.c.bf16 %v2954_v17, %v2952_v7  ;;  %v3135_v31 = vrot.slane %v6076_v29, %v7444_v56  ;;  %v3145_v17 = vsub.s32 3, %v7429_v51  ;;  %v8099_v29 = vld [vmem:[%s8642_s27 + $0x68] sm:$0xff] }
 0xce0   : > { %3205 = vmatpush1.bf16.msra.mxu1 %v5845_v46  ;;  %v8043_v46 = vld [vmem:[%s8642_s27 + $0x28] sm:$0xff] }
 0xce1   : > { %3089 = vmatprep.mubr.bf16.mxu0 %v2956_v1  ;;  %3206 = vmatprep.subr.bf16.mxu1 %v5850_v28  ;;  %v6077_v1 = vld [vmem:[%s8641_s15] sm:$0xf]  ;;  %v8049_v28 = vld [vmem:[%s8642_s27 + $0x30] sm:$0xff] }
 0xce2   : > { %3090 = vmatmul.mubr.bf16.vlgmr.msra.gmra.mrb[36].mxu0 %v2955_v45  ;;  %v3142_v27 = vrot.slane %v6077_v1, %v7444_v56 }
 0xce4   : > { %3207 = vmatpush1.bf16.msra.mxu1 %v5848_v34 }
 0xdb5   : > { %v5019_v33 = vpop.f32.mrb[36].mxu0 }
 0xdb6   : > { %v5020_v63 = vpop.f32.mrb[37].mxu0 }
 0xdb7   : > { %v5021_v48 = vadd.f32 %v5020_v63, %v5019_v33  ;;  %v5022_v50 = vpop.f32.mrb[38].mxu0  ;;  %v3146_v33 = vrot.slane %v6077_v1, %v3145_v17 }
 0xdb8   : > { %v5023_v9 = vpop.f32.mrb[39].mxu0 }
 0xdb9   : > { %v3092_v43 = vadd.f32 %v5021_v48, %v2960_v13  ;;  %v5024_v42 = vadd.f32 %v5023_v9, %v5022_v50  ;;  %v3156_v48 = vrot.slane %v3146_v33, %v7444_v56 }
 0xdbb   : > { %v7950_v18 = vadd.f32 %v3092_v43, %v7815_v10  ;;  %v3095_v59 = vadd.f32 %v5024_v42, %v2960_v13  ;;  %v3152_v13 = vrot.slane %v3142_v27, %v7444_v56 }
 0xdbd   : > { %v7953_v12 = vadd.f32 %v3095_v59, %v7818_v57  ;;  %v3100_v47 = vsel %vm1851_vm7, %v7950_v18, 0.0 }
 0xdbe   : > { %3101 = vadd.xlane.f32.xlu1 %v3100_v47  ;;  %v8002_v47 = vld [vmem:[%s8642_s27] sm:$0xff] }
 0xdbf   : > { %v3103_v36 = vsel %vm1851_vm7, %v7953_v12, 0.0 }
 0xdc0   : > { %3104 = vadd.xlane.f32.xlu0 %v3103_v36 }
 0xe4b   : > { %v3102_v6 = vpop.xlane.xlu1 %3101 }
 0xe4c   : > { %v3106_v19 = vmul.f32 0.015625, %v3102_v6 }
 0xe4d   : > { %v3105_v53 = vpop.xlane.xlu0 %3104 }
 0xe4e   : > { %v3108_v61 = vsub.f32 %v7950_v18, %v3106_v19  ;;  %v3107_v49 = vmul.f32 0.015625, %v3105_v53 }
 0xe50   : > { %v3109_v10 = vsub.f32 %v7953_v12, %v3107_v49  ;;  %v3110_v22 = vmul.f32 %v3108_v61, %v3108_v61 }
 0xe52   : > { %v3112_v57 = vsel %vm1851_vm7, %v3110_v22, 0.0  ;;  %v3111_v26 = vmul.f32 %v3109_v10, %v3109_v10 }
 0xe53   : > { %3113 = vadd.xlane.f32.xlu1 %v3112_v57 }
 0xe54   : > { %v3115_v52 = vsel %vm1851_vm7, %v3111_v26, 0.0  ;;  %v8015_v26 = vld [vmem:[%s8642_s27 + $0x8] sm:$0xff] }
 0xe55   : > { %3116 = vadd.xlane.f32.xlu0 %v3115_v52 }
 0xee0   : > { %v3114_v30 = vpop.xlane.xlu1 %3113 }
 0xee1   : > { %v3118_v38 = vmul.f32 0.015625, %v3114_v30 }
 0xee2   : > { %v3117_v37 = vpop.xlane.xlu0 %3116 }
 0xee3   : > { %v3120_v35 = vadd.f32 1e-06, %v3118_v38  ;;  %v3119_v62 = vmul.f32 0.015625, %v3117_v37  ;;  %v8057_v38 = vld [vmem:[%s8642_s27 + $0x38] sm:$0xff] }
 0xee5   : > { %5983 = vrsqrt.f32 %v3120_v35  ;;  %v3121_v39 = vadd.f32 1e-06, %v3119_v62  ;;  %v8063_v35 = vld [vmem:[%s8642_s27 + $0x40] sm:$0xff] }
 0xee7   : > { %5985 = vrsqrt.f32 %v3121_v39  ;;  %v8071_v39 = vld [vmem:[%s8642_s27 + $0x48] sm:$0xff] }
 0xeef   : > { %v5984_v32 = vpop.eup %5983 }
 0xef0   : > { %v3124_v25 = vmul.f32 %v5984_v32, %v3108_v61 }
 0xef1   : > { %v5986_v40 = vpop.eup %5985 }
 0xef2   : > { %v3130_v58 = vmul.f32 %v3129_v23, %v3124_v25  ;;  %v3125_v24 = vmul.f32 %v5986_v40, %v3109_v10  ;;  %v8085_v25 = vld [vmem:[%s8642_s27 + $0x58] sm:$0xff] }
 0xef4   : > { %v3131_v0 = vmul.f32 %v3129_v23, %v3125_v24  ;;  %v3136_v44 = vadd.f32 %v3135_v31, %v3130_v58  ;;  %v8077_v23 = vld [vmem:[%s8642_s27 + $0x50] sm:$0xff]  ;;  %v8091_v58 = vld [vmem:[%s8642_s27 + $0x60] sm:$0xff] }
 0xef6   : > { %v3137_v7 = vadd.f32 %v3135_v31, %v3131_v0  ;;  %v8105_v0 = vld [vmem:[%s8642_s27 + $0x70] sm:$0xff] }
 0xef8   : > { %v3138_v45 = vpack.c.bf16 %v3137_v7, %v3136_v44  ;;  %v8113_v7 = vld [vmem:[%s8642_s27 + $0x78] sm:$0xff] }
 0xefa   : > { %4857 = vmatmul.mubr.msk.bf16.vlgmr.msra.gmra.mrb[28].mxu1 %vm1851_vm7, %v3138_v45 }
 0xfcd   : > { %v3234_v63 = vpop.f32.mrb[28].mxu1 }
 0xfce   : > { %v3235_v50 = vadd.f32 %v3234_v63, %v3152_v13  ;;  %v3236_v9 = vpop.f32.mrb[29].mxu1 }
 0xfcf   : > { %v3238_v43 = vpop.f32.mrb[30].mxu1  ;;  %v3237_v6 = vadd.f32 %v3236_v9, %v3156_v48 }
 0xfd0   : > { %v3239_v42 = vadd.f32 %v3238_v43, %v3152_v13  ;;  %v3240_v59 = vpop.f32.mrb[31].mxu1  ;;  %v3243_v36 = vmul.f32 %v8002_v47, %v3235_v50  ;;  %v3245_v4 = vmul.f32 %v8021_v16, %v3235_v50  ;;  %v3247_v15 = vmul.f32 %v8035_v14, %v3235_v50 }
 0xfd1   : > { %v3241_v19 = vadd.f32 %v3240_v59, %v3156_v48  ;;  %v3249_v30 = vmul.f32 %v8049_v28, %v3235_v50  ;;  %v3251_v62 = vmul.f32 %v8063_v35, %v3235_v50  ;;  %v3253_v32 = vmul.f32 %v8077_v23, %v3235_v50 }
 0xfd2   : > { %5160 = vmatprep.mubr.msk.f32.mxu1 %vm1851_vm7, %v3243_v36  ;;  %v5678_v53 = vpack.i.bf16 %v3239_v42, %v3235_v50  ;;  %v3244_v52 = vmul.f32 %v8015_v26, %v3239_v42  ;;  %v3246_v41 = vmul.f32 %v8029_v55, %v3239_v42  ;;  %v3248_v34 = vmul.f32 %v8043_v46, %v3239_v42 }
 0xfd3   : > { %v5390_v61 = vpack.c.bf16 %v3241_v19, %v3237_v6  ;;  %v3250_v37 = vmul.f32 %v8057_v38, %v3239_v42  ;;  %v3252_v21 = vmul.f32 %v8071_v39, %v3239_v42  ;;  %v3254_v40 = vmul.f32 %v8085_v25, %v3239_v42 }
 0xfd4   : > { %5679 = vrot.lane.b32.xlu1 %v5678_v53, %s8650_s29  ;;  %v3255_v24 = vmul.f32 %v8091_v58, %v3235_v50  ;;  %v3256_v31 = vmul.f32 %v8099_v29, %v3239_v42  ;;  %v3257_v44 = vmul.f32 %v8105_v0, %v3235_v50  ;;  %v3258_v45 = vmul.f32 %v8113_v7, %v3239_v42  ;;  %s8653_s29 = sld [smem:[#allocation60_spill]] }
 0xfd5   : > { %5391 = vmatprep.subr.bf16.mxu0 %v5390_v61 }
 0xfd6   : > { %5393 = vmatpush3.bf16.msra.mxu0 %v5390_v61 }
 0xfda   : > { %s8654_s0 = smov %s8653_s29  ;;  %s8472_s2 = scalar_lea.hbm %s8653_s29, %s4939_s25 }
0x1046   : > { %v5680_v49 = vpop.permute.xlu1 %5679 }
0x1047   : > { %v5682_v10 = vunpack.i.h.bf16 %v5680_v49  ;;  %v5681_v22 = vunpack.i.l.bf16 %v5680_v49 }
0x1049   : > { %v5384_v57 = vpack.c.bf16 %v5682_v10, %v5681_v22 }
0x104b   : > { %5386 = vmatprep.subr.msk.bf16.mxu1 %vm7492_vm8, %v5384_v57 }
0x104c   : > { %5389 = vmatpush3.bf16.xpose.msk.msra.mxu1 %vm7492_vm8, %v5384_v57 }
0x104d   : > { %5212 = vmatprep.subr.bf16.mxu1 %v6609_v8 }
0x1053   : > { %5161 = vmatmul.mubr.msk.f32.vlgmr.msra.gmra.mrb[32].mxu1 %vm1851_vm7, %v3244_v52 }
0x1054   : > { %5163 = vmatprep.mubr.msk.f32.mxu1 %vm1851_vm7, %v3245_v4 }
0x1057   : > { %5164 = vmatmul.mubr.msk.f32.gmra.mrb[34].mxu1 %vm1851_vm7, %v3246_v41 }
0x1058   : > { %5166 = vmatprep.mubr.msk.f32.mxu1 %vm1851_vm7, %v3247_v15 }
0x105b   : > { %5167 = vmatmul.mubr.msk.f32.gmra.mrb[36].mxu1 %vm1851_vm7, %v3248_v34 }
0x105c   : > { %5169 = vmatprep.mubr.msk.f32.mxu1 %vm1851_vm7, %v3249_v30 }
0x105f   : > { %5170 = vmatmul.mubr.msk.f32.gmra.mrb[38].mxu1 %vm1851_vm7, %v3250_v37 }
0x1060   : > { %5172 = vmatprep.mubr.msk.f32.mxu1 %vm1851_vm7, %v3251_v62 }
0x1063   : > { %5173 = vmatmul.mubr.msk.f32.gmra.mrb[40].mxu1 %vm1851_vm7, %v3252_v21 }
0x1064   : > { %5175 = vmatprep.mubr.msk.f32.mxu1 %vm1851_vm7, %v3253_v32 }
0x1067   : > { %5176 = vmatmul.mubr.msk.f32.gmra.mrb[42].mxu1 %vm1851_vm7, %v3254_v40 }
0x1068   : > { %5178 = vmatprep.mubr.msk.f32.mxu1 %vm1851_vm7, %v3255_v24 }
0x106b   : > { %5179 = vmatmul.mubr.msk.f32.gmra.mrb[44].mxu1 %vm1851_vm7, %v3256_v31 }
0x106c   : > { %5181 = vmatprep.mubr.msk.f32.mxu1 %vm1851_vm7, %v3257_v44 }
0x106f   : > { %5182 = vmatmul.mubr.msk.f32.gmra.mrb[46].mxu1 %vm1851_vm7, %v3258_v45 }
0x1070   : > { %5220 = vmatprep.mubr.msk.bf16.mxu1 %vm6612_vm10, %v6609_v8 }
0x1126   : > { %v5162_v1 = vpop.f32.mrb[32].mxu1 }
0x1127   : > { %v8119_v27 = vmul.f32 0.35355338, %v5162_v1  ;;  %v3383_v33 = vpop.f32.mrb[33].mxu1 }
0x1128   : > { %v8121_v13 = vmul.f32 0.35355338, %v3383_v33 }
0x1129   : > { %v3481_v63 = vsel %vm2232_vm9, %v8119_v27, -inf }
0x112a   : > { %3482 = vmax.xlane.f32.xlu0 %v3481_v63  ;;  %v5165_v48 = vpop.f32.mrb[34].mxu1  ;;  %v3478_v43 = vsel %vm2232_vm9, %v8121_v13, -inf }
0x112b   : > { %v3393_v50 = vpop.f32.mrb[35].mxu1  ;;  %v8125_v9 = vmul.f32 0.35355338, %v5165_v48 }
0x112c   : > { %v8131_v6 = vmul.f32 0.35355338, %v3393_v50 }
0x112d   : > { %v3487_v19 = vsel %vm2232_vm9, %v8125_v9, -inf }
0x112e   : > { %3479 = vmax.xlane.f32.xlu0 %v3478_v43  ;;  %v5168_v42 = vpop.f32.mrb[36].mxu1  ;;  %v3484_v22 = vsel %vm2232_vm9, %v8131_v6, -inf }
0x112f   : > { %v3403_v59 = vpop.f32.mrb[37].mxu1  ;;  %v8137_v10 = vmul.f32 0.35355338, %v5168_v42 }
0x1130   : > { %v8129_v36 = vmul.f32 0.35355338, %v3403_v59 }
0x1131   : > { %v3493_v41 = vsel %vm2232_vm9, %v8137_v10, -inf }
0x1132   : > { %3488 = vmax.xlane.f32.xlu0 %v3487_v19  ;;  %v5171_v53 = vpop.f32.mrb[38].mxu1  ;;  %v3490_v61 = vsel %vm2232_vm9, %v8129_v36, -inf }
0x1133   : > { %3491 = vmax.xlane.f32.xlu1 %v3490_v61  ;;  %v3413_v49 = vpop.f32.mrb[39].mxu1  ;;  %v8141_v4 = vmul.f32 0.35355338, %v5171_v53 }
0x1134   : > { %v8145_v30 = vmul.f32 0.35355338, %v3413_v49 }
0x1135   : > { %v3499_v37 = vsel %vm2232_vm9, %v8141_v4, -inf }
0x1136   : > { %3485 = vmax.xlane.f32.xlu0 %v3484_v22  ;;  %v5174_v57 = vpop.f32.mrb[40].mxu1  ;;  %v3496_v40 = vsel %vm2232_vm9, %v8145_v30, -inf }
0x1137   : > { %v3423_v52 = vpop.f32.mrb[41].mxu1  ;;  %v8149_v32 = vmul.f32 0.35355338, %v5174_v57 }
0x1138   : > { %v8155_v45 = vmul.f32 0.35355338, %v3423_v52 }
0x1139   : > { %v3505_v1 = vsel %vm2232_vm9, %v8149_v32, -inf }
0x113a   : > { %3494 = vmax.xlane.f32.xlu0 %v3493_v41  ;;  %v5177_v15 = vpop.f32.mrb[42].mxu1  ;;  %v3502_v48 = vsel %vm2232_vm9, %v8155_v45, -inf }
0x113b   : > { %v3433_v34 = vpop.f32.mrb[43].mxu1  ;;  %v8161_v63 = vmul.f32 0.35355338, %v5177_v15 }
0x113c   : > { %v8165_v50 = vmul.f32 0.35355338, %v3433_v34 }
0x113d   : > { %v3511_v43 = vsel %vm2232_vm9, %v8161_v63, -inf }
0x113e   : > { %3500 = vmax.xlane.f32.xlu0 %v3499_v37  ;;  %v5180_v62 = vpop.f32.mrb[44].mxu1  ;;  %v3508_v59 = vsel %vm2232_vm9, %v8165_v50, -inf }
0x113f   : > { %v3443_v21 = vpop.f32.mrb[45].mxu1  ;;  %v8173_v19 = vmul.f32 0.35355338, %v5180_v62 }
0x1140   : > { %v8169_v42 = vmul.f32 0.35355338, %v3443_v21 }
0x1141   : > { %v3517_v49 = vsel %vm2232_vm9, %v8173_v19, -inf }
0x1142   : > { %3497 = vmax.xlane.f32.xlu0 %v3496_v40  ;;  %v5183_v24 = vpop.f32.mrb[46].mxu1  ;;  %v3514_v53 = vsel %vm2232_vm9, %v8169_v42, -inf }
0x1143   : > { %v3453_v31 = vpop.f32.mrb[47].mxu1  ;;  %v8177_v61 = vmul.f32 0.35355338, %v5183_v24 }
0x1144   : > { %v8153_v44 = vmul.f32 0.35355338, %v3453_v31 }
0x1145   : > { %v3523_v22 = vsel %vm2232_vm9, %v8177_v61, -inf }
0x1146   : > { %3506 = vmax.xlane.f32.xlu0 %v3505_v1  ;;  %v3520_v33 = vsel %vm2232_vm9, %v8153_v44, -inf }
0x1147   : > { %3521 = vmax.xlane.f32.xlu1 %v3520_v33 }
0x114a   : > { %3503 = vmax.xlane.f32.xlu0 %v3502_v48 }
0x114e   : > { %3512 = vmax.xlane.f32.xlu0 %v3511_v43 }
0x1152   : > { %3509 = vmax.xlane.f32.xlu0 %v3508_v59 }
0x1156   : > { %3515 = vmax.xlane.f32.xlu0 %v3514_v53 }
0x115a   : > { %3518 = vmax.xlane.f32.xlu0 %v3517_v49 }
0x115e   : > { %3524 = vmax.xlane.f32.xlu0 %v3523_v22 }
0x11b7   : > { %v3483_v57 = vpop.xlane.xlu0 %3482 }
0x11b8   : > { %v3527_v52 = vsub.f32 %v8119_v27, %v3483_v57 }
0x11ba   : > { %v3544_v41 = vmul.f32 1.442695, %v3527_v52 }
0x11bb   : > { %v3480_v15 = vpop.xlane.xlu0 %3479 }
0x11bc   : > { %5987 = vpow2.f32 %v3544_v41  ;;  %v3526_v34 = vsub.f32 %v8121_v13, %v3480_v15 }
0x11be   : > { %v3542_v37 = vmul.f32 1.442695, %v3526_v34 }
0x11bf   : > { %v3489_v62 = vpop.xlane.xlu0 %3488 }
0x11c0   : > { %5989 = vpow2.f32 %v3542_v37  ;;  %v3529_v21 = vsub.f32 %v8125_v9, %v3489_v62  ;;  %v3492_v40 = vpop.xlane.xlu1 %3491 }
0x11c1   : > { %v3530_v31 = vsub.f32 %v8129_v36, %v3492_v40 }
0x11c2   : > { %v3548_v24 = vmul.f32 1.442695, %v3529_v21 }
0x11c3   : > { %v3486_v1 = vpop.xlane.xlu0 %3485  ;;  %v3550_v27 = vmul.f32 1.442695, %v3530_v31 }
0x11c4   : > { %5991 = vpow2.f32 %v3548_v24  ;;  %v3528_v33 = vsub.f32 %v8131_v6, %v3486_v1 }
0x11c6   : > { %v8188_v48 = vpop.eup %5987  ;;  %v3546_v43 = vmul.f32 1.442695, %v3528_v33 }
0x11c7   : > { %v3495_v59 = vpop.xlane.xlu0 %3494  ;;  %v3577_v13 = vsel %vm2232_vm9, %v8188_v48, 0.0 }
0x11c8   : > { %5993 = vpow2.f32 %v3546_v43  ;;  %v3531_v53 = vsub.f32 %v8137_v10, %v3495_v59  ;;  %3578 = vadd.xlane.f32.xlu0 %v3577_v13 }
0x11c9   : > { %5995 = vpow2.f32 %v3550_v27 }
0x11ca   : > { %v8193_v9 = vpop.eup %5989  ;;  %v3552_v36 = vmul.f32 1.442695, %v3531_v53 }
0x11cb   : > { %v3501_v49 = vpop.xlane.xlu0 %3500  ;;  %v3574_v6 = vsel %vm2232_vm9, %v8193_v9, 0.0 }
0x11cc   : > { %5997 = vpow2.f32 %v3552_v36  ;;  %v3533_v22 = vsub.f32 %v8141_v4, %v3501_v49  ;;  %3575 = vadd.xlane.f32.xlu1 %v3574_v6 }
0x11ce   : > { %v8198_v57 = vpop.eup %5991  ;;  %v3556_v52 = vmul.f32 1.442695, %v3533_v22 }
0x11cf   : > { %v3498_v41 = vpop.xlane.xlu0 %3497  ;;  %v3583_v10 = vsel %vm2232_vm9, %v8198_v57, 0.0 }
0x11d0   : > { %5999 = vpow2.f32 %v3556_v52  ;;  %v3532_v15 = vsub.f32 %v8145_v30, %v3498_v41  ;;  %3584 = vadd.xlane.f32.xlu0 %v3583_v10 }
0x11d2   : > { %v8203_v34 = vpop.eup %5993  ;;  %v3554_v37 = vmul.f32 1.442695, %v3532_v15 }
0x11d3   : > { %v3507_v62 = vpop.xlane.xlu0 %3506  ;;  %v3580_v21 = vsel %vm2232_vm9, %v8203_v34, 0.0  ;;  %v8207_v4 = vpop.eup %5995 }
0x11d4   : > { %6001 = vpow2.f32 %v3554_v37  ;;  %v3535_v40 = vsub.f32 %v8149_v32, %v3507_v62  ;;  %3581 = vadd.xlane.f32.xlu1 %v3580_v21  ;;  %v3586_v33 = vsel %vm2232_vm9, %v8207_v4, 0.0  ;;  %v3522_v6 = vpop.xlane.xlu1 %3521 }
0x11d5   : > { %v3540_v10 = vsub.f32 %v8153_v44, %v3522_v6 }
0x11d6   : > { %v8210_v24 = vpop.eup %5997  ;;  %v3560_v31 = vmul.f32 1.442695, %v3535_v40 }
0x11d7   : > { %v3504_v1 = vpop.xlane.xlu0 %3503  ;;  %v3589_v30 = vsel %vm2232_vm9, %v8210_v24, 0.0  ;;  %v3570_v40 = vmul.f32 1.442695, %v3540_v10 }
0x11d8   : > { %6003 = vpow2.f32 %v3560_v31  ;;  %v3534_v27 = vsub.f32 %v8155_v45, %v3504_v1  ;;  %3590 = vadd.xlane.f32.xlu0 %v3589_v30  ;;  %3587 = vadd.xlane.f32.xlu1 %v3586_v33 }
0x11da   : > { %v8217_v43 = vpop.eup %5999  ;;  %v3558_v59 = vmul.f32 1.442695, %v3534_v27 }
0x11db   : > { %v3513_v32 = vpop.xlane.xlu0 %3512  ;;  %v3595_v13 = vsel %vm2232_vm9, %v8217_v43, 0.0 }
0x11dc   : > { %6005 = vpow2.f32 %v3558_v59  ;;  %v3537_v53 = vsub.f32 %v8161_v63, %v3513_v32  ;;  %3596 = vadd.xlane.f32.xlu0 %v3595_v13 }
0x11de   : > { %v8222_v36 = vpop.eup %6001  ;;  %v3564_v49 = vmul.f32 1.442695, %v3537_v53 }
0x11df   : > { %v3510_v22 = vpop.xlane.xlu0 %3509  ;;  %v3592_v45 = vsel %vm2232_vm9, %v8222_v36, 0.0 }
0x11e0   : > { %6007 = vpow2.f32 %v3564_v49  ;;  %v3536_v52 = vsub.f32 %v8165_v50, %v3510_v22  ;;  %3593 = vadd.xlane.f32.xlu1 %v3592_v45 }
0x11e2   : > { %v8227_v41 = vpop.eup %6003  ;;  %v3562_v15 = vmul.f32 1.442695, %v3536_v52 }
0x11e3   : > { %v3516_v37 = vpop.xlane.xlu0 %3515  ;;  %v3601_v63 = vsel %vm2232_vm9, %v8227_v41, 0.0 }
0x11e4   : > { %6009 = vpow2.f32 %v3562_v15  ;;  %v3538_v62 = vsub.f32 %v8169_v42, %v3516_v37  ;;  %3602 = vadd.xlane.f32.xlu0 %v3601_v63 }
0x11e6   : > { %v8233_v21 = vpop.eup %6005  ;;  %v3566_v31 = vmul.f32 1.442695, %v3538_v62 }
0x11e7   : > { %v3519_v1 = vpop.xlane.xlu0 %3518  ;;  %v3598_v50 = vsel %vm2232_vm9, %v8233_v21, 0.0 }
0x11e8   : > { %6011 = vpow2.f32 %v3566_v31  ;;  %v3539_v44 = vsub.f32 %v8173_v19, %v3519_v1  ;;  %3599 = vadd.xlane.f32.xlu1 %v3598_v50 }
0x11e9   : > { %6013 = vpow2.f32 %v3570_v40 }
0x11ea   : > { %v8238_v30 = vpop.eup %6007  ;;  %v3568_v33 = vmul.f32 1.442695, %v3539_v44 }
0x11eb   : > { %v3525_v27 = vpop.xlane.xlu0 %3524  ;;  %v3607_v42 = vsel %vm2232_vm9, %v8238_v30, 0.0 }
0x11ec   : > { %6015 = vpow2.f32 %v3568_v33  ;;  %v3541_v59 = vsub.f32 %v8177_v61, %v3525_v27  ;;  %3608 = vadd.xlane.f32.xlu0 %v3607_v42 }
0x11ee   : > { %v8243_v32 = vpop.eup %6009  ;;  %v3572_v13 = vmul.f32 1.442695, %v3541_v59 }
0x11ef   : > { %v3604_v53 = vsel %vm2232_vm9, %v8243_v32, 0.0 }
0x11f0   : > { %6017 = vpow2.f32 %v3572_v13  ;;  %3605 = vadd.xlane.f32.xlu1 %v3604_v53 }
0x11f2   : > { %v8247_v19 = vpop.eup %6011 }
0x11f3   : > { %v3610_v49 = vsel %vm2232_vm9, %v8247_v19, 0.0  ;;  %v8251_v6 = vpop.eup %6013 }
0x11f4   : > { %3611 = vadd.xlane.f32.xlu1 %v3610_v49  ;;  %v3616_v45 = vsel %vm2232_vm9, %v8251_v6, 0.0 }
0x11f6   : > { %v8253_v22 = vpop.eup %6015 }
0x11f7   : > { %v3613_v61 = vsel %vm2232_vm9, %v8253_v22, 0.0 }
0x11f8   : > { %3614 = vadd.xlane.f32.xlu0 %v3613_v61  ;;  %3617 = vadd.xlane.f32.xlu1 %v3616_v45 }
0x11fa   : > { %v8259_v52 = vpop.eup %6017 }
0x11fb   : > { %v3619_v10 = vsel %vm2232_vm9, %v8259_v52, 0.0 }
0x11fc   : > { %3620 = vadd.xlane.f32.xlu0 %v3619_v10 }
0x1255   : > { %v3579_v15 = vpop.xlane.xlu0 %3578 }
0x1256   : > { %6019 = vrcp.f32 %v3579_v15 }
0x1259   : > { %v3576_v37 = vpop.xlane.xlu1 %3575 }
0x125a   : > { %6021 = vrcp.f32 %v3576_v37 }
0x125d   : > { %v3585_v63 = vpop.xlane.xlu0 %3584 }
0x125e   : > { %6023 = vrcp.f32 %v3585_v63 }
0x1260   : > { %v6020_v40 = vpop.eup %6019 }
0x1261   : > { %v3582_v62 = vpop.xlane.xlu1 %3581  ;;  %v3639_v33 = vmul.f32 %v6020_v40, %v8188_v48 }
0x1262   : > { %6025 = vrcp.f32 %v3582_v62 }
0x1264   : > { %v6022_v31 = vpop.eup %6021 }
0x1265   : > { %v3591_v1 = vpop.xlane.xlu0 %3590  ;;  %v3588_v50 = vpop.xlane.xlu1 %3587  ;;  %v3638_v44 = vmul.f32 %v6022_v31, %v8193_v9 }
0x1266   : > { %6027 = vrcp.f32 %v3591_v1 }
0x1267   : > { %6029 = vrcp.f32 %v3588_v50  ;;  %5188 = vmatprep.mubr.msk.f32.mxu0 %vm2232_vm9, %v3638_v44 }
0x1268   : > { %5189 = vmatmul.mubr.msk.f32.vlgmr.msra.gmra.mrb[40].mxu0 %vm2232_vm9, %v3639_v33  ;;  %v6024_v42 = vpop.eup %6023 }
0x1269   : > { %v3597_v27 = vpop.xlane.xlu0 %3596  ;;  %v3641_v49 = vmul.f32 %v6024_v42, %v8198_v57 }
0x126a   : > { %6031 = vrcp.f32 %v3597_v27 }
0x126c   : > { %v6026_v59 = vpop.eup %6025 }
0x126d   : > { %v3594_v13 = vpop.xlane.xlu1 %3593  ;;  %v3640_v53 = vmul.f32 %v6026_v59, %v8203_v34 }
0x126e   : > { %6033 = vrcp.f32 %v3594_v13 }
0x126f   : > { %5191 = vmatprep.mubr.msk.f32.mxu0 %vm2232_vm9, %v3640_v53 }
0x1270   : > { %v6028_v9 = vpop.eup %6027  ;;  %5192 = vmatmul.mubr.msk.f32.gmra.mrb[42].mxu0 %vm2232_vm9, %v3641_v49 }
0x1271   : > { %v6030_v48 = vpop.eup %6029  ;;  %v3643_v61 = vmul.f32 %v6028_v9, %v8210_v24  ;;  %v3603_v45 = vpop.xlane.xlu0 %3602 }
0x1272   : > { %v3642_v10 = vmul.f32 %v6030_v48, %v8207_v4  ;;  %6035 = vrcp.f32 %v3603_v45  ;;  %v5852_v48 = vld [vmem:[#allocation11 + $0x28] sm:$0xff]  }
0x1274   : > { %5194 = vmatprep.mubr.msk.f32.mxu0 %vm2232_vm9, %v3642_v10  ;;  %v6032_v15 = vpop.eup %6031 }
0x1275   : > { %5195 = vmatmul.mubr.msk.f32.gmra.mrb[44].mxu0 %vm2232_vm9, %v3643_v61  ;;  %v3600_v34 = vpop.xlane.xlu1 %3599  ;;  %v3645_v62 = vmul.f32 %v6032_v15, %v8217_v43 }
0x1276   : > { %6037 = vrcp.f32 %v3600_v34 }
0x1278   : > { %v6034_v57 = vpop.eup %6033 }
0x1279   : > { %v3644_v37 = vmul.f32 %v6034_v57, %v8222_v36  ;;  %v3609_v63 = vpop.xlane.xlu0 %3608 }
0x127a   : > { %6039 = vrcp.f32 %v3609_v63 }
0x127b   : > { %5197 = vmatprep.mubr.msk.f32.mxu0 %vm2232_vm9, %v3644_v37 }
0x127c   : > { %5198 = vmatmul.mubr.msk.f32.gmra.mrb[46].mxu0 %vm2232_vm9, %v3645_v62  ;;  %v6036_v24 = vpop.eup %6035 }
0x127d   : > { %v3606_v4 = vpop.xlane.xlu1 %3605  ;;  %v3647_v50 = vmul.f32 %v6036_v24, %v8227_v41 }
0x127e   : > { %6041 = vrcp.f32 %v3606_v4 }
0x1280   : > { %v6038_v40 = vpop.eup %6037 }
0x1281   : > { %v3612_v31 = vpop.xlane.xlu1 %3611  ;;  %v3646_v1 = vmul.f32 %v6038_v40, %v8233_v21 }
0x1282   : > { %6043 = vrcp.f32 %v3612_v31 }
0x1283   : > { %5200 = vmatprep.mubr.msk.f32.mxu0 %vm2232_vm9, %v3646_v1 }
0x1284   : > { %5201 = vmatmul.mubr.msk.f32.gmra.mrb[48].mxu0 %vm2232_vm9, %v3647_v50  ;;  %v6040_v44 = vpop.eup %6039 }
0x1285   : > { %v3615_v43 = vpop.xlane.xlu0 %3614  ;;  %v3618_v36 = vpop.xlane.xlu1 %3617  ;;  %v3649_v59 = vmul.f32 %v6040_v44, %v8238_v30 }
0x1286   : > { %6045 = vrcp.f32 %v3615_v43 }
0x1287   : > { %6047 = vrcp.f32 %v3618_v36 }
0x1288   : > { %v6042_v33 = vpop.eup %6041 }
0x1289   : > { %v3621_v27 = vpop.xlane.xlu0 %3620  ;;  %v3648_v42 = vmul.f32 %v6042_v33, %v8243_v32 }
0x128a   : > { %6049 = vrcp.f32 %v3621_v27 }
0x128b   : > { %5203 = vmatprep.mubr.msk.f32.mxu0 %vm2232_vm9, %v3648_v42 }
0x128c   : > { %v6044_v21 = vpop.eup %6043  ;;  %5204 = vmatmul.mubr.msk.f32.gmra.mrb[50].mxu0 %vm2232_vm9, %v3649_v59 }
0x128d   : > { %v3650_v41 = vmul.f32 %v6044_v21, %v8247_v19  ;;  %v5851_v19 = vld [vmem:[#allocation11 + $0x20] sm:$0xff]  }
0x128e   : > { %5213 = vmatpush3.bf16.msra.mxu1 %v5851_v19 }
0x128f   : > { %5206 = vmatprep.mubr.msk.f32.mxu0 %vm2232_vm9, %v3650_v41  ;;  %5214 = vmatprep.subr.bf16.mxu1 %v6609_v8 }
0x1290   : > { %v6046_v13 = vpop.eup %6045 }
0x1291   : > { %v6048_v53 = vpop.eup %6047  ;;  %v3651_v49 = vmul.f32 %v6046_v13, %v8253_v22  ;;  %v5854_v22 = vld [vmem:[#allocation11 + $0x38] sm:$0xff]  }
0x1292   : > { %v3652_v9 = vmul.f32 %v6048_v53, %v8251_v6  ;;  %5215 = vmatpush3.bf16.msra.mxu1 %v5852_v48  ;;  %v5853_v6 = vld [vmem:[#allocation11 + $0x30] sm:$0xff]  }
0x1293   : > { %5207 = vmatmul.mubr.msk.f32.gmra.mrb[52].mxu0 %vm2232_vm9, %v3651_v49  ;;  %5216 = vmatprep.subr.bf16.mxu1 %v6609_v8 }
0x1294   : > { %v6050_v32 = vpop.eup %6049  ;;  %5209 = vmatprep.mubr.msk.f32.mxu0 %vm2232_vm9, %v3652_v9 }
0x1295   : > { %v3653_v30 = vmul.f32 %v6050_v32, %v8259_v52 }
0x1296   : > { %5217 = vmatpush3.bf16.msra.mxu1 %v5853_v6 }
0x1297   : > { %5210 = vmatmul.mubr.msk.f32.gmra.mrb[54].mxu0 %vm2232_vm9, %v3653_v30  ;;  %5218 = vmatprep.subr.bf16.mxu1 %v6609_v8 }
0x1298   : > { %4084 = vmatprep.mubr.bf16.mxu0 %v6610_v60 }
0x129a   : > { %5219 = vmatpush3.bf16.msra.mxu1 %v5854_v22 }
0x133b   : > { %v5190_v61 = vpop.f32.mrb[40].mxu0 }
0x133c   : > { %v3768_v52 = vpop.f32.mrb[41].mxu0  ;;  %v3848_v10 = vmul.f32 %v8015_v26, %v5190_v61 }
0x133d   : > { %v3847_v57 = vmul.f32 %v8002_v47, %v3768_v52 }
0x1343   : > { %v5193_v45 = vpop.f32.mrb[42].mxu0 }
0x1344   : > { %v3850_v34 = vmul.f32 %v8029_v55, %v5193_v45  ;;  %v3778_v15 = vpop.f32.mrb[43].mxu0 }
0x1345   : > { %v3849_v37 = vmul.f32 %v8021_v16, %v3778_v15 }
0x1346   : > { %v3864_v63 = vadd.f32 %v3850_v34, %v3848_v10 }
0x1347   : > { %v3863_v62 = vadd.f32 %v3849_v37, %v3847_v57  ;;  %v5855_v37 = vld [vmem:[%s8645_s12 + $0x40] ss:$8 sps:$4 sm:$0xff]  }
0x1348   : > { %v5196_v4 = vpop.f32.mrb[44].mxu0 }
0x1349   : > { %v3852_v24 = vmul.f32 %v8043_v46, %v5196_v4  ;;  %v3788_v8 = vpop.f32.mrb[45].mxu0 }
0x134a   : > { %v3851_v40 = vmul.f32 %v8035_v14, %v3788_v8 }
0x134b   : > { %v3866_v31 = vadd.f32 %v3864_v63, %v3852_v24 }
0x134c   : > { %v3865_v1 = vadd.f32 %v3863_v62, %v3851_v40 }
0x134f   : > { %v5199_v50 = vpop.f32.mrb[46].mxu0 }
0x1350   : > { %v3854_v26 = vmul.f32 %v8057_v38, %v5199_v50  ;;  %v3798_v43 = vpop.f32.mrb[47].mxu0 }
0x1351   : > { %v3853_v55 = vmul.f32 %v8049_v28, %v3798_v43  ;;  %v5858_v43 = vld [vmem:[%s8645_s12 + $0x50] ss:$8 sps:$4 sm:$0xff]  }
0x1352   : > { %v3868_v36 = vadd.f32 %v3866_v31, %v3854_v26  ;;  %v5860_v26 = vld [vmem:[%s8645_s12 + $0x54] ss:$8 sps:$4 sm:$0xff]  }
0x1353   : > { %v3867_v47 = vadd.f32 %v3865_v1, %v3853_v55  ;;  %v5863_v55 = vld [vmem:[%s8645_s12 + $0x64] ss:$8 sps:$4 sm:$0xff]  }
0x1357   : > { %v5202_v44 = vpop.f32.mrb[48].mxu0 }
0x1358   : > { %v3856_v16 = vmul.f32 %v8071_v39, %v5202_v44  ;;  %v3808_v33 = vpop.f32.mrb[49].mxu0  ;;  %v5864_v44 = vld [vmem:[%s8645_s12 + $0x70] ss:$8 sps:$4 sm:$0xff]  }
0x1359   : > { %v3855_v27 = vmul.f32 %v8063_v35, %v3808_v33 }
0x135a   : > { %v3870_v46 = vadd.f32 %v3868_v36, %v3856_v16  ;;  %v5861_v36 = vld [vmem:[%s8645_s12 + $0x60] ss:$8 sps:$4 sm:$0xff]  }
0x135b   : > { %v3869_v42 = vadd.f32 %v3867_v47, %v3855_v27  ;;  %v5866_v47 = vld [vmem:[%s8645_s12 + $0x74] ss:$8 sps:$4 sm:$0xff]  }
0x135f   : > { %v5205_v59 = vpop.f32.mrb[50].mxu0 }
0x1360   : > { %v3858_v14 = vmul.f32 %v8085_v25, %v5205_v59  ;;  %v3818_v21 = vpop.f32.mrb[51].mxu0 }
0x1361   : > { %v3857_v41 = vmul.f32 %v8077_v23, %v3818_v21  ;;  %v6094_v23 = vld [vmem:[#allocation13] sm:$0x3] }
0x1362   : > { %v3872_v38 = vadd.f32 %v3870_v46, %v3858_v14  ;;  %v3881_v61 = vrot.slane %v6094_v23, %v7444_v56  ;;  %v6095_v14 = vld [vmem:[#allocation14] sm:$0x3]  ;;  %v5873_v23 = vld [vmem:[%s8647_s4 + $0xd8] sm:$0xff]  }
0x1363   : > { %v3871_v13 = vadd.f32 %v3869_v42, %v3857_v41  ;;  %v3981_v21 = vrot.slane %v6095_v14, %v7444_v56 }
0x1366   : > { %v5208_v53 = vpop.f32.mrb[52].mxu0 }
0x1367   : > { %v3860_v28 = vmul.f32 %v8099_v29, %v5208_v53  ;;  %v3828_v49 = vpop.f32.mrb[53].mxu0  ;;  %v6096_v53 = vld [vmem:[#allocation16] sm:$0x3] }
0x1368   : > { %v3859_v9 = vmul.f32 %v8091_v58, %v3828_v49 }
0x1369   : > { %v3874_v39 = vadd.f32 %v3872_v38, %v3860_v28  ;;  %v3987_v28 = vrot.slane %v6096_v53, %v7444_v56 }
0x136a   : > { %v3873_v32 = vadd.f32 %v3871_v13, %v3859_v9  ;;  %v5211_v30 = vpop.f32.mrb[54].mxu0 }
0x136b   : > { %v3862_v35 = vmul.f32 %v8113_v7, %v5211_v30  ;;  %v3838_v19 = vpop.f32.mrb[55].mxu0 }
0x136c   : > { %v3861_v48 = vmul.f32 %v8105_v0, %v3838_v19  ;;  %v5867_v19 = vld [vmem:[%s8647_s4 + $0xc0] sm:$0xff]  }
0x136d   : > { %v3876_v25 = vadd.f32 %v3874_v39, %v3862_v35  ;;  %5066 = vmatprep.subr.bf16.mxu1 %v5867_v19 }
0x136e   : > { %v3875_v6 = vadd.f32 %v3873_v32, %v3861_v48  ;;  %v5868_v48 = vld [vmem:[%s8647_s4 + $0x80] sm:$0xff]  }
0x1370   : > { %v3877_v22 = vpack.c.bf16 %v3876_v25, %v3875_v6  ;;  %v5869_v25 = vld [vmem:[%s8647_s4 + $0xc8] sm:$0xff]  }
0x1371   : > { %v5870_v6 = vld [vmem:[%s8647_s4 + $0x88] sm:$0xff]  }
0x1372   : > { %5221 = vmatmul.mubr.msk.bf16.vlgmr.msra.gmra.mrb[48].mxu1 %vm1851_vm7, %v3877_v22  ;;  %v5872_v22 = vld [vmem:[%s8647_s4 + $0x90] sm:$0xff]  }
0x1373   : > { %5067 = vmatpush3.bf16.msra.mxu1 %v5868_v48 }
0x1374   : > { %5068 = vmatprep.subr.bf16.mxu1 %v5869_v25 }
0x1377   : > { %5069 = vmatpush3.bf16.msra.mxu1 %v5870_v6 }
0x1445   : > { %v3943_v29 = vpop.f32.mrb[48].mxu1 }
0x1446   : > { %v3944_v52 = vadd.f32 %v3943_v29, %v3881_v61  ;;  %v5222_v45 = vpop.f32.mrb[49].mxu1  ;;  %v5875_v29 = vld [vmem:[%s8647_s4 + $0xe0] sm:$0xff]  }
0x1447   : > { %v3946_v58 = vpop.f32.mrb[50].mxu1  ;;  %v5877_v45 = vld [vmem:[%s8647_s4 + $0xe8] sm:$0xff]  }
0x1448   : > { %v8318_v10 = vadd.f32 %v3944_v52, %v7950_v18  ;;  %v3947_v34 = vadd.f32 %v3946_v58, %v3881_v61  ;;  %v5223_v7 = vpop.f32.mrb[51].mxu1  ;;  %v5857_v18 = vld [vmem:[%s8645_s12 + $0x44] ss:$8 sps:$4 sm:$0xff]   ;;  %v5874_v61 = vld [vmem:[%s8647_s4 + $0x98] sm:$0xff]  }
0x1449   : > { %4052 = vmatprep.subr.bf16.mxu0 %v5857_v18  ;;  %v5876_v52 = vld [vmem:[%s8647_s4 + $0xa0] sm:$0xff]   ;;  %v5878_v58 = vld [vmem:[%s8647_s4 + $0xa8] sm:$0xff]   ;;  %v5880_v7 = vld [vmem:[%s8647_s4 + $0xb0] sm:$0xff]  }
0x144a   : > { %v8321_v15 = vadd.f32 %v3947_v34, %v7953_v12  ;;  %v3952_v0 = vsel %vm1851_vm7, %v8318_v10, 0.0  ;;  %4053 = vmatpush1.bf16.msra.mxu0 %v5855_v37  ;;  %v5879_v34 = vld [vmem:[%s8647_s4 + $0xf0] sm:$0xff]   ;;  %v6097_v37 = vld [vmem:[%s8649_s9] sm:$0xf] }
0x144b   : > { %3953 = vadd.xlane.f32.xlu1 %v3952_v0  ;;  %4054 = vmatprep.subr.bf16.mxu0 %v5860_v26  ;;  %v5881_v0 = vld [vmem:[%s8647_s4 + $0xf8] sm:$0xff]   ;;  %v3994_v18 = vrot.slane %v6097_v37, %v7444_v56 }
0x144c   : > { %v3955_v57 = vsel %vm1851_vm7, %v8321_v15, 0.0 }
0x144d   : > { %3956 = vadd.xlane.f32.xlu0 %v3955_v57  ;;  %v5882_v57 = vld [vmem:[%s8647_s4 + $0xb8] sm:$0xff]  }
0x144e   : > { %4055 = vmatpush1.bf16.msra.mxu0 %v5858_v43 }
0x144f   : > { %4056 = vmatprep.subr.bf16.mxu0 %v5863_v55 }
0x1452   : > { %4057 = vmatpush1.bf16.msra.mxu0 %v5861_v36 }
0x1453   : > { %4058 = vmatprep.subr.bf16.mxu0 %v5866_v47 }
0x1456   : > { %4059 = vmatpush1.bf16.msra.mxu0 %v5864_v44 }
0x14d8   : > { %v3954_v12 = vpop.xlane.xlu1 %3953 }
0x14d9   : > { %v3958_v63 = vmul.f32 0.015625, %v3954_v12  ;;  %v3998_v12 = vrot.slane %v6097_v37, %v3145_v17 }
0x14da   : > { %v3957_v62 = vpop.xlane.xlu0 %3956 }
0x14db   : > { %v3960_v4 = vsub.f32 %v8318_v10, %v3958_v63  ;;  %v3959_v24 = vmul.f32 0.015625, %v3957_v62  ;;  %v4004_v63 = vrot.slane %v3994_v18, %v7444_v56  ;;  %v4008_v62 = vrot.slane %v3998_v12, %v7444_v56 }
0x14dd   : > { %v3961_v8 = vsub.f32 %v8321_v15, %v3959_v24  ;;  %v3962_v40 = vmul.f32 %v3960_v4, %v3960_v4 }
0x14df   : > { %v3964_v31 = vsel %vm1851_vm7, %v3962_v40, 0.0  ;;  %v3963_v1 = vmul.f32 %v3961_v8, %v3961_v8 }
0x14e0   : > { %3965 = vadd.xlane.f32.xlu1 %v3964_v31 }
0x14e1   : > { %v3967_v50 = vsel %vm1851_vm7, %v3963_v1, 0.0 }
0x14e2   : > { %3968 = vadd.xlane.f32.xlu0 %v3967_v50 }
0x156d   : > { %v3966_v16 = vpop.xlane.xlu1 %3965 }
0x156e   : > { %v3970_v33 = vmul.f32 0.015625, %v3966_v16 }
0x156f   : > { %v3969_v27 = vpop.xlane.xlu0 %3968 }
0x1570   : > { %v3972_v46 = vadd.f32 1e-06, %v3970_v33  ;;  %v3971_v42 = vmul.f32 0.015625, %v3969_v27 }
0x1572   : > { %6051 = vrsqrt.f32 %v3972_v46  ;;  %v3973_v59 = vadd.f32 1e-06, %v3971_v42 }
0x1574   : > { %6053 = vrsqrt.f32 %v3973_v59 }
0x157c   : > { %v6052_v41 = vpop.eup %6051 }
0x157d   : > { %v3976_v38 = vmul.f32 %v6052_v41, %v3960_v4 }
0x157e   : > { %v6054_v13 = vpop.eup %6053 }
0x157f   : > { %v3982_v49 = vmul.f32 %v3981_v21, %v3976_v38  ;;  %v3977_v9 = vmul.f32 %v6054_v13, %v3961_v8 }
0x1581   : > { %v3983_v39 = vmul.f32 %v3981_v21, %v3977_v9  ;;  %v3988_v32 = vadd.f32 %v3987_v28, %v3982_v49 }
0x1583   : > { %v3989_v30 = vadd.f32 %v3987_v28, %v3983_v39 }
0x1585   : > { %v3990_v35 = vpack.c.bf16 %v3989_v30, %v3988_v32 }
0x1587   : > { %4905 = vmatmul.mubr.msk.bf16.vlgmr.msra.gmra.mrb[56].mxu0 %vm1851_vm7, %v3990_v35 }
0x1588   : > { %4484 = vmatprep.mubr.bf16.mxu0 %v6610_v60  ;;  %v5871_v60 = vld [vmem:[%s8647_s4 + $0xd0] sm:$0xff]   ;;  %s6497_s4 = scalar_lea.vmem %s6496_s3, 1024 }
0x1589   : > { %5070 = vmatprep.subr.bf16.mxu1 %v5871_v60  ;;  %p6499_p11 = scmp.lt.s32.totalorder %s6497_s4, %s6491_s6 }
0x158a   : > { %5071 = vmatpush3.bf16.msra.mxu1 %v5872_v22 }
0x158b   : > { %5072 = vmatprep.subr.bf16.mxu1 %v5873_v23  ;;  %p6500_p13 = por %p6499_p11, %p6498_p8 }
0x158d   : > { %p6501_p1 = pnand %p6500_p13, %p6494_p7 }
0x158e   : > { %5073 = vmatpush3.bf16.msra.mxu1 %v5874_v61 }
0x158f   : > { %5074 = vmatprep.subr.bf16.mxu1 %v5875_v29 }
0x1592   : > { %5075 = vmatpush3.bf16.msra.mxu1 %v5876_v52 }
0x1593   : > { %5076 = vmatprep.subr.bf16.mxu1 %v5877_v45 }
0x1596   : > { %5077 = vmatpush3.bf16.msra.mxu1 %v5878_v58 }
0x1597   : > { %5078 = vmatprep.subr.bf16.mxu1 %v5879_v34 }
0x159a   : > { %5079 = vmatpush3.bf16.msra.mxu1 %v5880_v7 }
0x159b   : > { %5080 = vmatprep.subr.bf16.mxu1 %v5881_v0 }
0x159e   : > { %5081 = vmatpush3.bf16.msra.mxu1 %v5882_v57 }
0x165a   : > { %v4086_v4 = vpop.f32.mrb[56].mxu0 }
0x165b   : > { %v8415_v24 = vadd.f32 %v4086_v4, %v4004_v63  ;;  %v4088_v8 = vpop.f32.mrb[57].mxu0 }
0x165c   : > { %v8417_v40 = vadd.f32 %v4088_v8, %v4008_v62  ;;  %v4090_v31 = vpop.f32.mrb[58].mxu0 }
0x165d   : > { %v8420_v1 = vmul.f32 0.70710677, %v8415_v24  ;;  %v8422_v50 = vadd.f32 %v4090_v31, %v4004_v63  ;;  %v4092_v26 = vpop.f32.mrb[59].mxu0 }
0x165e   : > { %v8425_v51 = vmul.f32 0.70710677, %v8417_v40  ;;  %v8431_v55 = vadd.f32 %v4092_v26, %v4008_v62 }
0x165f   : > { %v4111_v17 = vand.u32 2147483647, %v8420_v1  ;;  %v8429_v43 = vmul.f32 0.70710677, %v8422_v50  ;;  %vm4103_vm15 = vcmp.ge.f32.partialorder %v8420_v1, 0.0 }
0x1660   : > { %v4112_v36 = vand.u32 2147483647, %v8425_v51  ;;  %v8436_v27 = vmul.f32 0.70710677, %v8431_v55  ;;  %vm4104_vm0 = vcmp.ge.f32.partialorder %v8425_v51, 0.0 }
0x1661   : > { %v4115_v47 = vmul.f32 0.3275911, %v4111_v17  ;;  %v4113_v16 = vand.u32 2147483647, %v8429_v43  ;;  %v4163_v38 = vsub.f32 0.0, %v4111_v17  ;;  %vm4105_vm1 = vcmp.ge.f32.partialorder %v8429_v43, 0.0 }
0x1662   : > { %v4116_v44 = vmul.f32 0.3275911, %v4112_v36  ;;  %v4114_v59 = vand.u32 2147483647, %v8436_v27  ;;  %v4164_v13 = vsub.f32 0.0, %v4112_v36  ;;  %v4108_v1 = vsel %vm4104_vm0, 1.0, %v6613_v20 }
0x1663   : > { %v4119_v33 = vadd.f32 1.0, %v4115_v47  ;;  %v4117_v42 = vmul.f32 0.3275911, %v4113_v16  ;;  %v4167_v28 = vmul.f32 %v4163_v38, %v4111_v17  ;;  %v4165_v49 = vsub.f32 0.0, %v4113_v16 }
0x1664   : > { %v4120_v46 = vadd.f32 1.0, %v4116_v44  ;;  %v4118_v21 = vmul.f32 0.3275911, %v4114_v59  ;;  %v4168_v32 = vmul.f32 %v4164_v13, %v4112_v36  ;;  %v4166_v35 = vsub.f32 0.0, %v4114_v59 }
0x1665   : > { %6055 = vrcp.f32 %v4119_v33  ;;  %v4121_v14 = vadd.f32 1.0, %v4117_v42  ;;  %v4171_v25 = vmul.f32 1.442695, %v4167_v28  ;;  %v4169_v60 = vmul.f32 %v4165_v49, %v4113_v16 }
0x1666   : > { %6057 = vrcp.f32 %v4120_v46  ;;  %v4122_v41 = vadd.f32 1.0, %v4118_v21  ;;  %v4173_v23 = vmul.f32 1.442695, %v4168_v32  ;;  %v4170_v45 = vmul.f32 %v4166_v35, %v4114_v59 }
0x1667   : > { %6059 = vrcp.f32 %v4121_v14  ;;  %v4175_v57 = vmul.f32 1.442695, %v4169_v60  ;;  %vm4106_vm2 = vcmp.ge.f32.partialorder %v8436_v27, 0.0  ;;  %v4109_v51 = vsel %vm4105_vm1, 1.0, %v6613_v20 }
0x1668   : > { %6061 = vrcp.f32 %v4122_v41  ;;  %v4177_v62 = vmul.f32 1.442695, %v4170_v45  ;;  %v4098_v27 = vmul.f32 0.5, %v8431_v55 }
0x1669   : > { %6063 = vpow2.f32 %v4171_v25 }
0x166a   : > { %6065 = vpow2.f32 %v4173_v23 }
0x166b   : > { %6067 = vpow2.f32 %v4175_v57 }
0x166c   : > { %6069 = vpow2.f32 %v4177_v62 }
0x166f   : > { %v6056_v53 = vpop.eup %6055 }
0x1670   : > { %v6058_v9 = vpop.eup %6057  ;;  %v4127_v39 = vmul.f32 1.0614054, %v6056_v53 }
0x1671   : > { %v4128_v30 = vmul.f32 1.0614054, %v6058_v9  ;;  %v6060_v48 = vpop.eup %6059 }
0x1672   : > { %v4131_v19 = vadd.f32 -1.4531521, %v4127_v39  ;;  %v4129_v61 = vmul.f32 1.0614054, %v6060_v48  ;;  %v6062_v29 = vpop.eup %6061 }
0x1673   : > { %v4132_v6 = vadd.f32 -1.4531521, %v4128_v30  ;;  %v4130_v7 = vmul.f32 1.0614054, %v6062_v29  ;;  %v6064_v41 = vpop.eup %6063 }
0x1674   : > { %v4135_v22 = vmul.f32 %v6056_v53, %v4131_v19  ;;  %v4133_v34 = vadd.f32 -1.4531521, %v4129_v61  ;;  %v6066_v13 = vpop.eup %6065 }
0x1675   : > { %v4136_v52 = vmul.f32 %v6058_v9, %v4132_v6  ;;  %v4134_v12 = vadd.f32 -1.4531521, %v4130_v7  ;;  %v6068_v25 = vpop.eup %6067  ;;  %v4107_v6 = vsel %vm4103_vm15, 1.0, %v6613_v20  ;;  %v4095_v7 = vmul.f32 0.5, %v8415_v24 }
0x1676   : > { %v4139_v58 = vadd.f32 1.4214138, %v4135_v22  ;;  %v4137_v18 = vmul.f32 %v6060_v48, %v4133_v34  ;;  %v6070_v23 = vpop.eup %6069 }
0x1677   : > { %v4140_v0 = vadd.f32 1.4214138, %v4136_v52  ;;  %v4138_v31 = vmul.f32 %v6062_v29, %v4134_v12 }
0x1678   : > { %v4143_v37 = vmul.f32 %v6056_v53, %v4139_v58  ;;  %v4141_v8 = vadd.f32 1.4214138, %v4137_v18  ;;  %v4096_v18 = vmul.f32 0.5, %v8417_v40 }
0x1679   : > { %v4144_v63 = vmul.f32 %v6058_v9, %v4140_v0  ;;  %v4142_v47 = vadd.f32 1.4214138, %v4138_v31  ;;  %v4110_v0 = vsel %vm4106_vm2, 1.0, %v6613_v20  ;;  %v6098_v20 = vld [vmem:[#allocation17] sm:$0x3] }
0x167a   : > { %v4147_v4 = vadd.f32 -0.28449672, %v4143_v37  ;;  %v4145_v36 = vmul.f32 %v6060_v48, %v4141_v8 }
0x167b   : > { %v4148_v26 = vadd.f32 -0.28449672, %v4144_v63  ;;  %v4146_v46 = vmul.f32 %v6062_v29, %v4142_v47 }
0x167c   : > { %v4151_v17 = vmul.f32 %v6056_v53, %v4147_v4  ;;  %v4149_v33 = vadd.f32 -0.28449672, %v4145_v36 }
0x167d   : > { %v4152_v44 = vmul.f32 %v6058_v9, %v4148_v26  ;;  %v4150_v21 = vadd.f32 -0.28449672, %v4146_v46 }
0x167e   : > { %v4155_v16 = vadd.f32 0.2548296, %v4151_v17  ;;  %v4153_v14 = vmul.f32 %v6060_v48, %v4149_v33  ;;  %v4204_v17 = vrot.slane %v6098_v20, %v7444_v56 }
0x167f   : > { %v4156_v42 = vadd.f32 0.2548296, %v4152_v44  ;;  %v4154_v39 = vmul.f32 %v6062_v29, %v4150_v21 }
0x1680   : > { %v4159_v59 = vmul.f32 %v6056_v53, %v4155_v16  ;;  %v4157_v49 = vadd.f32 0.2548296, %v4153_v14 }
0x1681   : > { %v4160_v38 = vmul.f32 %v6058_v9, %v4156_v42  ;;  %v4158_v19 = vadd.f32 0.2548296, %v4154_v39 }
0x1682   : > { %v4179_v28 = vmul.f32 %v6064_v41, %v4159_v59  ;;  %v4161_v35 = vmul.f32 %v6060_v48, %v4157_v49 }
0x1683   : > { %v4180_v32 = vmul.f32 %v6066_v13, %v4160_v38  ;;  %v4162_v22 = vmul.f32 %v6062_v29, %v4158_v19  ;;  %v4097_v29 = vmul.f32 0.5, %v8422_v50  ;;  %v5886_v19 = vld [vmem:[#allocation22 + $0x10] ss:$8 sps:$4 sm:$0xff]  }
0x1684   : > { %v4183_v30 = vsub.f32 1.0, %v4179_v28  ;;  %v4181_v9 = vmul.f32 %v6068_v25, %v4161_v35  ;;  %v5888_v35 = vld [vmem:[#allocation22 + $0x14] ss:$8 sps:$4 sm:$0xff]   ;;  %v5891_v25 = vld [vmem:[#allocation22 + $0x24] ss:$8 sps:$4 sm:$0xff]  }
0x1685   : > { %v4184_v53 = vsub.f32 1.0, %v4180_v32  ;;  %v4182_v45 = vmul.f32 %v6070_v23, %v4162_v22 }
0x1686   : > { %v4187_v60 = vmul.f32 %v4183_v30, %v4107_v6  ;;  %v4185_v52 = vsub.f32 1.0, %v4181_v9  ;;  %v5885_v30 = vld [vmem:[#allocation22 + $0x4] ss:$8 sps:$4 sm:$0xff]   ;;  %v5889_v6 = vld [vmem:[#allocation22 + $0x20] ss:$8 sps:$4 sm:$0xff]  }
0x1687   : > { %v4188_v61 = vmul.f32 %v4184_v53, %v4108_v1  ;;  %v4186_v34 = vsub.f32 1.0, %v4182_v45  ;;  %4452 = vmatprep.subr.bf16.mxu0 %v5885_v30  ;;  %v5892_v53 = vld [vmem:[#allocation22 + $0x30] ss:$8 sps:$4 sm:$0xff]  }
0x1688   : > { %v4191_v48 = vadd.f32 1.0, %v4187_v60  ;;  %v4189_v58 = vmul.f32 %v4185_v52, %v4109_v51  ;;  %v5894_v60 = vld [vmem:[#allocation22 + $0x34] ss:$8 sps:$4 sm:$0xff]  }
0x1689   : > { %v4192_v43 = vadd.f32 1.0, %v4188_v61  ;;  %v4190_v37 = vmul.f32 %v4186_v34, %v4110_v0  ;;  %v4922_v51 = vld [vmem:[#allocation19] ss:$0 sm:$0xff]  ;;  %v4923_v0 = vld [vmem:[#allocation20] ss:$0 sm:$0xff] }
0x168a   : > { %v4193_v57 = vadd.f32 1.0, %v4189_v58  ;;  %v4195_v12 = vmul.f32 %v4191_v48, %v4095_v7 }
0x168b   : > { %v4194_v62 = vadd.f32 1.0, %v4190_v37  ;;  %v4196_v4 = vmul.f32 %v4192_v43, %v4096_v18  ;;  %v4397_v18 = vld [vmem:[#allocation23] sm:$0x3] }
0x168c   : > { %v4197_v63 = vmul.f32 %v4193_v57, %v4097_v29 }
0x168d   : > { %v4198_v31 = vmul.f32 %v4194_v62, %v4098_v27 }
0x168e   : > { %v4199_v8 = vpack.c.bf16 %v4197_v63, %v4195_v12  ;;  %v4402_v12 = vrot.slane %v4397_v18, %v7438_v54  ;;  %v4406_v63 = vrot.slane %v4397_v18, %v7444_v56 }
0x168f   : > { %v4200_v26 = vpack.c.bf16 %v4198_v31, %v4196_v4 }
0x1691   : > { %4333 = vmatprep.mubr.bf16.mxu1 %v4200_v26 }
0x1692   : > { %4334 = vmatmul.mubr.bf16.vlgmr.msra.gmra.mrb[52].mxu1 %v4199_v8 }
0x1765   : > { %v5082_v24 = vpop.f32.mrb[52].mxu1 }
0x1766   : > { %v5083_v50 = vpop.f32.mrb[53].mxu1 }
0x1767   : > { %v5084_v36 = vadd.f32 %v5083_v50, %v5082_v24  ;;  %v5085_v47 = vpop.f32.mrb[54].mxu1 }
0x1768   : > { %v5086_v44 = vpop.f32.mrb[55].mxu1 }
0x1769   : > { %v4336_v40 = vadd.f32 %v5084_v36, %v4204_v17  ;;  %v5087_v16 = vadd.f32 %v5086_v44, %v5085_v47 }
0x176b   : > { %v4339_v33 = vadd.f32 %v5087_v16, %v4204_v17  ;;  %v4342_v55 = vadd.f32 %v4336_v40, %v8318_v10 }
0x176d   : > { %v4346_v46 = vsel %vm1851_vm7, %v4342_v55, 0.0  ;;  %v4343_v42 = vadd.f32 %v4339_v33, %v8321_v15  ;;  %v5883_v15 = vld [vmem:[#allocation22] ss:$8 sps:$4 sm:$0xff]  }
0x176e   : > { %4347 = vadd.xlane.f32.xlu1 %v4346_v46  ;;  %4453 = vmatpush1.bf16.msra.mxu0 %v5883_v15 }
0x176f   : > { %v4349_v59 = vsel %vm1851_vm7, %v4343_v42, 0.0  ;;  %4454 = vmatprep.subr.bf16.mxu0 %v5888_v35 }
0x1770   : > { %4350 = vadd.xlane.f32.xlu0 %v4349_v59 }
0x1772   : > { %4455 = vmatpush1.bf16.msra.mxu0 %v5886_v19 }
0x1773   : > { %4456 = vmatprep.subr.bf16.mxu0 %v5891_v25 }
0x1776   : > { %4457 = vmatpush1.bf16.msra.mxu0 %v5889_v6 }
0x1777   : > { %4458 = vmatprep.subr.bf16.mxu0 %v5894_v60 }
0x177a   : > { %4459 = vmatpush1.bf16.msra.mxu0 %v5892_v53 }
0x17fb   : > { %v4348_v14 = vpop.xlane.xlu1 %4347 }
0x17fc   : > { %v4352_v21 = vmul.f32 0.015625, %v4348_v14 }
0x17fd   : > { %v4351_v41 = vpop.xlane.xlu0 %4350 }
0x17fe   : > { %v4354_v38 = vsub.f32 %v4342_v55, %v4352_v21  ;;  %v4353_v13 = vmul.f32 0.015625, %v4351_v41 }
0x1800   : > { %v4355_v28 = vsub.f32 %v4343_v42, %v4353_v13  ;;  %v4356_v49 = vmul.f32 %v4354_v38, %v4354_v38 }
0x1802   : > { %v4358_v39 = vsel %vm1851_vm7, %v4356_v49, 0.0  ;;  %v4357_v32 = vmul.f32 %v4355_v28, %v4355_v28 }
0x1803   : > { %4359 = vadd.xlane.f32.xlu1 %v4358_v39 }
0x1804   : > { %v4361_v10 = vsel %vm1851_vm7, %v4357_v32, 0.0 }
0x1805   : > { %4362 = vadd.xlane.f32.xlu0 %v4361_v10 }
0x1890   : > { %v4360_v9 = vpop.xlane.xlu1 %4359 }
0x1891   : > { %v4364_v22 = vmul.f32 0.015625, %v4360_v9 }
0x1892   : > { %v4363_v23 = vpop.xlane.xlu0 %4362 }
0x1893   : > { %v4366_v1 = vadd.f32 1e-06, %v4364_v22  ;;  %v4365_v61 = vmul.f32 0.015625, %v4363_v23 }
0x1895   : > { %6071 = vrsqrt.f32 %v4366_v1  ;;  %v4367_v52 = vadd.f32 1e-06, %v4365_v61 }
0x1897   : > { %6073 = vrsqrt.f32 %v4367_v52 }
0x189f   : > { %v6072_v45 = vpop.eup %6071 }
0x18a0   : > { %v4370_v48 = vmul.f32 %v6072_v45, %v4354_v38 }
0x18a1   : > { %v6074_v58 = vpop.eup %6073 }
0x18a2   : > { %v4378_v34 = vmul.f32 %v4922_v51, %v4370_v48  ;;  %v4371_v7 = vmul.f32 %v6074_v58, %v4355_v28 }
0x18a4   : > { %v4379_v43 = vmul.f32 %v4922_v51, %v4371_v7  ;;  %v4386_v29 = vadd.f32 %v4923_v0, %v4378_v34 }
0x18a6   : > { %v4387_v57 = vadd.f32 %v4923_v0, %v4379_v43 }
0x18a8   : > { %v4388_v37 = vpack.c.bf16 %v4387_v57, %v4386_v29 }
0x18aa   : > { %4932 = vmatmul.mubr.msk.bf16.vlgmr.msra.gmra.mrb[60].mxu0 %vm1851_vm7, %v4388_v37 }
0x197d   : > { %v4486_v27 = vpop.f32.mrb[60].mxu0 }
0x197e   : > { %v4487_v62 = vadd.f32 %v4486_v27, %v4402_v12  ;;  %v4488_v4 = vpop.f32.mrb[61].mxu0 }
0x197f   : > { %v4489_v8 = vadd.f32 %v4488_v4, %v4406_v63  ;;  %v4490_v31 = vpop.f32.mrb[62].mxu0 }
0x1980   : > { %v4495_v26 = vadd.f32 %v4487_v62, %v7456_v2  ;;  %v4491_v24 = vadd.f32 %v4490_v31, %v4402_v12  ;;  %v4492_v20 = vpop.f32.mrb[63].mxu0 }
0x1981   : > { %v4496_v17 = vadd.f32 %v4489_v8, %v7459_v3  ;;  %v4493_v50 = vadd.f32 %v4492_v20, %v4406_v63 }
0x1982   : > { %4499 = vst [vmem:[%s943_s5] sm:$0xff] %v4495_v26  ;;  %v4497_v54 = vadd.f32 %v4491_v24, %v7462_v5 }
0x1983   : > { %4500 = vst [vmem:[%s943_s5 + $0x8] sm:$0xff] %v4496_v17  ;;  %v4498_v56 = vadd.f32 %v4493_v50, %v7465_v11 }
0x1984   : > { %4501 = vst [vmem:[%s943_s5 + $0x10] sm:$0xff] %v4497_v54 }
0x1985   : > { %4502 = vst [vmem:[%s943_s5 + $0x18] sm:$0xff] %v4498_v56 }
0x1986   : > { %6504 = shalt.err (!%p6501_p1)
}
0x1987   : > { %s6505_s13 = scalar_lea.hbm %s8472_s2, 512  ;;  %s6509_s1 = scalar_lea.hbm %s8654_s0, 1024 }
0x1988   : > { %p6506_p6 = scmp.ne.s32.totalorder %s8472_s2, %s6505_s13  ;;  %p6510_p10 = scmp.lt.u32.totalorder %s8472_s2, %s8654_s0 }
0x1989   : > { %p6511_p0 = scmp.lt.u32.totalorder %s6509_s1, %s6505_s13  ;;  %p6513_p3 = scmp.lt.u32.totalorder %s6505_s13, %s8472_s2 }
0x198a   : > { %p6507_p9 = pnand %p6506_p6, %p8655_p4 }
0x198b   : > { %p6512_p2 = por %p6511_p0, %p6510_p10 }
0x198c   : > { %p6508_p5 = pneg %p6507_p9 }
0x198d   : > { %p6514_p12 = por %p6513_p3, %p6512_p2 }
0x198f   : > { %p6515_p7 = pnand %p6514_p12, %p6508_p5 }
0x1991   : > { %6518 = shalt.err (!%p6515_p7)
}
0x1992   : > { %s6615_s4 = smov 256   ;;  %s6616_s30 = smov 16  }
0x1993   : > { %5514 = dma.vmem_to_hbm [thread:$0]  (%p8655_p4), %s8465_s28, 512, %s8472_s2, %s8474_s7, %s6615_s4, %s6615_s4, %s6616_s30  }
0x1994 PF: > { %s8656_s29 = sld [smem:[#allocation38_spill]]  ;;  %s8657_s6 = sld [smem:[#allocation35_spill]] }
0x1995   : > { %s8658_s5 = sld [smem:[#allocation42_spill]] }
0x199a   : > { %p5591_p8 = scmp.ge.s32.totalorder %s8656_s29, 2  ;;  %s4532_s25 = sand.u32 1, %s8657_s6  }
0x199b   : > { %p8659_p11 = scmp.ne.s32.totalorder %s8658_s5, 0  ;;  %s4533_s13 = scalar_lea.sflag [#allocation4], %s4532_s25 }
0x199d   : > { %p5560_p13 = pnand %p5591_p8, %p8659_p11 }
0x199f   : > { %6568 = dma.done.wait (!%p5560_p13), %s4533_s13, 512  }
0x19a0   : > { %6570 = vsyncadd (!%p5560_p13), %s4533_s13, 4294966784  ;;  %s8660_s30 = sld [smem:[#allocation39_spill]]  ;;  %s8661_s29 = sld [smem:[#allocation36_spill]] }
0x19a1   : > { %s8662_s2 = sld [smem:[#allocation37_spill]]  ;;  %s8663_s6 = sld [smem:[#allocation40_spill]] }
0x19a6   : > { %p43_p1 = scmp.ge.s32.totalorder %s8660_s30, 4  }
0x19a8   :  { %45 = sbr.rel (!%p43_p1) target bundleno = 30 (0x1e), region = 212 }
0x19af   :  { %4538 = vsyncpa [#allocation3], 1 }
0x19b0   :  { %4540 = vsyncpa [#allocation3 + $0x1], 1 }
0x19b1   :  { %4541 = vsyncpa [#allocation6], 1 }
0x19b2   :  { %4542 = vsyncpa [#allocation9], 1 }
0x19b3   :  { %4543 = vsyncpa [#allocation12], 1 }
0x19b4   :  { %4544 = vsyncpa [#allocation15], 1 }
0x19b5   :  { %4545 = vsyncpa [#allocation18], 1 }
0x19b6   :  { %4546 = vsyncpa [#allocation21], 1 }
0x19b7   :  { %4547 = vsyncpa [#allocation24], 1 }
0x19b8   :  { %4548 = vsyncpa [#allocation4], 1 }
0x19b9   :  { %4550 = vsyncpa [#allocation4 + $0x1], 1 }

</bundles_post_ra>
